<compile_context>
chip_gen: v7x
topology: tpu7x:2x2x1
jax: 0.10.0
libtpu: 0.0.40
codegen_flags: <defaults>
</compile_context>

<pallas_src>
import functools

import jax
import jax.numpy as jnp
from jax.experimental import pallas as pl
from jax.experimental.pallas import tpu as pltpu

KSIZE = 7
PAD = 3  # padding = 3 for kernel_size = 7


def _pick_c_tile(C, HW, budget_bytes=4 * 1024 * 1024):
    """Largest channel tile whose x block fits the per-block VMEM budget.

    Prefers C_TILE == C (full axis) or a multiple-of-8 divisor of C so the
    block's second-to-minor dim satisfies the (8, 128) tiling rule.
    """
    if C * HW * 4 <= budget_bytes:
        return C
    fallback = 1
    for t in range(C - 1, 0, -1):
        if C % t != 0 or t * HW * 4 > budget_bytes:
            continue
        if t % 8 == 0:
            return t
        fallback = max(fallback, t)
    return fallback


def spatial_attention_kernel(w_ref, x_ref, o_ref, sum_ref, max_ref, pad_ref,
                             *, C, H, W):
    # w_ref   : SMEM f32[2*7*7]        conv weights, flattened [in_c, kh, kw]
    # x_ref   : VMEM f32[1, C_TILE, H*W]  one channel tile of one image
    # o_ref   : VMEM f32[1, 1, H*W]    spatial attention map (lane-dense)
    # sum_ref : VMEM f32[1, H*W]       running channel sum   (resident over k)
    # max_ref : VMEM f32[1, H*W]       running channel max   (resident over k)
    # pad_ref : VMEM f32[2, H+6, W+6]  zero-padded [avg; max] maps for the conv
    k = pl.program_id(1)

    blk = x_ref[0]                                     # (C_TILE, H*W)
    if blk.dtype != jnp.float32:
        blk = blk.astype(jnp.float32)
    part_sum = jnp.sum(blk, axis=0, keepdims=True)     # (1, H*W)
    part_max = jnp.max(blk, axis=0, keepdims=True)     # (1, H*W)

    @pl.when(k == 0)
    def _init():
        sum_ref[...] = jnp.zeros(sum_ref.shape, sum_ref.dtype)
        max_ref[...] = jnp.full(max_ref.shape, -jnp.inf, max_ref.dtype)

    sum_ref[...] = sum_ref[...] + part_sum
    max_ref[...] = jnp.maximum(max_ref[...], part_max)

    @pl.when(k == pl.num_programs(1) - 1)
    def _finalize():
        Hp = H + 2 * PAD
        Wp = W + 2 * PAD
        inv_c = 1.0 / C  # static python constant; reciprocal hoisted

        # Zero only the 3-wide halo (interior is fully overwritten below).
        for c in range(2):
            pad_ref[c, 0:PAD, :] = jnp.zeros((PAD, Wp), jnp.float32)
            pad_ref[c, PAD + H:Hp, :] = jnp.zeros((PAD, Wp), jnp.float32)
            pad_ref[c, PAD:PAD + H, 0:PAD] = jnp.zeros((H, PAD), jnp.float32)
            pad_ref[c, PAD:PAD + H, PAD + W:Wp] = jnp.zeros((H, PAD),
                                                            jnp.float32)

        # Un-flatten the lane-dense accumulators into the padded 2-D planes
        # via per-row ref slice loads/stores (no in-kernel reshape needed).
        for h in range(H):
            lo = h * W
            pad_ref[0, PAD + h:PAD + h + 1, PAD:PAD + W] = (
                sum_ref[:, lo:lo + W] * inv_c)
            pad_ref[1, PAD + h:PAD + h + 1, PAD:PAD + W] = (
                max_ref[:, lo:lo + W])

        # 7x7 conv, 2 in-channels -> 1 out-channel, no bias.  The kw
        # (lane-direction) shift is hoisted out of the kh loop: 7 lane-shifted
        # loads per channel, then 49 sublane-offset slices + VPU FMAs each.
        acc = jnp.zeros((H, W), jnp.float32)
        for c in range(2):
            for kw in range(KSIZE):
                shifted = pad_ref[c, :, kw:kw + W]     # (H+6, W)
                for kh in range(KSIZE):
                    wv = w_ref[c * KSIZE * KSIZE + kh * KSIZE + kw]
                    acc = acc + shifted[kh:kh + H, :] * wv

        sig = jax.nn.sigmoid(acc)                      # (H, W)

        # Write the output lane-dense (flattened H*W in the minor dim).
        for h in range(H):
            o_ref[0, :, h * W:(h + 1) * W] = sig[h:h + 1, :]


def spatial_attention(x, weight):
    """x: (N, C, H, W); weight: (1, 2, 7, 7) -> (N, 1, H, W) float32."""
    N, C, H, W = x.shape
    HW = H * W

    x_flat = x.reshape(N, C, HW)                       # lane-dense layout
    w_flat = weight.reshape(-1).astype(jnp.float32)    # (98,)

    c_tile = _pick_c_tile(C, HW)
    assert C % c_tile == 0
    kc = C // c_tile

    kernel = functools.partial(spatial_attention_kernel, C=C, H=H, W=W)

    grid_spec = pltpu.PrefetchScalarGridSpec(
        num_scalar_prefetch=0,
        grid=(N, kc),                                  # reduction axis last
        in_specs=[
            pl.BlockSpec(memory_space=pltpu.MemorySpace.SMEM),       # weights
            pl.BlockSpec((1, c_tile, HW), lambda n, k: (n, k, 0)),   # x tile
        ],
        out_specs=pl.BlockSpec((1, 1, HW), lambda n, k: (n, 0, 0)),
        scratch_shapes=[
            pltpu.VMEM((1, HW), jnp.float32),                  # running sum
            pltpu.VMEM((1, HW), jnp.float32),                  # running max
            pltpu.VMEM((2, H + 2 * PAD, W + 2 * PAD), jnp.float32),  # padded
        ],
    )

    out_flat = pl.pallas_call(
        kernel,
        out_shape=jax.ShapeDtypeStruct((N, 1, HW), jnp.float32),
        grid_spec=grid_spec,
        compiler_params=pltpu.CompilerParams(
            dimension_semantics=("parallel", "arbitrary"),
            vmem_limit_bytes=32 * 1024 * 1024,
        ),
    )(w_flat, x_flat)

    return out_flat.reshape(N, 1, H, W)


def spatial_attention_reference(x, weight):
    avg = jnp.mean(x, axis=1, keepdims=True)
    mx = jnp.max(x, axis=1, keepdims=True)
    cat = jnp.concatenate([avg, mx], axis=1)
    out = jax.lax.conv_general_dilated(
        cat, weight, window_strides=(1, 1),
        padding=((PAD, PAD), (PAD, PAD)),
        dimension_numbers=("NCHW", "OIHW", "NCHW"))
    return jax.nn.sigmoid(out)


if __name__ == "__main__":
    key = jax.random.PRNGKey(0)
    kx, kw = jax.random.split(key)

    N, C, H, W = 2, 4, 16, 16
    x = jax.random.normal(kx, (N, C, H, W), dtype=jnp.float32)

    # Deterministic conv weight init (PyTorch-style kaiming-uniform bound).
    fan_in = 2 * KSIZE * KSIZE
    bound = 1.0 / (fan_in ** 0.5)
    weight = jax.random.uniform(
        kw, (1, 2, KSIZE, KSIZE), minval=-bound, maxval=bound,
        dtype=jnp.float32)

    out = spatial_attention(x, weight)
    out = jax.block_until_ready(out)

    ref = spatial_attention_reference(x, weight)
    assert out.shape == (N, 1, H, W)
    assert jnp.allclose(out, ref, atol=1e-5, rtol=1e-5), (
        f"max err {jnp.max(jnp.abs(out - ref))}")

    print("KERNEL_OK")
</pallas_src>

<mosaic_0001>
module attributes {stable_mosaic.version = 11 : i64} {
  func.func @spatial_attention_kernel(%arg0: i32, %arg1: i32, %arg2: memref<98xf32, #tpu.memory_space<smem>>, %arg3: memref<1x4x256xf32, #tpu.memory_space<vmem>>, %arg4: memref<1x1x256xf32, #tpu.memory_space<vmem>>, %arg5: memref<1x256xf32, #tpu.memory_space<vmem>>, %arg6: memref<1x256xf32, #tpu.memory_space<vmem>>, %arg7: memref<2x22x22xf32, #tpu.memory_space<vmem>>) attributes {dimension_semantics = [#tpu.dimension_semantics<parallel>, #tpu.dimension_semantics<arbitrary>], iteration_bounds = array<i64: 2, 1>, scalar_prefetch = 0 : i64, scratch_operands = 3 : i64, tpu.core_type = #tpu.core_type<tc>, window_params = [{transform_indices = @transform_0, window_bounds = array<i64: 98>}, {transform_indices = @transform_1, window_bounds = array<i64: 1, 4, 256>}, {transform_indices = @transform_2, window_bounds = array<i64: 1, 1, 256>}]} {
    %c0 = arith.constant 0 : index
    %c0_0 = arith.constant 0 : index
    %c0_1 = arith.constant 0 : index
    %0 = vector.load %arg3[%c0, %c0_0, %c0_1] : memref<1x4x256xf32, #tpu.memory_space<vmem>>, vector<1x4x256xf32>
    %1 = vector.shape_cast %0 : vector<1x4x256xf32> to vector<4x256xf32>
    %cst = arith.constant dense<0.000000e+00> : vector<256xf32>
    %2 = vector.multi_reduction <add>, %1, %cst [0] : vector<4x256xf32> to vector<256xf32>
    %3 = vector.shape_cast %2 : vector<256xf32> to vector<1x256xf32>
    %cst_2 = arith.constant dense<0xFF800000> : vector<256xf32>
    %4 = vector.multi_reduction <maximumf>, %1, %cst_2 [0] : vector<4x256xf32> to vector<256xf32>
    %5 = vector.shape_cast %4 : vector<256xf32> to vector<1x256xf32>
    %c0_i32 = arith.constant 0 : i32
    %6 = arith.cmpi eq, %arg1, %c0_i32 : i32
    %7 = arith.extui %6 : i1 to i32
    %c0_i32_3 = arith.constant 0 : i32
    %8 = arith.cmpi ne, %7, %c0_i32_3 : i32
    scf.if %8 {
      %cst_14 = arith.constant 0.000000e+00 : f32
      %18 = vector.broadcast %cst_14 : f32 to vector<1x256xf32>
      %c0_15 = arith.constant 0 : index
      %c0_16 = arith.constant 0 : index
      %19 = vector.load %arg5[%c0_15, %c0_16] : memref<1x256xf32, #tpu.memory_space<vmem>>, vector<1x256xf32>
      tpu.vector_store %arg5[%c0_15, %c0_16], %18 {strides = array<i32>} : memref<1x256xf32, #tpu.memory_space<vmem>>, vector<1x256xf32>,
      %cst_17 = arith.constant 0xFF800000 : f32
      %20 = vector.broadcast %cst_17 : f32 to vector<1x256xf32>
      %c0_18 = arith.constant 0 : index
      %c0_19 = arith.constant 0 : index
      %21 = vector.load %arg6[%c0_18, %c0_19] : memref<1x256xf32, #tpu.memory_space<vmem>>, vector<1x256xf32>
      tpu.vector_store %arg6[%c0_18, %c0_19], %20 {strides = array<i32>} : memref<1x256xf32, #tpu.memory_space<vmem>>, vector<1x256xf32>,
    } else {
    }
    %c0_4 = arith.constant 0 : index
    %c0_5 = arith.constant 0 : index
    %9 = vector.load %arg5[%c0_4, %c0_5] : memref<1x256xf32, #tpu.memory_space<vmem>>, vector<1x256xf32>
    %10 = arith.addf %9, %3 : vector<1x256xf32>
    %c0_6 = arith.constant 0 : index
    %c0_7 = arith.constant 0 : index
    %11 = vector.load %arg5[%c0_6, %c0_7] : memref<1x256xf32, #tpu.memory_space<vmem>>, vector<1x256xf32>
    tpu.vector_store %arg5[%c0_6, %c0_7], %10 {strides = array<i32>} : memref<1x256xf32, #tpu.memory_space<vmem>>, vector<1x256xf32>,
    %c0_8 = arith.constant 0 : index
    %c0_9 = arith.constant 0 : index
    %12 = vector.load %arg6[%c0_8, %c0_9] : memref<1x256xf32, #tpu.memory_space<vmem>>, vector<1x256xf32>
    %13 = arith.maximumf %12, %5 : vector<1x256xf32>
    %c0_10 = arith.constant 0 : index
    %c0_11 = arith.constant 0 : index
    %14 = vector.load %arg6[%c0_10, %c0_11] : memref<1x256xf32, #tpu.memory_space<vmem>>, vector<1x256xf32>
    tpu.vector_store %arg6[%c0_10, %c0_11], %13 {strides = array<i32>} : memref<1x256xf32, #tpu.memory_space<vmem>>, vector<1x256xf32>,
    %c0_i32_12 = arith.constant 0 : i32
    %15 = arith.cmpi eq, %arg1, %c0_i32_12 : i32
    %16 = arith.extui %15 : i1 to i32
    %c0_i32_13 = arith.constant 0 : i32
    %17 = arith.cmpi ne, %16, %c0_i32_13 : i32
    scf.if %17 {
      %cst_14 = arith.constant 0.000000e+00 : f32
      %18 = vector.broadcast %cst_14 : f32 to vector<3x22xf32>
      %c0_15 = arith.constant 0 : index
      %c0_16 = arith.constant 0 : index
      %c0_17 = arith.constant 0 : index
      %19 = vector.load %arg7[%c0_15, %c0_16, %c0_17] : memref<2x22x22xf32, #tpu.memory_space<vmem>>, vector<1x3x22xf32>
      %20 = vector.shape_cast %19 : vector<1x3x22xf32> to vector<3x22xf32>
      %21 = vector.shape_cast %18 : vector<3x22xf32> to vector<1x3x22xf32>
      tpu.vector_store %arg7[%c0_15, %c0_16, %c0_17], %21 {strides = array<i32>} : memref<2x22x22xf32, #tpu.memory_space<vmem>>, vector<1x3x22xf32>,
      %cst_18 = arith.constant 0.000000e+00 : f32
      %22 = vector.broadcast %cst_18 : f32 to vector<3x22xf32>
      %c0_19 = arith.constant 0 : index
      %c19 = arith.constant 19 : index
      %c0_20 = arith.constant 0 : index
      %23 = vector.load %arg7[%c0_19, %c19, %c0_20] : memref<2x22x22xf32, #tpu.memory_space<vmem>>, vector<1x3x22xf32>
      %24 = vector.shape_cast %23 : vector<1x3x22xf32> to vector<3x22xf32>
      %25 = vector.shape_cast %22 : vector<3x22xf32> to vector<1x3x22xf32>
      tpu.vector_store %arg7[%c0_19, %c19, %c0_20], %25 {strides = array<i32>} : memref<2x22x22xf32, #tpu.memory_space<vmem>>, vector<1x3x22xf32>,
      %cst_21 = arith.constant 0.000000e+00 : f32
      %26 = vector.broadcast %cst_21 : f32 to vector<16x3xf32>
      %c0_22 = arith.constant 0 : index
      %c3 = arith.constant 3 : index
      %c0_23 = arith.constant 0 : index
      %27 = vector.load %arg7[%c0_22, %c3, %c0_23] : memref<2x22x22xf32, #tpu.memory_space<vmem>>, vector<1x16x3xf32>
      %28 = vector.shape_cast %27 : vector<1x16x3xf32> to vector<16x3xf32>
      %29 = vector.shape_cast %26 : vector<16x3xf32> to vector<1x16x3xf32>
      tpu.vector_store %arg7[%c0_22, %c3, %c0_23], %29 {strides = array<i32>} : memref<2x22x22xf32, #tpu.memory_space<vmem>>, vector<1x16x3xf32>,
      %cst_24 = arith.constant 0.000000e+00 : f32
      %30 = vector.broadcast %cst_24 : f32 to vector<16x3xf32>
      %c0_25 = arith.constant 0 : index
      %c3_26 = arith.constant 3 : index
      %c19_27 = arith.constant 19 : index
      %31 = vector.load %arg7[%c0_25, %c3_26, %c19_27] : memref<2x22x22xf32, #tpu.memory_space<vmem>>, vector<1x16x3xf32>
      %32 = vector.shape_cast %31 : vector<1x16x3xf32> to vector<16x3xf32>
      %33 = vector.shape_cast %30 : vector<16x3xf32> to vector<1x16x3xf32>
      tpu.vector_store %arg7[%c0_25, %c3_26, %c19_27], %33 {strides = array<i32>} : memref<2x22x22xf32, #tpu.memory_space<vmem>>, vector<1x16x3xf32>,
      %cst_28 = arith.constant 0.000000e+00 : f32
      %34 = vector.broadcast %cst_28 : f32 to vector<3x22xf32>
      %c1 = arith.constant 1 : index
      %c0_29 = arith.constant 0 : index
      %c0_30 = arith.constant 0 : index
      %35 = vector.load %arg7[%c1, %c0_29, %c0_30] : memref<2x22x22xf32, #tpu.memory_space<vmem>>, vector<1x3x22xf32>
      %36 = vector.shape_cast %35 : vector<1x3x22xf32> to vector<3x22xf32>
      %37 = vector.shape_cast %34 : vector<3x22xf32> to vector<1x3x22xf32>
      tpu.vector_store %arg7[%c1, %c0_29, %c0_30], %37 {strides = array<i32>} : memref<2x22x22xf32, #tpu.memory_space<vmem>>, vector<1x3x22xf32>,
      %cst_31 = arith.constant 0.000000e+00 : f32
      %38 = vector.broadcast %cst_31 : f32 to vector<3x22xf32>
      %c1_32 = arith.constant 1 : index
      %c19_33 = arith.constant 19 : index
      %c0_34 = arith.constant 0 : index
      %39 = vector.load %arg7[%c1_32, %c19_33, %c0_34] : memref<2x22x22xf32, #tpu.memory_space<vmem>>, vector<1x3x22xf32>
      %40 = vector.shape_cast %39 : vector<1x3x22xf32> to vector<3x22xf32>
      %41 = vector.shape_cast %38 : vector<3x22xf32> to vector<1x3x22xf32>
      tpu.vector_store %arg7[%c1_32, %c19_33, %c0_34], %41 {strides = array<i32>} : memref<2x22x22xf32, #tpu.memory_space<vmem>>, vector<1x3x22xf32>,
      %cst_35 = arith.constant 0.000000e+00 : f32
      %42 = vector.broadcast %cst_35 : f32 to vector<16x3xf32>
      %c1_36 = arith.constant 1 : index
      %c3_37 = arith.constant 3 : index
      %c0_38 = arith.constant 0 : index
      %43 = vector.load %arg7[%c1_36, %c3_37, %c0_38] : memref<2x22x22xf32, #tpu.memory_space<vmem>>, vector<1x16x3xf32>
      %44 = vector.shape_cast %43 : vector<1x16x3xf32> to vector<16x3xf32>
      %45 = vector.shape_cast %42 : vector<16x3xf32> to vector<1x16x3xf32>
      tpu.vector_store %arg7[%c1_36, %c3_37, %c0_38], %45 {strides = array<i32>} : memref<2x22x22xf32, #tpu.memory_space<vmem>>, vector<1x16x3xf32>,
      %cst_39 = arith.constant 0.000000e+00 : f32
      %46 = vector.broadcast %cst_39 : f32 to vector<16x3xf32>
      %c1_40 = arith.constant 1 : index
      %c3_41 = arith.constant 3 : index
      %c19_42 = arith.constant 19 : index
      %47 = vector.load %arg7[%c1_40, %c3_41, %c19_42] : memref<2x22x22xf32, #tpu.memory_space<vmem>>, vector<1x16x3xf32>
      %48 = vector.shape_cast %47 : vector<1x16x3xf32> to vector<16x3xf32>
      %49 = vector.shape_cast %46 : vector<16x3xf32> to vector<1x16x3xf32>
      tpu.vector_store %arg7[%c1_40, %c3_41, %c19_42], %49 {strides = array<i32>} : memref<2x22x22xf32, #tpu.memory_space<vmem>>, vector<1x16x3xf32>,
      %c0_43 = arith.constant 0 : index
      %c0_44 = arith.constant 0 : index
      %50 = vector.load %arg5[%c0_43, %c0_44] : memref<1x256xf32, #tpu.memory_space<vmem>>, vector<1x16xf32>
      %cst_45 = arith.constant 2.500000e-01 : f32
      %51 = vector.broadcast %cst_45 : f32 to vector<1x16xf32>
      %52 = arith.mulf %50, %51 : vector<1x16xf32>
      %c0_46 = arith.constant 0 : index
      %c3_47 = arith.constant 3 : index
      %c3_48 = arith.constant 3 : index
      %53 = vector.load %arg7[%c0_46, %c3_47, %c3_48] : memref<2x22x22xf32, #tpu.memory_space<vmem>>, vector<1x1x16xf32>
      %54 = vector.shape_cast %53 : vector<1x1x16xf32> to vector<1x16xf32>
      %55 = vector.shape_cast %52 : vector<1x16xf32> to vector<1x1x16xf32>
      tpu.vector_store %arg7[%c0_46, %c3_47, %c3_48], %55 {strides = array<i32>} : memref<2x22x22xf32, #tpu.memory_space<vmem>>, vector<1x1x16xf32>,
      %c0_49 = arith.constant 0 : index
      %c0_50 = arith.constant 0 : index
      %56 = vector.load %arg6[%c0_49, %c0_50] : memref<1x256xf32, #tpu.memory_space<vmem>>, vector<1x16xf32>
      %c1_51 = arith.constant 1 : index
      %c3_52 = arith.constant 3 : index
      %c3_53 = arith.constant 3 : index
      %57 = vector.load %arg7[%c1_51, %c3_52, %c3_53] : memref<2x22x22xf32, #tpu.memory_space<vmem>>, vector<1x1x16xf32>
      %58 = vector.shape_cast %57 : vector<1x1x16xf32> to vector<1x16xf32>
      %59 = vector.shape_cast %56 : vector<1x16xf32> to vector<1x1x16xf32>
      tpu.vector_store %arg7[%c1_51, %c3_52, %c3_53], %59 {strides = array<i32>} : memref<2x22x22xf32, #tpu.memory_space<vmem>>, vector<1x1x16xf32>,
      %c0_54 = arith.constant 0 : index
      %c16 = arith.constant 16 : index
      %60 = vector.load %arg5[%c0_54, %c16] : memref<1x256xf32, #tpu.memory_space<vmem>>, vector<1x16xf32>
      %cst_55 = arith.constant 2.500000e-01 : f32
      %61 = vector.broadcast %cst_55 : f32 to vector<1x16xf32>
      %62 = arith.mulf %60, %61 : vector<1x16xf32>
      %c0_56 = arith.constant 0 : index
      %c4 = arith.constant 4 : index
      %c3_57 = arith.constant 3 : index
      %63 = vector.load %arg7[%c0_56, %c4, %c3_57] : memref<2x22x22xf32, #tpu.memory_space<vmem>>, vector<1x1x16xf32>
      %64 = vector.shape_cast %63 : vector<1x1x16xf32> to vector<1x16xf32>
      %65 = vector.shape_cast %62 : vector<1x16xf32> to vector<1x1x16xf32>
      tpu.vector_store %arg7[%c0_56, %c4, %c3_57], %65 {strides = array<i32>} : memref<2x22x22xf32, #tpu.memory_space<vmem>>, vector<1x1x16xf32>,
      %c0_58 = arith.constant 0 : index
      %c16_59 = arith.constant 16 : index
      %66 = vector.load %arg6[%c0_58, %c16_59] : memref<1x256xf32, #tpu.memory_space<vmem>>, vector<1x16xf32>
      %c1_60 = arith.constant 1 : index
      %c4_61 = arith.constant 4 : index
      %c3_62 = arith.constant 3 : index
      %67 = vector.load %arg7[%c1_60, %c4_61, %c3_62] : memref<2x22x22xf32, #tpu.memory_space<vmem>>, vector<1x1x16xf32>
      %68 = vector.shape_cast %67 : vector<1x1x16xf32> to vector<1x16xf32>
      %69 = vector.shape_cast %66 : vector<1x16xf32> to vector<1x1x16xf32>
      tpu.vector_store %arg7[%c1_60, %c4_61, %c3_62], %69 {strides = array<i32>} : memref<2x22x22xf32, #tpu.memory_space<vmem>>, vector<1x1x16xf32>,
      %c0_63 = arith.constant 0 : index
      %c32 = arith.constant 32 : index
      %70 = vector.load %arg5[%c0_63, %c32] : memref<1x256xf32, #tpu.memory_space<vmem>>, vector<1x16xf32>
      %cst_64 = arith.constant 2.500000e-01 : f32
      %71 = vector.broadcast %cst_64 : f32 to vector<1x16xf32>
      %72 = arith.mulf %70, %71 : vector<1x16xf32>
      %c0_65 = arith.constant 0 : index
      %c5 = arith.constant 5 : index
      %c3_66 = arith.constant 3 : index
      %73 = vector.load %arg7[%c0_65, %c5, %c3_66] : memref<2x22x22xf32, #tpu.memory_space<vmem>>, vector<1x1x16xf32>
      %74 = vector.shape_cast %73 : vector<1x1x16xf32> to vector<1x16xf32>
      %75 = vector.shape_cast %72 : vector<1x16xf32> to vector<1x1x16xf32>
      tpu.vector_store %arg7[%c0_65, %c5, %c3_66], %75 {strides = array<i32>} : memref<2x22x22xf32, #tpu.memory_space<vmem>>, vector<1x1x16xf32>,
      %c0_67 = arith.constant 0 : index
      %c32_68 = arith.constant 32 : index
      %76 = vector.load %arg6[%c0_67, %c32_68] : memref<1x256xf32, #tpu.memory_space<vmem>>, vector<1x16xf32>
      %c1_69 = arith.constant 1 : index
      %c5_70 = arith.constant 5 : index
      %c3_71 = arith.constant 3 : index
      %77 = vector.load %arg7[%c1_69, %c5_70, %c3_71] : memref<2x22x22xf32, #tpu.memory_space<vmem>>, vector<1x1x16xf32>
      %78 = vector.shape_cast %77 : vector<1x1x16xf32> to vector<1x16xf32>
      %79 = vector.shape_cast %76 : vector<1x16xf32> to vector<1x1x16xf32>
      tpu.vector_store %arg7[%c1_69, %c5_70, %c3_71], %79 {strides = array<i32>} : memref<2x22x22xf32, #tpu.memory_space<vmem>>, vector<1x1x16xf32>,
      %c0_72 = arith.constant 0 : index
      %c48 = arith.constant 48 : index
      %80 = vector.load %arg5[%c0_72, %c48] : memref<1x256xf32, #tpu.memory_space<vmem>>, vector<1x16xf32>
      %cst_73 = arith.constant 2.500000e-01 : f32
      %81 = vector.broadcast %cst_73 : f32 to vector<1x16xf32>
      %82 = arith.mulf %80, %81 : vector<1x16xf32>
      %c0_74 = arith.constant 0 : index
      %c6 = arith.constant 6 : index
      %c3_75 = arith.constant 3 : index
      %83 = vector.load %arg7[%c0_74, %c6, %c3_75] : memref<2x22x22xf32, #tpu.memory_space<vmem>>, vector<1x1x16xf32>
      %84 = vector.shape_cast %83 : vector<1x1x16xf32> to vector<1x16xf32>
      %85 = vector.shape_cast %82 : vector<1x16xf32> to vector<1x1x16xf32>
      tpu.vector_store %arg7[%c0_74, %c6, %c3_75], %85 {strides = array<i32>} : memref<2x22x22xf32, #tpu.memory_space<vmem>>, vector<1x1x16xf32>,
      %c0_76 = arith.constant 0 : index
      %c48_77 = arith.constant 48 : index
      %86 = vector.load %arg6[%c0_76, %c48_77] : memref<1x256xf32, #tpu.memory_space<vmem>>, vector<1x16xf32>
      %c1_78 = arith.constant 1 : index
      %c6_79 = arith.constant 6 : index
      %c3_80 = arith.constant 3 : index
      %87 = vector.load %arg7[%c1_78, %c6_79, %c3_80] : memref<2x22x22xf32, #tpu.memory_space<vmem>>, vector<1x1x16xf32>
      %88 = vector.shape_cast %87 : vector<1x1x16xf32> to vector<1x16xf32>
      %89 = vector.shape_cast %86 : vector<1x16xf32> to vector<1x1x16xf32>
      tpu.vector_store %arg7[%c1_78, %c6_79, %c3_80], %89 {strides = array<i32>} : memref<2x22x22xf32, #tpu.memory_space<vmem>>, vector<1x1x16xf32>,
      %c0_81 = arith.constant 0 : index
      %c64 = arith.constant 64 : index
      %90 = vector.load %arg5[%c0_81, %c64] : memref<1x256xf32, #tpu.memory_space<vmem>>, vector<1x16xf32>
      %cst_82 = arith.constant 2.500000e-01 : f32
      %91 = vector.broadcast %cst_82 : f32 to vector<1x16xf32>
      %92 = arith.mulf %90, %91 : vector<1x16xf32>
      %c0_83 = arith.constant 0 : index
      %c7 = arith.constant 7 : index
      %c3_84 = arith.constant 3 : index
      %93 = vector.load %arg7[%c0_83, %c7, %c3_84] : memref<2x22x22xf32, #tpu.memory_space<vmem>>, vector<1x1x16xf32>
      %94 = vector.shape_cast %93 : vector<1x1x16xf32> to vector<1x16xf32>
      %95 = vector.shape_cast %92 : vector<1x16xf32> to vector<1x1x16xf32>
      tpu.vector_store %arg7[%c0_83, %c7, %c3_84], %95 {strides = array<i32>} : memref<2x22x22xf32, #tpu.memory_space<vmem>>, vector<1x1x16xf32>,
      %c0_85 = arith.constant 0 : index
      %c64_86 = arith.constant 64 : index
      %96 = vector.load %arg6[%c0_85, %c64_86] : memref<1x256xf32, #tpu.memory_space<vmem>>, vector<1x16xf32>
      %c1_87 = arith.constant 1 : index
      %c7_88 = arith.constant 7 : index
      %c3_89 = arith.constant 3 : index
      %97 = vector.load %arg7[%c1_87, %c7_88, %c3_89] : memref<2x22x22xf32, #tpu.memory_space<vmem>>, vector<1x1x16xf32>
      %98 = vector.shape_cast %97 : vector<1x1x16xf32> to vector<1x16xf32>
      %99 = vector.shape_cast %96 : vector<1x16xf32> to vector<1x1x16xf32>
      tpu.vector_store %arg7[%c1_87, %c7_88, %c3_89], %99 {strides = array<i32>} : memref<2x22x22xf32, #tpu.memory_space<vmem>>, vector<1x1x16xf32>,
      %c0_90 = arith.constant 0 : index
      %c80 = arith.constant 80 : index
      %100 = vector.load %arg5[%c0_90, %c80] : memref<1x256xf32, #tpu.memory_space<vmem>>, vector<1x16xf32>
      %cst_91 = arith.constant 2.500000e-01 : f32
      %101 = vector.broadcast %cst_91 : f32 to vector<1x16xf32>
      %102 = arith.mulf %100, %101 : vector<1x16xf32>
      %c0_92 = arith.constant 0 : index
      %c8 = arith.constant 8 : index
      %c3_93 = arith.constant 3 : index
      %103 = vector.load %arg7[%c0_92, %c8, %c3_93] : memref<2x22x22xf32, #tpu.memory_space<vmem>>, vector<1x1x16xf32>
      %104 = vector.shape_cast %103 : vector<1x1x16xf32> to vector<1x16xf32>
      %105 = vector.shape_cast %102 : vector<1x16xf32> to vector<1x1x16xf32>
      tpu.vector_store %arg7[%c0_92, %c8, %c3_93], %105 {strides = array<i32>} : memref<2x22x22xf32, #tpu.memory_space<vmem>>, vector<1x1x16xf32>,
      %c0_94 = arith.constant 0 : index
      %c80_95 = arith.constant 80 : index
      %106 = vector.load %arg6[%c0_94, %c80_95] : memref<1x256xf32, #tpu.memory_space<vmem>>, vector<1x16xf32>
      %c1_96 = arith.constant 1 : index
      %c8_97 = arith.constant 8 : index
      %c3_98 = arith.constant 3 : index
      %107 = vector.load %arg7[%c1_96, %c8_97, %c3_98] : memref<2x22x22xf32, #tpu.memory_space<vmem>>, vector<1x1x16xf32>
      %108 = vector.shape_cast %107 : vector<1x1x16xf32> to vector<1x16xf32>
      %109 = vector.shape_cast %106 : vector<1x16xf32> to vector<1x1x16xf32>
      tpu.vector_store %arg7[%c1_96, %c8_97, %c3_98], %109 {strides = array<i32>} : memref<2x22x22xf32, #tpu.memory_space<vmem>>, vector<1x1x16xf32>,
      %c0_99 = arith.constant 0 : index
      %c96 = arith.constant 96 : index
      %110 = vector.load %arg5[%c0_99, %c96] : memref<1x256xf32, #tpu.memory_space<vmem>>, vector<1x16xf32>
      %cst_100 = arith.constant 2.500000e-01 : f32
      %111 = vector.broadcast %cst_100 : f32 to vector<1x16xf32>
      %112 = arith.mulf %110, %111 : vector<1x16xf32>
      %c0_101 = arith.constant 0 : index
      %c9 = arith.constant 9 : index
      %c3_102 = arith.constant 3 : index
      %113 = vector.load %arg7[%c0_101, %c9, %c3_102] : memref<2x22x22xf32, #tpu.memory_space<vmem>>, vector<1x1x16xf32>
      %114 = vector.shape_cast %113 : vector<1x1x16xf32> to vector<1x16xf32>
      %115 = vector.shape_cast %112 : vector<1x16xf32> to vector<1x1x16xf32>
      tpu.vector_store %arg7[%c0_101, %c9, %c3_102], %115 {strides = array<i32>} : memref<2x22x22xf32, #tpu.memory_space<vmem>>, vector<1x1x16xf32>,
      %c0_103 = arith.constant 0 : index
      %c96_104 = arith.constant 96 : index
      %116 = vector.load %arg6[%c0_103, %c96_104] : memref<1x256xf32, #tpu.memory_space<vmem>>, vector<1x16xf32>
      %c1_105 = arith.constant 1 : index
      %c9_106 = arith.constant 9 : index
      %c3_107 = arith.constant 3 : index
      %117 = vector.load %arg7[%c1_105, %c9_106, %c3_107] : memref<2x22x22xf32, #tpu.memory_space<vmem>>, vector<1x1x16xf32>
      %118 = vector.shape_cast %117 : vector<1x1x16xf32> to vector<1x16xf32>
      %119 = vector.shape_cast %116 : vector<1x16xf32> to vector<1x1x16xf32>
      tpu.vector_store %arg7[%c1_105, %c9_106, %c3_107], %119 {strides = array<i32>} : memref<2x22x22xf32, #tpu.memory_space<vmem>>, vector<1x1x16xf32>,
      %c0_108 = arith.constant 0 : index
      %c112 = arith.constant 112 : index
      %120 = vector.load %arg5[%c0_108, %c112] : memref<1x256xf32, #tpu.memory_space<vmem>>, vector<1x16xf32>
      %cst_109 = arith.constant 2.500000e-01 : f32
      %121 = vector.broadcast %cst_109 : f32 to vector<1x16xf32>
      %122 = arith.mulf %120, %121 : vector<1x16xf32>
      %c0_110 = arith.constant 0 : index
      %c10 = arith.constant 10 : index
      %c3_111 = arith.constant 3 : index
      %123 = vector.load %arg7[%c0_110, %c10, %c3_111] : memref<2x22x22xf32, #tpu.memory_space<vmem>>, vector<1x1x16xf32>
      %124 = vector.shape_cast %123 : vector<1x1x16xf32> to vector<1x16xf32>
      %125 = vector.shape_cast %122 : vector<1x16xf32> to vector<1x1x16xf32>
      tpu.vector_store %arg7[%c0_110, %c10, %c3_111], %125 {strides = array<i32>} : memref<2x22x22xf32, #tpu.memory_space<vmem>>, vector<1x1x16xf32>,
      %c0_112 = arith.constant 0 : index
      %c112_113 = arith.constant 112 : index
      %126 = vector.load %arg6[%c0_112, %c112_113] : memref<1x256xf32, #tpu.memory_space<vmem>>, vector<1x16xf32>
      %c1_114 = arith.constant 1 : index
      %c10_115 = arith.constant 10 : index
      %c3_116 = arith.constant 3 : index
      %127 = vector.load %arg7[%c1_114, %c10_115, %c3_116] : memref<2x22x22xf32, #tpu.memory_space<vmem>>, vector<1x1x16xf32>
      %128 = vector.shape_cast %127 : vector<1x1x16xf32> to vector<1x16xf32>
      %129 = vector.shape_cast %126 : vector<1x16xf32> to vector<1x1x16xf32>
      tpu.vector_store %arg7[%c1_114, %c10_115, %c3_116], %129 {strides = array<i32>} : memref<2x22x22xf32, #tpu.memory_space<vmem>>, vector<1x1x16xf32>,
      %c0_117 = arith.constant 0 : index
      %c128 = arith.constant 128 : index
      %130 = vector.load %arg5[%c0_117, %c128] : memref<1x256xf32, #tpu.memory_space<vmem>>, vector<1x16xf32>
      %cst_118 = arith.constant 2.500000e-01 : f32
      %131 = vector.broadcast %cst_118 : f32 to vector<1x16xf32>
      %132 = arith.mulf %130, %131 : vector<1x16xf32>
      %c0_119 = arith.constant 0 : index
      %c11 = arith.constant 11 : index
      %c3_120 = arith.constant 3 : index
      %133 = vector.load %arg7[%c0_119, %c11, %c3_120] : memref<2x22x22xf32, #tpu.memory_space<vmem>>, vector<1x1x16xf32>
      %134 = vector.shape_cast %133 : vector<1x1x16xf32> to vector<1x16xf32>
      %135 = vector.shape_cast %132 : vector<1x16xf32> to vector<1x1x16xf32>
      tpu.vector_store %arg7[%c0_119, %c11, %c3_120], %135 {strides = array<i32>} : memref<2x22x22xf32, #tpu.memory_space<vmem>>, vector<1x1x16xf32>,
      %c0_121 = arith.constant 0 : index
      %c128_122 = arith.constant 128 : index
      %136 = vector.load %arg6[%c0_121, %c128_122] : memref<1x256xf32, #tpu.memory_space<vmem>>, vector<1x16xf32>
      %c1_123 = arith.constant 1 : index
      %c11_124 = arith.constant 11 : index
      %c3_125 = arith.constant 3 : index
      %137 = vector.load %arg7[%c1_123, %c11_124, %c3_125] : memref<2x22x22xf32, #tpu.memory_space<vmem>>, vector<1x1x16xf32>
      %138 = vector.shape_cast %137 : vector<1x1x16xf32> to vector<1x16xf32>
      %139 = vector.shape_cast %136 : vector<1x16xf32> to vector<1x1x16xf32>
      tpu.vector_store %arg7[%c1_123, %c11_124, %c3_125], %139 {strides = array<i32>} : memref<2x22x22xf32, #tpu.memory_space<vmem>>, vector<1x1x16xf32>,
      %c0_126 = arith.constant 0 : index
      %c144 = arith.constant 144 : index
      %140 = vector.load %arg5[%c0_126, %c144] : memref<1x256xf32, #tpu.memory_space<vmem>>, vector<1x16xf32>
      %cst_127 = arith.constant 2.500000e-01 : f32
      %141 = vector.broadcast %cst_127 : f32 to vector<1x16xf32>
      %142 = arith.mulf %140, %141 : vector<1x16xf32>
      %c0_128 = arith.constant 0 : index
      %c12 = arith.constant 12 : index
      %c3_129 = arith.constant 3 : index
      %143 = vector.load %arg7[%c0_128, %c12, %c3_129] : memref<2x22x22xf32, #tpu.memory_space<vmem>>, vector<1x1x16xf32>
      %144 = vector.shape_cast %143 : vector<1x1x16xf32> to vector<1x16xf32>
      %145 = vector.shape_cast %142 : vector<1x16xf32> to vector<1x1x16xf32>
      tpu.vector_store %arg7[%c0_128, %c12, %c3_129], %145 {strides = array<i32>} : memref<2x22x22xf32, #tpu.memory_space<vmem>>, vector<1x1x16xf32>,
      %c0_130 = arith.constant 0 : index
      %c144_131 = arith.constant 144 : index
      %146 = vector.load %arg6[%c0_130, %c144_131] : memref<1x256xf32, #tpu.memory_space<vmem>>, vector<1x16xf32>
      %c1_132 = arith.constant 1 : index
      %c12_133 = arith.constant 12 : index
      %c3_134 = arith.constant 3 : index
      %147 = vector.load %arg7[%c1_132, %c12_133, %c3_134] : memref<2x22x22xf32, #tpu.memory_space<vmem>>, vector<1x1x16xf32>
      %148 = vector.shape_cast %147 : vector<1x1x16xf32> to vector<1x16xf32>
      %149 = vector.shape_cast %146 : vector<1x16xf32> to vector<1x1x16xf32>
      tpu.vector_store %arg7[%c1_132, %c12_133, %c3_134], %149 {strides = array<i32>} : memref<2x22x22xf32, #tpu.memory_space<vmem>>, vector<1x1x16xf32>,
      %c0_135 = arith.constant 0 : index
      %c160 = arith.constant 160 : index
      %150 = vector.load %arg5[%c0_135, %c160] : memref<1x256xf32, #tpu.memory_space<vmem>>, vector<1x16xf32>
      %cst_136 = arith.constant 2.500000e-01 : f32
      %151 = vector.broadcast %cst_136 : f32 to vector<1x16xf32>
      %152 = arith.mulf %150, %151 : vector<1x16xf32>
      %c0_137 = arith.constant 0 : index
      %c13 = arith.constant 13 : index
      %c3_138 = arith.constant 3 : index
      %153 = vector.load %arg7[%c0_137, %c13, %c3_138] : memref<2x22x22xf32, #tpu.memory_space<vmem>>, vector<1x1x16xf32>
      %154 = vector.shape_cast %153 : vector<1x1x16xf32> to vector<1x16xf32>
      %155 = vector.shape_cast %152 : vector<1x16xf32> to vector<1x1x16xf32>
      tpu.vector_store %arg7[%c0_137, %c13, %c3_138], %155 {strides = array<i32>} : memref<2x22x22xf32, #tpu.memory_space<vmem>>, vector<1x1x16xf32>,
      %c0_139 = arith.constant 0 : index
      %c160_140 = arith.constant 160 : index
      %156 = vector.load %arg6[%c0_139, %c160_140] : memref<1x256xf32, #tpu.memory_space<vmem>>, vector<1x16xf32>
      %c1_141 = arith.constant 1 : index
      %c13_142 = arith.constant 13 : index
      %c3_143 = arith.constant 3 : index
      %157 = vector.load %arg7[%c1_141, %c13_142, %c3_143] : memref<2x22x22xf32, #tpu.memory_space<vmem>>, vector<1x1x16xf32>
      %158 = vector.shape_cast %157 : vector<1x1x16xf32> to vector<1x16xf32>
      %159 = vector.shape_cast %156 : vector<1x16xf32> to vector<1x1x16xf32>
      tpu.vector_store %arg7[%c1_141, %c13_142, %c3_143], %159 {strides = array<i32>} : memref<2x22x22xf32, #tpu.memory_space<vmem>>, vector<1x1x16xf32>,
      %c0_144 = arith.constant 0 : index
      %c176 = arith.constant 176 : index
      %160 = vector.load %arg5[%c0_144, %c176] : memref<1x256xf32, #tpu.memory_space<vmem>>, vector<1x16xf32>
      %cst_145 = arith.constant 2.500000e-01 : f32
      %161 = vector.broadcast %cst_145 : f32 to vector<1x16xf32>
      %162 = arith.mulf %160, %161 : vector<1x16xf32>
      %c0_146 = arith.constant 0 : index
      %c14 = arith.constant 14 : index
      %c3_147 = arith.constant 3 : index
      %163 = vector.load %arg7[%c0_146, %c14, %c3_147] : memref<2x22x22xf32, #tpu.memory_space<vmem>>, vector<1x1x16xf32>
      %164 = vector.shape_cast %163 : vector<1x1x16xf32> to vector<1x16xf32>
      %165 = vector.shape_cast %162 : vector<1x16xf32> to vector<1x1x16xf32>
      tpu.vector_store %arg7[%c0_146, %c14, %c3_147], %165 {strides = array<i32>} : memref<2x22x22xf32, #tpu.memory_space<vmem>>, vector<1x1x16xf32>,
      %c0_148 = arith.constant 0 : index
      %c176_149 = arith.constant 176 : index
      %166 = vector.load %arg6[%c0_148, %c176_149] : memref<1x256xf32, #tpu.memory_space<vmem>>, vector<1x16xf32>
      %c1_150 = arith.constant 1 : index
      %c14_151 = arith.constant 14 : index
      %c3_152 = arith.constant 3 : index
      %167 = vector.load %arg7[%c1_150, %c14_151, %c3_152] : memref<2x22x22xf32, #tpu.memory_space<vmem>>, vector<1x1x16xf32>
      %168 = vector.shape_cast %167 : vector<1x1x16xf32> to vector<1x16xf32>
      %169 = vector.shape_cast %166 : vector<1x16xf32> to vector<1x1x16xf32>
      tpu.vector_store %arg7[%c1_150, %c14_151, %c3_152], %169 {strides = array<i32>} : memref<2x22x22xf32, #tpu.memory_space<vmem>>, vector<1x1x16xf32>,
      %c0_153 = arith.constant 0 : index
      %c192 = arith.constant 192 : index
      %170 = vector.load %arg5[%c0_153, %c192] : memref<1x256xf32, #tpu.memory_space<vmem>>, vector<1x16xf32>
      %cst_154 = arith.constant 2.500000e-01 : f32
      %171 = vector.broadcast %cst_154 : f32 to vector<1x16xf32>
      %172 = arith.mulf %170, %171 : vector<1x16xf32>
      %c0_155 = arith.constant 0 : index
      %c15 = arith.constant 15 : index
      %c3_156 = arith.constant 3 : index
      %173 = vector.load %arg7[%c0_155, %c15, %c3_156] : memref<2x22x22xf32, #tpu.memory_space<vmem>>, vector<1x1x16xf32>
      %174 = vector.shape_cast %173 : vector<1x1x16xf32> to vector<1x16xf32>
      %175 = vector.shape_cast %172 : vector<1x16xf32> to vector<1x1x16xf32>
      tpu.vector_store %arg7[%c0_155, %c15, %c3_156], %175 {strides = array<i32>} : memref<2x22x22xf32, #tpu.memory_space<vmem>>, vector<1x1x16xf32>,
      %c0_157 = arith.constant 0 : index
      %c192_158 = arith.constant 192 : index
      %176 = vector.load %arg6[%c0_157, %c192_158] : memref<1x256xf32, #tpu.memory_space<vmem>>, vector<1x16xf32>
      %c1_159 = arith.constant 1 : index
      %c15_160 = arith.constant 15 : index
      %c3_161 = arith.constant 3 : index
      %177 = vector.load %arg7[%c1_159, %c15_160, %c3_161] : memref<2x22x22xf32, #tpu.memory_space<vmem>>, vector<1x1x16xf32>
      %178 = vector.shape_cast %177 : vector<1x1x16xf32> to vector<1x16xf32>
      %179 = vector.shape_cast %176 : vector<1x16xf32> to vector<1x1x16xf32>
      tpu.vector_store %arg7[%c1_159, %c15_160, %c3_161], %179 {strides = array<i32>} : memref<2x22x22xf32, #tpu.memory_space<vmem>>, vector<1x1x16xf32>,
      %c0_162 = arith.constant 0 : index
      %c208 = arith.constant 208 : index
      %180 = vector.load %arg5[%c0_162, %c208] : memref<1x256xf32, #tpu.memory_space<vmem>>, vector<1x16xf32>
      %cst_163 = arith.constant 2.500000e-01 : f32
      %181 = vector.broadcast %cst_163 : f32 to vector<1x16xf32>
      %182 = arith.mulf %180, %181 : vector<1x16xf32>
      %c0_164 = arith.constant 0 : index
      %c16_165 = arith.constant 16 : index
      %c3_166 = arith.constant 3 : index
      %183 = vector.load %arg7[%c0_164, %c16_165, %c3_166] : memref<2x22x22xf32, #tpu.memory_space<vmem>>, vector<1x1x16xf32>
      %184 = vector.shape_cast %183 : vector<1x1x16xf32> to vector<1x16xf32>
      %185 = vector.shape_cast %182 : vector<1x16xf32> to vector<1x1x16xf32>
      tpu.vector_store %arg7[%c0_164, %c16_165, %c3_166], %185 {strides = array<i32>} : memref<2x22x22xf32, #tpu.memory_space<vmem>>, vector<1x1x16xf32>,
      %c0_167 = arith.constant 0 : index
      %c208_168 = arith.constant 208 : index
      %186 = vector.load %arg6[%c0_167, %c208_168] : memref<1x256xf32, #tpu.memory_space<vmem>>, vector<1x16xf32>
      %c1_169 = arith.constant 1 : index
      %c16_170 = arith.constant 16 : index
      %c3_171 = arith.constant 3 : index
      %187 = vector.load %arg7[%c1_169, %c16_170, %c3_171] : memref<2x22x22xf32, #tpu.memory_space<vmem>>, vector<1x1x16xf32>
      %188 = vector.shape_cast %187 : vector<1x1x16xf32> to vector<1x16xf32>
      %189 = vector.shape_cast %186 : vector<1x16xf32> to vector<1x1x16xf32>
      tpu.vector_store %arg7[%c1_169, %c16_170, %c3_171], %189 {strides = array<i32>} : memref<2x22x22xf32, #tpu.memory_space<vmem>>, vector<1x1x16xf32>,
      %c0_172 = arith.constant 0 : index
      %c224 = arith.constant 224 : index
      %190 = vector.load %arg5[%c0_172, %c224] : memref<1x256xf32, #tpu.memory_space<vmem>>, vector<1x16xf32>
      %cst_173 = arith.constant 2.500000e-01 : f32
      %191 = vector.broadcast %cst_173 : f32 to vector<1x16xf32>
      %192 = arith.mulf %190, %191 : vector<1x16xf32>
      %c0_174 = arith.constant 0 : index
      %c17 = arith.constant 17 : index
      %c3_175 = arith.constant 3 : index
      %193 = vector.load %arg7[%c0_174, %c17, %c3_175] : memref<2x22x22xf32, #tpu.memory_space<vmem>>, vector<1x1x16xf32>
      %194 = vector.shape_cast %193 : vector<1x1x16xf32> to vector<1x16xf32>
      %195 = vector.shape_cast %192 : vector<1x16xf32> to vector<1x1x16xf32>
      tpu.vector_store %arg7[%c0_174, %c17, %c3_175], %195 {strides = array<i32>} : memref<2x22x22xf32, #tpu.memory_space<vmem>>, vector<1x1x16xf32>,
      %c0_176 = arith.constant 0 : index
      %c224_177 = arith.constant 224 : index
      %196 = vector.load %arg6[%c0_176, %c224_177] : memref<1x256xf32, #tpu.memory_space<vmem>>, vector<1x16xf32>
      %c1_178 = arith.constant 1 : index
      %c17_179 = arith.constant 17 : index
      %c3_180 = arith.constant 3 : index
      %197 = vector.load %arg7[%c1_178, %c17_179, %c3_180] : memref<2x22x22xf32, #tpu.memory_space<vmem>>, vector<1x1x16xf32>
      %198 = vector.shape_cast %197 : vector<1x1x16xf32> to vector<1x16xf32>
      %199 = vector.shape_cast %196 : vector<1x16xf32> to vector<1x1x16xf32>
      tpu.vector_store %arg7[%c1_178, %c17_179, %c3_180], %199 {strides = array<i32>} : memref<2x22x22xf32, #tpu.memory_space<vmem>>, vector<1x1x16xf32>,
      %c0_181 = arith.constant 0 : index
      %c240 = arith.constant 240 : index
      %200 = vector.load %arg5[%c0_181, %c240] : memref<1x256xf32, #tpu.memory_space<vmem>>, vector<1x16xf32>
      %cst_182 = arith.constant 2.500000e-01 : f32
      %201 = vector.broadcast %cst_182 : f32 to vector<1x16xf32>
      %202 = arith.mulf %200, %201 : vector<1x16xf32>
      %c0_183 = arith.constant 0 : index
      %c18 = arith.constant 18 : index
      %c3_184 = arith.constant 3 : index
      %203 = vector.load %arg7[%c0_183, %c18, %c3_184] : memref<2x22x22xf32, #tpu.memory_space<vmem>>, vector<1x1x16xf32>
      %204 = vector.shape_cast %203 : vector<1x1x16xf32> to vector<1x16xf32>
      %205 = vector.shape_cast %202 : vector<1x16xf32> to vector<1x1x16xf32>
      tpu.vector_store %arg7[%c0_183, %c18, %c3_184], %205 {strides = array<i32>} : memref<2x22x22xf32, #tpu.memory_space<vmem>>, vector<1x1x16xf32>,
      %c0_185 = arith.constant 0 : index
      %c240_186 = arith.constant 240 : index
      %206 = vector.load %arg6[%c0_185, %c240_186] : memref<1x256xf32, #tpu.memory_space<vmem>>, vector<1x16xf32>
      %c1_187 = arith.constant 1 : index
      %c18_188 = arith.constant 18 : index
      %c3_189 = arith.constant 3 : index
      %207 = vector.load %arg7[%c1_187, %c18_188, %c3_189] : memref<2x22x22xf32, #tpu.memory_space<vmem>>, vector<1x1x16xf32>
      %208 = vector.shape_cast %207 : vector<1x1x16xf32> to vector<1x16xf32>
      %209 = vector.shape_cast %206 : vector<1x16xf32> to vector<1x1x16xf32>
      tpu.vector_store %arg7[%c1_187, %c18_188, %c3_189], %209 {strides = array<i32>} : memref<2x22x22xf32, #tpu.memory_space<vmem>>, vector<1x1x16xf32>,
      %cst_190 = arith.constant 0.000000e+00 : f32
      %210 = vector.broadcast %cst_190 : f32 to vector<16x16xf32>
      %c0_191 = arith.constant 0 : index
      %c0_192 = arith.constant 0 : index
      %c0_193 = arith.constant 0 : index
      %211 = vector.load %arg7[%c0_191, %c0_192, %c0_193] : memref<2x22x22xf32, #tpu.memory_space<vmem>>, vector<1x22x16xf32>
      %212 = vector.shape_cast %211 : vector<1x22x16xf32> to vector<22x16xf32>
      %c0_194 = arith.constant 0 : index
      %213 = memref.load %arg2[%c0_194] : memref<98xf32, #tpu.memory_space<smem>>
      %214 = vector.extract_strided_slice %212 {offsets = [0, 0], sizes = [16, 16], strides = [1, 1]} : vector<22x16xf32> to vector<16x16xf32>
      %215 = vector.broadcast %213 : f32 to vector<16x16xf32>
      %216 = arith.mulf %214, %215 : vector<16x16xf32>
      %217 = arith.addf %210, %216 : vector<16x16xf32>
      %c7_195 = arith.constant 7 : index
      %218 = memref.load %arg2[%c7_195] : memref<98xf32, #tpu.memory_space<smem>>
      %219 = vector.extract_strided_slice %212 {offsets = [1, 0], sizes = [16, 16], strides = [1, 1]} : vector<22x16xf32> to vector<16x16xf32>
      %220 = vector.broadcast %218 : f32 to vector<16x16xf32>
      %221 = arith.mulf %219, %220 : vector<16x16xf32>
      %222 = arith.addf %217, %221 : vector<16x16xf32>
      %c14_196 = arith.constant 14 : index
      %223 = memref.load %arg2[%c14_196] : memref<98xf32, #tpu.memory_space<smem>>
      %224 = vector.extract_strided_slice %212 {offsets = [2, 0], sizes = [16, 16], strides = [1, 1]} : vector<22x16xf32> to vector<16x16xf32>
      %225 = vector.broadcast %223 : f32 to vector<16x16xf32>
      %226 = arith.mulf %224, %225 : vector<16x16xf32>
      %227 = arith.addf %222, %226 : vector<16x16xf32>
      %c21 = arith.constant 21 : index
      %228 = memref.load %arg2[%c21] : memref<98xf32, #tpu.memory_space<smem>>
      %229 = vector.extract_strided_slice %212 {offsets = [3, 0], sizes = [16, 16], strides = [1, 1]} : vector<22x16xf32> to vector<16x16xf32>
      %230 = vector.broadcast %228 : f32 to vector<16x16xf32>
      %231 = arith.mulf %229, %230 : vector<16x16xf32>
      %232 = arith.addf %227, %231 : vector<16x16xf32>
      %c28 = arith.constant 28 : index
      %233 = memref.load %arg2[%c28] : memref<98xf32, #tpu.memory_space<smem>>
      %234 = vector.extract_strided_slice %212 {offsets = [4, 0], sizes = [16, 16], strides = [1, 1]} : vector<22x16xf32> to vector<16x16xf32>
      %235 = vector.broadcast %233 : f32 to vector<16x16xf32>
      %236 = arith.mulf %234, %235 : vector<16x16xf32>
      %237 = arith.addf %232, %236 : vector<16x16xf32>
      %c35 = arith.constant 35 : index
      %238 = memref.load %arg2[%c35] : memref<98xf32, #tpu.memory_space<smem>>
      %239 = vector.extract_strided_slice %212 {offsets = [5, 0], sizes = [16, 16], strides = [1, 1]} : vector<22x16xf32> to vector<16x16xf32>
      %240 = vector.broadcast %238 : f32 to vector<16x16xf32>
      %241 = arith.mulf %239, %240 : vector<16x16xf32>
      %242 = arith.addf %237, %241 : vector<16x16xf32>
      %c42 = arith.constant 42 : index
      %243 = memref.load %arg2[%c42] : memref<98xf32, #tpu.memory_space<smem>>
      %244 = vector.extract_strided_slice %212 {offsets = [6, 0], sizes = [16, 16], strides = [1, 1]} : vector<22x16xf32> to vector<16x16xf32>
      %245 = vector.broadcast %243 : f32 to vector<16x16xf32>
      %246 = arith.mulf %244, %245 : vector<16x16xf32>
      %247 = arith.addf %242, %246 : vector<16x16xf32>
      %c0_197 = arith.constant 0 : index
      %c0_198 = arith.constant 0 : index
      %c1_199 = arith.constant 1 : index
      %248 = vector.load %arg7[%c0_197, %c0_198, %c1_199] : memref<2x22x22xf32, #tpu.memory_space<vmem>>, vector<1x22x16xf32>
      %249 = vector.shape_cast %248 : vector<1x22x16xf32> to vector<22x16xf32>
      %c1_200 = arith.constant 1 : index
      %250 = memref.load %arg2[%c1_200] : memref<98xf32, #tpu.memory_space<smem>>
      %251 = vector.extract_strided_slice %249 {offsets = [0, 0], sizes = [16, 16], strides = [1, 1]} : vector<22x16xf32> to vector<16x16xf32>
      %252 = vector.broadcast %250 : f32 to vector<16x16xf32>
      %253 = arith.mulf %251, %252 : vector<16x16xf32>
      %254 = arith.addf %247, %253 : vector<16x16xf32>
      %c8_201 = arith.constant 8 : index
      %255 = memref.load %arg2[%c8_201] : memref<98xf32, #tpu.memory_space<smem>>
      %256 = vector.extract_strided_slice %249 {offsets = [1, 0], sizes = [16, 16], strides = [1, 1]} : vector<22x16xf32> to vector<16x16xf32>
      %257 = vector.broadcast %255 : f32 to vector<16x16xf32>
      %258 = arith.mulf %256, %257 : vector<16x16xf32>
      %259 = arith.addf %254, %258 : vector<16x16xf32>
      %c15_202 = arith.constant 15 : index
      %260 = memref.load %arg2[%c15_202] : memref<98xf32, #tpu.memory_space<smem>>
      %261 = vector.extract_strided_slice %249 {offsets = [2, 0], sizes = [16, 16], strides = [1, 1]} : vector<22x16xf32> to vector<16x16xf32>
      %262 = vector.broadcast %260 : f32 to vector<16x16xf32>
      %263 = arith.mulf %261, %262 : vector<16x16xf32>
      %264 = arith.addf %259, %263 : vector<16x16xf32>
      %c22 = arith.constant 22 : index
      %265 = memref.load %arg2[%c22] : memref<98xf32, #tpu.memory_space<smem>>
      %266 = vector.extract_strided_slice %249 {offsets = [3, 0], sizes = [16, 16], strides = [1, 1]} : vector<22x16xf32> to vector<16x16xf32>
      %267 = vector.broadcast %265 : f32 to vector<16x16xf32>
      %268 = arith.mulf %266, %267 : vector<16x16xf32>
      %269 = arith.addf %264, %268 : vector<16x16xf32>
      %c29 = arith.constant 29 : index
      %270 = memref.load %arg2[%c29] : memref<98xf32, #tpu.memory_space<smem>>
      %271 = vector.extract_strided_slice %249 {offsets = [4, 0], sizes = [16, 16], strides = [1, 1]} : vector<22x16xf32> to vector<16x16xf32>
      %272 = vector.broadcast %270 : f32 to vector<16x16xf32>
      %273 = arith.mulf %271, %272 : vector<16x16xf32>
      %274 = arith.addf %269, %273 : vector<16x16xf32>
      %c36 = arith.constant 36 : index
      %275 = memref.load %arg2[%c36] : memref<98xf32, #tpu.memory_space<smem>>
      %276 = vector.extract_strided_slice %249 {offsets = [5, 0], sizes = [16, 16], strides = [1, 1]} : vector<22x16xf32> to vector<16x16xf32>
      %277 = vector.broadcast %275 : f32 to vector<16x16xf32>
      %278 = arith.mulf %276, %277 : vector<16x16xf32>
      %279 = arith.addf %274, %278 : vector<16x16xf32>
      %c43 = arith.constant 43 : index
      %280 = memref.load %arg2[%c43] : memref<98xf32, #tpu.memory_space<smem>>
      %281 = vector.extract_strided_slice %249 {offsets = [6, 0], sizes = [16, 16], strides = [1, 1]} : vector<22x16xf32> to vector<16x16xf32>
      %282 = vector.broadcast %280 : f32 to vector<16x16xf32>
      %283 = arith.mulf %281, %282 : vector<16x16xf32>
      %284 = arith.addf %279, %283 : vector<16x16xf32>
      %c0_203 = arith.constant 0 : index
      %c0_204 = arith.constant 0 : index
      %c2 = arith.constant 2 : index
      %285 = vector.load %arg7[%c0_203, %c0_204, %c2] : memref<2x22x22xf32, #tpu.memory_space<vmem>>, vector<1x22x16xf32>
      %286 = vector.shape_cast %285 : vector<1x22x16xf32> to vector<22x16xf32>
      %c2_205 = arith.constant 2 : index
      %287 = memref.load %arg2[%c2_205] : memref<98xf32, #tpu.memory_space<smem>>
      %288 = vector.extract_strided_slice %286 {offsets = [0, 0], sizes = [16, 16], strides = [1, 1]} : vector<22x16xf32> to vector<16x16xf32>
      %289 = vector.broadcast %287 : f32 to vector<16x16xf32>
      %290 = arith.mulf %288, %289 : vector<16x16xf32>
      %291 = arith.addf %284, %290 : vector<16x16xf32>
      %c9_206 = arith.constant 9 : index
      %292 = memref.load %arg2[%c9_206] : memref<98xf32, #tpu.memory_space<smem>>
      %293 = vector.extract_strided_slice %286 {offsets = [1, 0], sizes = [16, 16], strides = [1, 1]} : vector<22x16xf32> to vector<16x16xf32>
      %294 = vector.broadcast %292 : f32 to vector<16x16xf32>
      %295 = arith.mulf %293, %294 : vector<16x16xf32>
      %296 = arith.addf %291, %295 : vector<16x16xf32>
      %c16_207 = arith.constant 16 : index
      %297 = memref.load %arg2[%c16_207] : memref<98xf32, #tpu.memory_space<smem>>
      %298 = vector.extract_strided_slice %286 {offsets = [2, 0], sizes = [16, 16], strides = [1, 1]} : vector<22x16xf32> to vector<16x16xf32>
      %299 = vector.broadcast %297 : f32 to vector<16x16xf32>
      %300 = arith.mulf %298, %299 : vector<16x16xf32>
      %301 = arith.addf %296, %300 : vector<16x16xf32>
      %c23 = arith.constant 23 : index
      %302 = memref.load %arg2[%c23] : memref<98xf32, #tpu.memory_space<smem>>
      %303 = vector.extract_strided_slice %286 {offsets = [3, 0], sizes = [16, 16], strides = [1, 1]} : vector<22x16xf32> to vector<16x16xf32>
      %304 = vector.broadcast %302 : f32 to vector<16x16xf32>
      %305 = arith.mulf %303, %304 : vector<16x16xf32>
      %306 = arith.addf %301, %305 : vector<16x16xf32>
      %c30 = arith.constant 30 : index
      %307 = memref.load %arg2[%c30] : memref<98xf32, #tpu.memory_space<smem>>
      %308 = vector.extract_strided_slice %286 {offsets = [4, 0], sizes = [16, 16], strides = [1, 1]} : vector<22x16xf32> to vector<16x16xf32>
      %309 = vector.broadcast %307 : f32 to vector<16x16xf32>
      %310 = arith.mulf %308, %309 : vector<16x16xf32>
      %311 = arith.addf %306, %310 : vector<16x16xf32>
      %c37 = arith.constant 37 : index
      %312 = memref.load %arg2[%c37] : memref<98xf32, #tpu.memory_space<smem>>
      %313 = vector.extract_strided_slice %286 {offsets = [5, 0], sizes = [16, 16], strides = [1, 1]} : vector<22x16xf32> to vector<16x16xf32>
      %314 = vector.broadcast %312 : f32 to vector<16x16xf32>
      %315 = arith.mulf %313, %314 : vector<16x16xf32>
      %316 = arith.addf %311, %315 : vector<16x16xf32>
      %c44 = arith.constant 44 : index
      %317 = memref.load %arg2[%c44] : memref<98xf32, #tpu.memory_space<smem>>
      %318 = vector.extract_strided_slice %286 {offsets = [6, 0], sizes = [16, 16], strides = [1, 1]} : vector<22x16xf32> to vector<16x16xf32>
      %319 = vector.broadcast %317 : f32 to vector<16x16xf32>
      %320 = arith.mulf %318, %319 : vector<16x16xf32>
      %321 = arith.addf %316, %320 : vector<16x16xf32>
      %c0_208 = arith.constant 0 : index
      %c0_209 = arith.constant 0 : index
      %c3_210 = arith.constant 3 : index
      %322 = vector.load %arg7[%c0_208, %c0_209, %c3_210] : memref<2x22x22xf32, #tpu.memory_space<vmem>>, vector<1x22x16xf32>
      %323 = vector.shape_cast %322 : vector<1x22x16xf32> to vector<22x16xf32>
      %c3_211 = arith.constant 3 : index
      %324 = memref.load %arg2[%c3_211] : memref<98xf32, #tpu.memory_space<smem>>
      %325 = vector.extract_strided_slice %323 {offsets = [0, 0], sizes = [16, 16], strides = [1, 1]} : vector<22x16xf32> to vector<16x16xf32>
      %326 = vector.broadcast %324 : f32 to vector<16x16xf32>
      %327 = arith.mulf %325, %326 : vector<16x16xf32>
      %328 = arith.addf %321, %327 : vector<16x16xf32>
      %c10_212 = arith.constant 10 : index
      %329 = memref.load %arg2[%c10_212] : memref<98xf32, #tpu.memory_space<smem>>
      %330 = vector.extract_strided_slice %323 {offsets = [1, 0], sizes = [16, 16], strides = [1, 1]} : vector<22x16xf32> to vector<16x16xf32>
      %331 = vector.broadcast %329 : f32 to vector<16x16xf32>
      %332 = arith.mulf %330, %331 : vector<16x16xf32>
      %333 = arith.addf %328, %332 : vector<16x16xf32>
      %c17_213 = arith.constant 17 : index
      %334 = memref.load %arg2[%c17_213] : memref<98xf32, #tpu.memory_space<smem>>
      %335 = vector.extract_strided_slice %323 {offsets = [2, 0], sizes = [16, 16], strides = [1, 1]} : vector<22x16xf32> to vector<16x16xf32>
      %336 = vector.broadcast %334 : f32 to vector<16x16xf32>
      %337 = arith.mulf %335, %336 : vector<16x16xf32>
      %338 = arith.addf %333, %337 : vector<16x16xf32>
      %c24 = arith.constant 24 : index
      %339 = memref.load %arg2[%c24] : memref<98xf32, #tpu.memory_space<smem>>
      %340 = vector.extract_strided_slice %323 {offsets = [3, 0], sizes = [16, 16], strides = [1, 1]} : vector<22x16xf32> to vector<16x16xf32>
      %341 = vector.broadcast %339 : f32 to vector<16x16xf32>
      %342 = arith.mulf %340, %341 : vector<16x16xf32>
      %343 = arith.addf %338, %342 : vector<16x16xf32>
      %c31 = arith.constant 31 : index
      %344 = memref.load %arg2[%c31] : memref<98xf32, #tpu.memory_space<smem>>
      %345 = vector.extract_strided_slice %323 {offsets = [4, 0], sizes = [16, 16], strides = [1, 1]} : vector<22x16xf32> to vector<16x16xf32>
      %346 = vector.broadcast %344 : f32 to vector<16x16xf32>
      %347 = arith.mulf %345, %346 : vector<16x16xf32>
      %348 = arith.addf %343, %347 : vector<16x16xf32>
      %c38 = arith.constant 38 : index
      %349 = memref.load %arg2[%c38] : memref<98xf32, #tpu.memory_space<smem>>
      %350 = vector.extract_strided_slice %323 {offsets = [5, 0], sizes = [16, 16], strides = [1, 1]} : vector<22x16xf32> to vector<16x16xf32>
      %351 = vector.broadcast %349 : f32 to vector<16x16xf32>
      %352 = arith.mulf %350, %351 : vector<16x16xf32>
      %353 = arith.addf %348, %352 : vector<16x16xf32>
      %c45 = arith.constant 45 : index
      %354 = memref.load %arg2[%c45] : memref<98xf32, #tpu.memory_space<smem>>
      %355 = vector.extract_strided_slice %323 {offsets = [6, 0], sizes = [16, 16], strides = [1, 1]} : vector<22x16xf32> to vector<16x16xf32>
      %356 = vector.broadcast %354 : f32 to vector<16x16xf32>
      %357 = arith.mulf %355, %356 : vector<16x16xf32>
      %358 = arith.addf %353, %357 : vector<16x16xf32>
      %c0_214 = arith.constant 0 : index
      %c0_215 = arith.constant 0 : index
      %c4_216 = arith.constant 4 : index
      %359 = vector.load %arg7[%c0_214, %c0_215, %c4_216] : memref<2x22x22xf32, #tpu.memory_space<vmem>>, vector<1x22x16xf32>
      %360 = vector.shape_cast %359 : vector<1x22x16xf32> to vector<22x16xf32>
      %c4_217 = arith.constant 4 : index
      %361 = memref.load %arg2[%c4_217] : memref<98xf32, #tpu.memory_space<smem>>
      %362 = vector.extract_strided_slice %360 {offsets = [0, 0], sizes = [16, 16], strides = [1, 1]} : vector<22x16xf32> to vector<16x16xf32>
      %363 = vector.broadcast %361 : f32 to vector<16x16xf32>
      %364 = arith.mulf %362, %363 : vector<16x16xf32>
      %365 = arith.addf %358, %364 : vector<16x16xf32>
      %c11_218 = arith.constant 11 : index
      %366 = memref.load %arg2[%c11_218] : memref<98xf32, #tpu.memory_space<smem>>
      %367 = vector.extract_strided_slice %360 {offsets = [1, 0], sizes = [16, 16], strides = [1, 1]} : vector<22x16xf32> to vector<16x16xf32>
      %368 = vector.broadcast %366 : f32 to vector<16x16xf32>
      %369 = arith.mulf %367, %368 : vector<16x16xf32>
      %370 = arith.addf %365, %369 : vector<16x16xf32>
      %c18_219 = arith.constant 18 : index
      %371 = memref.load %arg2[%c18_219] : memref<98xf32, #tpu.memory_space<smem>>
      %372 = vector.extract_strided_slice %360 {offsets = [2, 0], sizes = [16, 16], strides = [1, 1]} : vector<22x16xf32> to vector<16x16xf32>
      %373 = vector.broadcast %371 : f32 to vector<16x16xf32>
      %374 = arith.mulf %372, %373 : vector<16x16xf32>
      %375 = arith.addf %370, %374 : vector<16x16xf32>
      %c25 = arith.constant 25 : index
      %376 = memref.load %arg2[%c25] : memref<98xf32, #tpu.memory_space<smem>>
      %377 = vector.extract_strided_slice %360 {offsets = [3, 0], sizes = [16, 16], strides = [1, 1]} : vector<22x16xf32> to vector<16x16xf32>
      %378 = vector.broadcast %376 : f32 to vector<16x16xf32>
      %379 = arith.mulf %377, %378 : vector<16x16xf32>
      %380 = arith.addf %375, %379 : vector<16x16xf32>
      %c32_220 = arith.constant 32 : index
      %381 = memref.load %arg2[%c32_220] : memref<98xf32, #tpu.memory_space<smem>>
      %382 = vector.extract_strided_slice %360 {offsets = [4, 0], sizes = [16, 16], strides = [1, 1]} : vector<22x16xf32> to vector<16x16xf32>
      %383 = vector.broadcast %381 : f32 to vector<16x16xf32>
      %384 = arith.mulf %382, %383 : vector<16x16xf32>
      %385 = arith.addf %380, %384 : vector<16x16xf32>
      %c39 = arith.constant 39 : index
      %386 = memref.load %arg2[%c39] : memref<98xf32, #tpu.memory_space<smem>>
      %387 = vector.extract_strided_slice %360 {offsets = [5, 0], sizes = [16, 16], strides = [1, 1]} : vector<22x16xf32> to vector<16x16xf32>
      %388 = vector.broadcast %386 : f32 to vector<16x16xf32>
      %389 = arith.mulf %387, %388 : vector<16x16xf32>
      %390 = arith.addf %385, %389 : vector<16x16xf32>
      %c46 = arith.constant 46 : index
      %391 = memref.load %arg2[%c46] : memref<98xf32, #tpu.memory_space<smem>>
      %392 = vector.extract_strided_slice %360 {offsets = [6, 0], sizes = [16, 16], strides = [1, 1]} : vector<22x16xf32> to vector<16x16xf32>
      %393 = vector.broadcast %391 : f32 to vector<16x16xf32>
      %394 = arith.mulf %392, %393 : vector<16x16xf32>
      %395 = arith.addf %390, %394 : vector<16x16xf32>
      %c0_221 = arith.constant 0 : index
      %c0_222 = arith.constant 0 : index
      %c5_223 = arith.constant 5 : index
      %396 = vector.load %arg7[%c0_221, %c0_222, %c5_223] : memref<2x22x22xf32, #tpu.memory_space<vmem>>, vector<1x22x16xf32>
      %397 = vector.shape_cast %396 : vector<1x22x16xf32> to vector<22x16xf32>
      %c5_224 = arith.constant 5 : index
      %398 = memref.load %arg2[%c5_224] : memref<98xf32, #tpu.memory_space<smem>>
      %399 = vector.extract_strided_slice %397 {offsets = [0, 0], sizes = [16, 16], strides = [1, 1]} : vector<22x16xf32> to vector<16x16xf32>
      %400 = vector.broadcast %398 : f32 to vector<16x16xf32>
      %401 = arith.mulf %399, %400 : vector<16x16xf32>
      %402 = arith.addf %395, %401 : vector<16x16xf32>
      %c12_225 = arith.constant 12 : index
      %403 = memref.load %arg2[%c12_225] : memref<98xf32, #tpu.memory_space<smem>>
      %404 = vector.extract_strided_slice %397 {offsets = [1, 0], sizes = [16, 16], strides = [1, 1]} : vector<22x16xf32> to vector<16x16xf32>
      %405 = vector.broadcast %403 : f32 to vector<16x16xf32>
      %406 = arith.mulf %404, %405 : vector<16x16xf32>
      %407 = arith.addf %402, %406 : vector<16x16xf32>
      %c19_226 = arith.constant 19 : index
      %408 = memref.load %arg2[%c19_226] : memref<98xf32, #tpu.memory_space<smem>>
      %409 = vector.extract_strided_slice %397 {offsets = [2, 0], sizes = [16, 16], strides = [1, 1]} : vector<22x16xf32> to vector<16x16xf32>
      %410 = vector.broadcast %408 : f32 to vector<16x16xf32>
      %411 = arith.mulf %409, %410 : vector<16x16xf32>
      %412 = arith.addf %407, %411 : vector<16x16xf32>
      %c26 = arith.constant 26 : index
      %413 = memref.load %arg2[%c26] : memref<98xf32, #tpu.memory_space<smem>>
      %414 = vector.extract_strided_slice %397 {offsets = [3, 0], sizes = [16, 16], strides = [1, 1]} : vector<22x16xf32> to vector<16x16xf32>
      %415 = vector.broadcast %413 : f32 to vector<16x16xf32>
      %416 = arith.mulf %414, %415 : vector<16x16xf32>
      %417 = arith.addf %412, %416 : vector<16x16xf32>
      %c33 = arith.constant 33 : index
      %418 = memref.load %arg2[%c33] : memref<98xf32, #tpu.memory_space<smem>>
      %419 = vector.extract_strided_slice %397 {offsets = [4, 0], sizes = [16, 16], strides = [1, 1]} : vector<22x16xf32> to vector<16x16xf32>
      %420 = vector.broadcast %418 : f32 to vector<16x16xf32>
      %421 = arith.mulf %419, %420 : vector<16x16xf32>
      %422 = arith.addf %417, %421 : vector<16x16xf32>
      %c40 = arith.constant 40 : index
      %423 = memref.load %arg2[%c40] : memref<98xf32, #tpu.memory_space<smem>>
      %424 = vector.extract_strided_slice %397 {offsets = [5, 0], sizes = [16, 16], strides = [1, 1]} : vector<22x16xf32> to vector<16x16xf32>
      %425 = vector.broadcast %423 : f32 to vector<16x16xf32>
      %426 = arith.mulf %424, %425 : vector<16x16xf32>
      %427 = arith.addf %422, %426 : vector<16x16xf32>
      %c47 = arith.constant 47 : index
      %428 = memref.load %arg2[%c47] : memref<98xf32, #tpu.memory_space<smem>>
      %429 = vector.extract_strided_slice %397 {offsets = [6, 0], sizes = [16, 16], strides = [1, 1]} : vector<22x16xf32> to vector<16x16xf32>
      %430 = vector.broadcast %428 : f32 to vector<16x16xf32>
      %431 = arith.mulf %429, %430 : vector<16x16xf32>
      %432 = arith.addf %427, %431 : vector<16x16xf32>
      %c0_227 = arith.constant 0 : index
      %c0_228 = arith.constant 0 : index
      %c6_229 = arith.constant 6 : index
      %433 = vector.load %arg7[%c0_227, %c0_228, %c6_229] : memref<2x22x22xf32, #tpu.memory_space<vmem>>, vector<1x22x16xf32>
      %434 = vector.shape_cast %433 : vector<1x22x16xf32> to vector<22x16xf32>
      %c6_230 = arith.constant 6 : index
      %435 = memref.load %arg2[%c6_230] : memref<98xf32, #tpu.memory_space<smem>>
      %436 = vector.extract_strided_slice %434 {offsets = [0, 0], sizes = [16, 16], strides = [1, 1]} : vector<22x16xf32> to vector<16x16xf32>
      %437 = vector.broadcast %435 : f32 to vector<16x16xf32>
      %438 = arith.mulf %436, %437 : vector<16x16xf32>
      %439 = arith.addf %432, %438 : vector<16x16xf32>
      %c13_231 = arith.constant 13 : index
      %440 = memref.load %arg2[%c13_231] : memref<98xf32, #tpu.memory_space<smem>>
      %441 = vector.extract_strided_slice %434 {offsets = [1, 0], sizes = [16, 16], strides = [1, 1]} : vector<22x16xf32> to vector<16x16xf32>
      %442 = vector.broadcast %440 : f32 to vector<16x16xf32>
      %443 = arith.mulf %441, %442 : vector<16x16xf32>
      %444 = arith.addf %439, %443 : vector<16x16xf32>
      %c20 = arith.constant 20 : index
      %445 = memref.load %arg2[%c20] : memref<98xf32, #tpu.memory_space<smem>>
      %446 = vector.extract_strided_slice %434 {offsets = [2, 0], sizes = [16, 16], strides = [1, 1]} : vector<22x16xf32> to vector<16x16xf32>
      %447 = vector.broadcast %445 : f32 to vector<16x16xf32>
      %448 = arith.mulf %446, %447 : vector<16x16xf32>
      %449 = arith.addf %444, %448 : vector<16x16xf32>
      %c27 = arith.constant 27 : index
      %450 = memref.load %arg2[%c27] : memref<98xf32, #tpu.memory_space<smem>>
      %451 = vector.extract_strided_slice %434 {offsets = [3, 0], sizes = [16, 16], strides = [1, 1]} : vector<22x16xf32> to vector<16x16xf32>
      %452 = vector.broadcast %450 : f32 to vector<16x16xf32>
      %453 = arith.mulf %451, %452 : vector<16x16xf32>
      %454 = arith.addf %449, %453 : vector<16x16xf32>
      %c34 = arith.constant 34 : index
      %455 = memref.load %arg2[%c34] : memref<98xf32, #tpu.memory_space<smem>>
      %456 = vector.extract_strided_slice %434 {offsets = [4, 0], sizes = [16, 16], strides = [1, 1]} : vector<22x16xf32> to vector<16x16xf32>
      %457 = vector.broadcast %455 : f32 to vector<16x16xf32>
      %458 = arith.mulf %456, %457 : vector<16x16xf32>
      %459 = arith.addf %454, %458 : vector<16x16xf32>
      %c41 = arith.constant 41 : index
      %460 = memref.load %arg2[%c41] : memref<98xf32, #tpu.memory_space<smem>>
      %461 = vector.extract_strided_slice %434 {offsets = [5, 0], sizes = [16, 16], strides = [1, 1]} : vector<22x16xf32> to vector<16x16xf32>
      %462 = vector.broadcast %460 : f32 to vector<16x16xf32>
      %463 = arith.mulf %461, %462 : vector<16x16xf32>
      %464 = arith.addf %459, %463 : vector<16x16xf32>
      %c48_232 = arith.constant 48 : index
      %465 = memref.load %arg2[%c48_232] : memref<98xf32, #tpu.memory_space<smem>>
      %466 = vector.extract_strided_slice %434 {offsets = [6, 0], sizes = [16, 16], strides = [1, 1]} : vector<22x16xf32> to vector<16x16xf32>
      %467 = vector.broadcast %465 : f32 to vector<16x16xf32>
      %468 = arith.mulf %466, %467 : vector<16x16xf32>
      %469 = arith.addf %464, %468 : vector<16x16xf32>
      %c1_233 = arith.constant 1 : index
      %c0_234 = arith.constant 0 : index
      %c0_235 = arith.constant 0 : index
      %470 = vector.load %arg7[%c1_233, %c0_234, %c0_235] : memref<2x22x22xf32, #tpu.memory_space<vmem>>, vector<1x22x16xf32>
      %471 = vector.shape_cast %470 : vector<1x22x16xf32> to vector<22x16xf32>
      %c49 = arith.constant 49 : index
      %472 = memref.load %arg2[%c49] : memref<98xf32, #tpu.memory_space<smem>>
      %473 = vector.extract_strided_slice %471 {offsets = [0, 0], sizes = [16, 16], strides = [1, 1]} : vector<22x16xf32> to vector<16x16xf32>
      %474 = vector.broadcast %472 : f32 to vector<16x16xf32>
      %475 = arith.mulf %473, %474 : vector<16x16xf32>
      %476 = arith.addf %469, %475 : vector<16x16xf32>
      %c56 = arith.constant 56 : index
      %477 = memref.load %arg2[%c56] : memref<98xf32, #tpu.memory_space<smem>>
      %478 = vector.extract_strided_slice %471 {offsets = [1, 0], sizes = [16, 16], strides = [1, 1]} : vector<22x16xf32> to vector<16x16xf32>
      %479 = vector.broadcast %477 : f32 to vector<16x16xf32>
      %480 = arith.mulf %478, %479 : vector<16x16xf32>
      %481 = arith.addf %476, %480 : vector<16x16xf32>
      %c63 = arith.constant 63 : index
      %482 = memref.load %arg2[%c63] : memref<98xf32, #tpu.memory_space<smem>>
      %483 = vector.extract_strided_slice %471 {offsets = [2, 0], sizes = [16, 16], strides = [1, 1]} : vector<22x16xf32> to vector<16x16xf32>
      %484 = vector.broadcast %482 : f32 to vector<16x16xf32>
      %485 = arith.mulf %483, %484 : vector<16x16xf32>
      %486 = arith.addf %481, %485 : vector<16x16xf32>
      %c70 = arith.constant 70 : index
      %487 = memref.load %arg2[%c70] : memref<98xf32, #tpu.memory_space<smem>>
      %488 = vector.extract_strided_slice %471 {offsets = [3, 0], sizes = [16, 16], strides = [1, 1]} : vector<22x16xf32> to vector<16x16xf32>
      %489 = vector.broadcast %487 : f32 to vector<16x16xf32>
      %490 = arith.mulf %488, %489 : vector<16x16xf32>
      %491 = arith.addf %486, %490 : vector<16x16xf32>
      %c77 = arith.constant 77 : index
      %492 = memref.load %arg2[%c77] : memref<98xf32, #tpu.memory_space<smem>>
      %493 = vector.extract_strided_slice %471 {offsets = [4, 0], sizes = [16, 16], strides = [1, 1]} : vector<22x16xf32> to vector<16x16xf32>
      %494 = vector.broadcast %492 : f32 to vector<16x16xf32>
      %495 = arith.mulf %493, %494 : vector<16x16xf32>
      %496 = arith.addf %491, %495 : vector<16x16xf32>
      %c84 = arith.constant 84 : index
      %497 = memref.load %arg2[%c84] : memref<98xf32, #tpu.memory_space<smem>>
      %498 = vector.extract_strided_slice %471 {offsets = [5, 0], sizes = [16, 16], strides = [1, 1]} : vector<22x16xf32> to vector<16x16xf32>
      %499 = vector.broadcast %497 : f32 to vector<16x16xf32>
      %500 = arith.mulf %498, %499 : vector<16x16xf32>
      %501 = arith.addf %496, %500 : vector<16x16xf32>
      %c91 = arith.constant 91 : index
      %502 = memref.load %arg2[%c91] : memref<98xf32, #tpu.memory_space<smem>>
      %503 = vector.extract_strided_slice %471 {offsets = [6, 0], sizes = [16, 16], strides = [1, 1]} : vector<22x16xf32> to vector<16x16xf32>
      %504 = vector.broadcast %502 : f32 to vector<16x16xf32>
      %505 = arith.mulf %503, %504 : vector<16x16xf32>
      %506 = arith.addf %501, %505 : vector<16x16xf32>
      %c1_236 = arith.constant 1 : index
      %c0_237 = arith.constant 0 : index
      %c1_238 = arith.constant 1 : index
      %507 = vector.load %arg7[%c1_236, %c0_237, %c1_238] : memref<2x22x22xf32, #tpu.memory_space<vmem>>, vector<1x22x16xf32>
      %508 = vector.shape_cast %507 : vector<1x22x16xf32> to vector<22x16xf32>
      %c50 = arith.constant 50 : index
      %509 = memref.load %arg2[%c50] : memref<98xf32, #tpu.memory_space<smem>>
      %510 = vector.extract_strided_slice %508 {offsets = [0, 0], sizes = [16, 16], strides = [1, 1]} : vector<22x16xf32> to vector<16x16xf32>
      %511 = vector.broadcast %509 : f32 to vector<16x16xf32>
      %512 = arith.mulf %510, %511 : vector<16x16xf32>
      %513 = arith.addf %506, %512 : vector<16x16xf32>
      %c57 = arith.constant 57 : index
      %514 = memref.load %arg2[%c57] : memref<98xf32, #tpu.memory_space<smem>>
      %515 = vector.extract_strided_slice %508 {offsets = [1, 0], sizes = [16, 16], strides = [1, 1]} : vector<22x16xf32> to vector<16x16xf32>
      %516 = vector.broadcast %514 : f32 to vector<16x16xf32>
      %517 = arith.mulf %515, %516 : vector<16x16xf32>
      %518 = arith.addf %513, %517 : vector<16x16xf32>
      %c64_239 = arith.constant 64 : index
      %519 = memref.load %arg2[%c64_239] : memref<98xf32, #tpu.memory_space<smem>>
      %520 = vector.extract_strided_slice %508 {offsets = [2, 0], sizes = [16, 16], strides = [1, 1]} : vector<22x16xf32> to vector<16x16xf32>
      %521 = vector.broadcast %519 : f32 to vector<16x16xf32>
      %522 = arith.mulf %520, %521 : vector<16x16xf32>
      %523 = arith.addf %518, %522 : vector<16x16xf32>
      %c71 = arith.constant 71 : index
      %524 = memref.load %arg2[%c71] : memref<98xf32, #tpu.memory_space<smem>>
      %525 = vector.extract_strided_slice %508 {offsets = [3, 0], sizes = [16, 16], strides = [1, 1]} : vector<22x16xf32> to vector<16x16xf32>
      %526 = vector.broadcast %524 : f32 to vector<16x16xf32>
      %527 = arith.mulf %525, %526 : vector<16x16xf32>
      %528 = arith.addf %523, %527 : vector<16x16xf32>
      %c78 = arith.constant 78 : index
      %529 = memref.load %arg2[%c78] : memref<98xf32, #tpu.memory_space<smem>>
      %530 = vector.extract_strided_slice %508 {offsets = [4, 0], sizes = [16, 16], strides = [1, 1]} : vector<22x16xf32> to vector<16x16xf32>
      %531 = vector.broadcast %529 : f32 to vector<16x16xf32>
      %532 = arith.mulf %530, %531 : vector<16x16xf32>
      %533 = arith.addf %528, %532 : vector<16x16xf32>
      %c85 = arith.constant 85 : index
      %534 = memref.load %arg2[%c85] : memref<98xf32, #tpu.memory_space<smem>>
      %535 = vector.extract_strided_slice %508 {offsets = [5, 0], sizes = [16, 16], strides = [1, 1]} : vector<22x16xf32> to vector<16x16xf32>
      %536 = vector.broadcast %534 : f32 to vector<16x16xf32>
      %537 = arith.mulf %535, %536 : vector<16x16xf32>
      %538 = arith.addf %533, %537 : vector<16x16xf32>
      %c92 = arith.constant 92 : index
      %539 = memref.load %arg2[%c92] : memref<98xf32, #tpu.memory_space<smem>>
      %540 = vector.extract_strided_slice %508 {offsets = [6, 0], sizes = [16, 16], strides = [1, 1]} : vector<22x16xf32> to vector<16x16xf32>
      %541 = vector.broadcast %539 : f32 to vector<16x16xf32>
      %542 = arith.mulf %540, %541 : vector<16x16xf32>
      %543 = arith.addf %538, %542 : vector<16x16xf32>
      %c1_240 = arith.constant 1 : index
      %c0_241 = arith.constant 0 : index
      %c2_242 = arith.constant 2 : index
      %544 = vector.load %arg7[%c1_240, %c0_241, %c2_242] : memref<2x22x22xf32, #tpu.memory_space<vmem>>, vector<1x22x16xf32>
      %545 = vector.shape_cast %544 : vector<1x22x16xf32> to vector<22x16xf32>
      %c51 = arith.constant 51 : index
      %546 = memref.load %arg2[%c51] : memref<98xf32, #tpu.memory_space<smem>>
      %547 = vector.extract_strided_slice %545 {offsets = [0, 0], sizes = [16, 16], strides = [1, 1]} : vector<22x16xf32> to vector<16x16xf32>
      %548 = vector.broadcast %546 : f32 to vector<16x16xf32>
      %549 = arith.mulf %547, %548 : vector<16x16xf32>
      %550 = arith.addf %543, %549 : vector<16x16xf32>
      %c58 = arith.constant 58 : index
      %551 = memref.load %arg2[%c58] : memref<98xf32, #tpu.memory_space<smem>>
      %552 = vector.extract_strided_slice %545 {offsets = [1, 0], sizes = [16, 16], strides = [1, 1]} : vector<22x16xf32> to vector<16x16xf32>
      %553 = vector.broadcast %551 : f32 to vector<16x16xf32>
      %554 = arith.mulf %552, %553 : vector<16x16xf32>
      %555 = arith.addf %550, %554 : vector<16x16xf32>
      %c65 = arith.constant 65 : index
      %556 = memref.load %arg2[%c65] : memref<98xf32, #tpu.memory_space<smem>>
      %557 = vector.extract_strided_slice %545 {offsets = [2, 0], sizes = [16, 16], strides = [1, 1]} : vector<22x16xf32> to vector<16x16xf32>
      %558 = vector.broadcast %556 : f32 to vector<16x16xf32>
      %559 = arith.mulf %557, %558 : vector<16x16xf32>
      %560 = arith.addf %555, %559 : vector<16x16xf32>
      %c72 = arith.constant 72 : index
      %561 = memref.load %arg2[%c72] : memref<98xf32, #tpu.memory_space<smem>>
      %562 = vector.extract_strided_slice %545 {offsets = [3, 0], sizes = [16, 16], strides = [1, 1]} : vector<22x16xf32> to vector<16x16xf32>
      %563 = vector.broadcast %561 : f32 to vector<16x16xf32>
      %564 = arith.mulf %562, %563 : vector<16x16xf32>
      %565 = arith.addf %560, %564 : vector<16x16xf32>
      %c79 = arith.constant 79 : index
      %566 = memref.load %arg2[%c79] : memref<98xf32, #tpu.memory_space<smem>>
      %567 = vector.extract_strided_slice %545 {offsets = [4, 0], sizes = [16, 16], strides = [1, 1]} : vector<22x16xf32> to vector<16x16xf32>
      %568 = vector.broadcast %566 : f32 to vector<16x16xf32>
      %569 = arith.mulf %567, %568 : vector<16x16xf32>
      %570 = arith.addf %565, %569 : vector<16x16xf32>
      %c86 = arith.constant 86 : index
      %571 = memref.load %arg2[%c86] : memref<98xf32, #tpu.memory_space<smem>>
      %572 = vector.extract_strided_slice %545 {offsets = [5, 0], sizes = [16, 16], strides = [1, 1]} : vector<22x16xf32> to vector<16x16xf32>
      %573 = vector.broadcast %571 : f32 to vector<16x16xf32>
      %574 = arith.mulf %572, %573 : vector<16x16xf32>
      %575 = arith.addf %570, %574 : vector<16x16xf32>
      %c93 = arith.constant 93 : index
      %576 = memref.load %arg2[%c93] : memref<98xf32, #tpu.memory_space<smem>>
      %577 = vector.extract_strided_slice %545 {offsets = [6, 0], sizes = [16, 16], strides = [1, 1]} : vector<22x16xf32> to vector<16x16xf32>
      %578 = vector.broadcast %576 : f32 to vector<16x16xf32>
      %579 = arith.mulf %577, %578 : vector<16x16xf32>
      %580 = arith.addf %575, %579 : vector<16x16xf32>
      %c1_243 = arith.constant 1 : index
      %c0_244 = arith.constant 0 : index
      %c3_245 = arith.constant 3 : index
      %581 = vector.load %arg7[%c1_243, %c0_244, %c3_245] : memref<2x22x22xf32, #tpu.memory_space<vmem>>, vector<1x22x16xf32>
      %582 = vector.shape_cast %581 : vector<1x22x16xf32> to vector<22x16xf32>
      %c52 = arith.constant 52 : index
      %583 = memref.load %arg2[%c52] : memref<98xf32, #tpu.memory_space<smem>>
      %584 = vector.extract_strided_slice %582 {offsets = [0, 0], sizes = [16, 16], strides = [1, 1]} : vector<22x16xf32> to vector<16x16xf32>
      %585 = vector.broadcast %583 : f32 to vector<16x16xf32>
      %586 = arith.mulf %584, %585 : vector<16x16xf32>
      %587 = arith.addf %580, %586 : vector<16x16xf32>
      %c59 = arith.constant 59 : index
      %588 = memref.load %arg2[%c59] : memref<98xf32, #tpu.memory_space<smem>>
      %589 = vector.extract_strided_slice %582 {offsets = [1, 0], sizes = [16, 16], strides = [1, 1]} : vector<22x16xf32> to vector<16x16xf32>
      %590 = vector.broadcast %588 : f32 to vector<16x16xf32>
      %591 = arith.mulf %589, %590 : vector<16x16xf32>
      %592 = arith.addf %587, %591 : vector<16x16xf32>
      %c66 = arith.constant 66 : index
      %593 = memref.load %arg2[%c66] : memref<98xf32, #tpu.memory_space<smem>>
      %594 = vector.extract_strided_slice %582 {offsets = [2, 0], sizes = [16, 16], strides = [1, 1]} : vector<22x16xf32> to vector<16x16xf32>
      %595 = vector.broadcast %593 : f32 to vector<16x16xf32>
      %596 = arith.mulf %594, %595 : vector<16x16xf32>
      %597 = arith.addf %592, %596 : vector<16x16xf32>
      %c73 = arith.constant 73 : index
      %598 = memref.load %arg2[%c73] : memref<98xf32, #tpu.memory_space<smem>>
      %599 = vector.extract_strided_slice %582 {offsets = [3, 0], sizes = [16, 16], strides = [1, 1]} : vector<22x16xf32> to vector<16x16xf32>
      %600 = vector.broadcast %598 : f32 to vector<16x16xf32>
      %601 = arith.mulf %599, %600 : vector<16x16xf32>
      %602 = arith.addf %597, %601 : vector<16x16xf32>
      %c80_246 = arith.constant 80 : index
      %603 = memref.load %arg2[%c80_246] : memref<98xf32, #tpu.memory_space<smem>>
      %604 = vector.extract_strided_slice %582 {offsets = [4, 0], sizes = [16, 16], strides = [1, 1]} : vector<22x16xf32> to vector<16x16xf32>
      %605 = vector.broadcast %603 : f32 to vector<16x16xf32>
      %606 = arith.mulf %604, %605 : vector<16x16xf32>
      %607 = arith.addf %602, %606 : vector<16x16xf32>
      %c87 = arith.constant 87 : index
      %608 = memref.load %arg2[%c87] : memref<98xf32, #tpu.memory_space<smem>>
      %609 = vector.extract_strided_slice %582 {offsets = [5, 0], sizes = [16, 16], strides = [1, 1]} : vector<22x16xf32> to vector<16x16xf32>
      %610 = vector.broadcast %608 : f32 to vector<16x16xf32>
      %611 = arith.mulf %609, %610 : vector<16x16xf32>
      %612 = arith.addf %607, %611 : vector<16x16xf32>
      %c94 = arith.constant 94 : index
      %613 = memref.load %arg2[%c94] : memref<98xf32, #tpu.memory_space<smem>>
      %614 = vector.extract_strided_slice %582 {offsets = [6, 0], sizes = [16, 16], strides = [1, 1]} : vector<22x16xf32> to vector<16x16xf32>
      %615 = vector.broadcast %613 : f32 to vector<16x16xf32>
      %616 = arith.mulf %614, %615 : vector<16x16xf32>
      %617 = arith.addf %612, %616 : vector<16x16xf32>
      %c1_247 = arith.constant 1 : index
      %c0_248 = arith.constant 0 : index
      %c4_249 = arith.constant 4 : index
      %618 = vector.load %arg7[%c1_247, %c0_248, %c4_249] : memref<2x22x22xf32, #tpu.memory_space<vmem>>, vector<1x22x16xf32>
      %619 = vector.shape_cast %618 : vector<1x22x16xf32> to vector<22x16xf32>
      %c53 = arith.constant 53 : index
      %620 = memref.load %arg2[%c53] : memref<98xf32, #tpu.memory_space<smem>>
      %621 = vector.extract_strided_slice %619 {offsets = [0, 0], sizes = [16, 16], strides = [1, 1]} : vector<22x16xf32> to vector<16x16xf32>
      %622 = vector.broadcast %620 : f32 to vector<16x16xf32>
      %623 = arith.mulf %621, %622 : vector<16x16xf32>
      %624 = arith.addf %617, %623 : vector<16x16xf32>
      %c60 = arith.constant 60 : index
      %625 = memref.load %arg2[%c60] : memref<98xf32, #tpu.memory_space<smem>>
      %626 = vector.extract_strided_slice %619 {offsets = [1, 0], sizes = [16, 16], strides = [1, 1]} : vector<22x16xf32> to vector<16x16xf32>
      %627 = vector.broadcast %625 : f32 to vector<16x16xf32>
      %628 = arith.mulf %626, %627 : vector<16x16xf32>
      %629 = arith.addf %624, %628 : vector<16x16xf32>
      %c67 = arith.constant 67 : index
      %630 = memref.load %arg2[%c67] : memref<98xf32, #tpu.memory_space<smem>>
      %631 = vector.extract_strided_slice %619 {offsets = [2, 0], sizes = [16, 16], strides = [1, 1]} : vector<22x16xf32> to vector<16x16xf32>
      %632 = vector.broadcast %630 : f32 to vector<16x16xf32>
      %633 = arith.mulf %631, %632 : vector<16x16xf32>
      %634 = arith.addf %629, %633 : vector<16x16xf32>
      %c74 = arith.constant 74 : index
      %635 = memref.load %arg2[%c74] : memref<98xf32, #tpu.memory_space<smem>>
      %636 = vector.extract_strided_slice %619 {offsets = [3, 0], sizes = [16, 16], strides = [1, 1]} : vector<22x16xf32> to vector<16x16xf32>
      %637 = vector.broadcast %635 : f32 to vector<16x16xf32>
      %638 = arith.mulf %636, %637 : vector<16x16xf32>
      %639 = arith.addf %634, %638 : vector<16x16xf32>
      %c81 = arith.constant 81 : index
      %640 = memref.load %arg2[%c81] : memref<98xf32, #tpu.memory_space<smem>>
      %641 = vector.extract_strided_slice %619 {offsets = [4, 0], sizes = [16, 16], strides = [1, 1]} : vector<22x16xf32> to vector<16x16xf32>
      %642 = vector.broadcast %640 : f32 to vector<16x16xf32>
      %643 = arith.mulf %641, %642 : vector<16x16xf32>
      %644 = arith.addf %639, %643 : vector<16x16xf32>
      %c88 = arith.constant 88 : index
      %645 = memref.load %arg2[%c88] : memref<98xf32, #tpu.memory_space<smem>>
      %646 = vector.extract_strided_slice %619 {offsets = [5, 0], sizes = [16, 16], strides = [1, 1]} : vector<22x16xf32> to vector<16x16xf32>
      %647 = vector.broadcast %645 : f32 to vector<16x16xf32>
      %648 = arith.mulf %646, %647 : vector<16x16xf32>
      %649 = arith.addf %644, %648 : vector<16x16xf32>
      %c95 = arith.constant 95 : index
      %650 = memref.load %arg2[%c95] : memref<98xf32, #tpu.memory_space<smem>>
      %651 = vector.extract_strided_slice %619 {offsets = [6, 0], sizes = [16, 16], strides = [1, 1]} : vector<22x16xf32> to vector<16x16xf32>
      %652 = vector.broadcast %650 : f32 to vector<16x16xf32>
      %653 = arith.mulf %651, %652 : vector<16x16xf32>
      %654 = arith.addf %649, %653 : vector<16x16xf32>
      %c1_250 = arith.constant 1 : index
      %c0_251 = arith.constant 0 : index
      %c5_252 = arith.constant 5 : index
      %655 = vector.load %arg7[%c1_250, %c0_251, %c5_252] : memref<2x22x22xf32, #tpu.memory_space<vmem>>, vector<1x22x16xf32>
      %656 = vector.shape_cast %655 : vector<1x22x16xf32> to vector<22x16xf32>
      %c54 = arith.constant 54 : index
      %657 = memref.load %arg2[%c54] : memref<98xf32, #tpu.memory_space<smem>>
      %658 = vector.extract_strided_slice %656 {offsets = [0, 0], sizes = [16, 16], strides = [1, 1]} : vector<22x16xf32> to vector<16x16xf32>
      %659 = vector.broadcast %657 : f32 to vector<16x16xf32>
      %660 = arith.mulf %658, %659 : vector<16x16xf32>
      %661 = arith.addf %654, %660 : vector<16x16xf32>
      %c61 = arith.constant 61 : index
      %662 = memref.load %arg2[%c61] : memref<98xf32, #tpu.memory_space<smem>>
      %663 = vector.extract_strided_slice %656 {offsets = [1, 0], sizes = [16, 16], strides = [1, 1]} : vector<22x16xf32> to vector<16x16xf32>
      %664 = vector.broadcast %662 : f32 to vector<16x16xf32>
      %665 = arith.mulf %663, %664 : vector<16x16xf32>
      %666 = arith.addf %661, %665 : vector<16x16xf32>
      %c68 = arith.constant 68 : index
      %667 = memref.load %arg2[%c68] : memref<98xf32, #tpu.memory_space<smem>>
      %668 = vector.extract_strided_slice %656 {offsets = [2, 0], sizes = [16, 16], strides = [1, 1]} : vector<22x16xf32> to vector<16x16xf32>
      %669 = vector.broadcast %667 : f32 to vector<16x16xf32>
      %670 = arith.mulf %668, %669 : vector<16x16xf32>
      %671 = arith.addf %666, %670 : vector<16x16xf32>
      %c75 = arith.constant 75 : index
      %672 = memref.load %arg2[%c75] : memref<98xf32, #tpu.memory_space<smem>>
      %673 = vector.extract_strided_slice %656 {offsets = [3, 0], sizes = [16, 16], strides = [1, 1]} : vector<22x16xf32> to vector<16x16xf32>
      %674 = vector.broadcast %672 : f32 to vector<16x16xf32>
      %675 = arith.mulf %673, %674 : vector<16x16xf32>
      %676 = arith.addf %671, %675 : vector<16x16xf32>
      %c82 = arith.constant 82 : index
      %677 = memref.load %arg2[%c82] : memref<98xf32, #tpu.memory_space<smem>>
      %678 = vector.extract_strided_slice %656 {offsets = [4, 0], sizes = [16, 16], strides = [1, 1]} : vector<22x16xf32> to vector<16x16xf32>
      %679 = vector.broadcast %677 : f32 to vector<16x16xf32>
      %680 = arith.mulf %678, %679 : vector<16x16xf32>
      %681 = arith.addf %676, %680 : vector<16x16xf32>
      %c89 = arith.constant 89 : index
      %682 = memref.load %arg2[%c89] : memref<98xf32, #tpu.memory_space<smem>>
      %683 = vector.extract_strided_slice %656 {offsets = [5, 0], sizes = [16, 16], strides = [1, 1]} : vector<22x16xf32> to vector<16x16xf32>
      %684 = vector.broadcast %682 : f32 to vector<16x16xf32>
      %685 = arith.mulf %683, %684 : vector<16x16xf32>
      %686 = arith.addf %681, %685 : vector<16x16xf32>
      %c96_253 = arith.constant 96 : index
      %687 = memref.load %arg2[%c96_253] : memref<98xf32, #tpu.memory_space<smem>>
      %688 = vector.extract_strided_slice %656 {offsets = [6, 0], sizes = [16, 16], strides = [1, 1]} : vector<22x16xf32> to vector<16x16xf32>
      %689 = vector.broadcast %687 : f32 to vector<16x16xf32>
      %690 = arith.mulf %688, %689 : vector<16x16xf32>
      %691 = arith.addf %686, %690 : vector<16x16xf32>
      %c1_254 = arith.constant 1 : index
      %c0_255 = arith.constant 0 : index
      %c6_256 = arith.constant 6 : index
      %692 = vector.load %arg7[%c1_254, %c0_255, %c6_256] : memref<2x22x22xf32, #tpu.memory_space<vmem>>, vector<1x22x16xf32>
      %693 = vector.shape_cast %692 : vector<1x22x16xf32> to vector<22x16xf32>
      %c55 = arith.constant 55 : index
      %694 = memref.load %arg2[%c55] : memref<98xf32, #tpu.memory_space<smem>>
      %695 = vector.extract_strided_slice %693 {offsets = [0, 0], sizes = [16, 16], strides = [1, 1]} : vector<22x16xf32> to vector<16x16xf32>
      %696 = vector.broadcast %694 : f32 to vector<16x16xf32>
      %697 = arith.mulf %695, %696 : vector<16x16xf32>
      %698 = arith.addf %691, %697 : vector<16x16xf32>
      %c62 = arith.constant 62 : index
      %699 = memref.load %arg2[%c62] : memref<98xf32, #tpu.memory_space<smem>>
      %700 = vector.extract_strided_slice %693 {offsets = [1, 0], sizes = [16, 16], strides = [1, 1]} : vector<22x16xf32> to vector<16x16xf32>
      %701 = vector.broadcast %699 : f32 to vector<16x16xf32>
      %702 = arith.mulf %700, %701 : vector<16x16xf32>
      %703 = arith.addf %698, %702 : vector<16x16xf32>
      %c69 = arith.constant 69 : index
      %704 = memref.load %arg2[%c69] : memref<98xf32, #tpu.memory_space<smem>>
      %705 = vector.extract_strided_slice %693 {offsets = [2, 0], sizes = [16, 16], strides = [1, 1]} : vector<22x16xf32> to vector<16x16xf32>
      %706 = vector.broadcast %704 : f32 to vector<16x16xf32>
      %707 = arith.mulf %705, %706 : vector<16x16xf32>
      %708 = arith.addf %703, %707 : vector<16x16xf32>
      %c76 = arith.constant 76 : index
      %709 = memref.load %arg2[%c76] : memref<98xf32, #tpu.memory_space<smem>>
      %710 = vector.extract_strided_slice %693 {offsets = [3, 0], sizes = [16, 16], strides = [1, 1]} : vector<22x16xf32> to vector<16x16xf32>
      %711 = vector.broadcast %709 : f32 to vector<16x16xf32>
      %712 = arith.mulf %710, %711 : vector<16x16xf32>
      %713 = arith.addf %708, %712 : vector<16x16xf32>
      %c83 = arith.constant 83 : index
      %714 = memref.load %arg2[%c83] : memref<98xf32, #tpu.memory_space<smem>>
      %715 = vector.extract_strided_slice %693 {offsets = [4, 0], sizes = [16, 16], strides = [1, 1]} : vector<22x16xf32> to vector<16x16xf32>
      %716 = vector.broadcast %714 : f32 to vector<16x16xf32>
      %717 = arith.mulf %715, %716 : vector<16x16xf32>
      %718 = arith.addf %713, %717 : vector<16x16xf32>
      %c90 = arith.constant 90 : index
      %719 = memref.load %arg2[%c90] : memref<98xf32, #tpu.memory_space<smem>>
      %720 = vector.extract_strided_slice %693 {offsets = [5, 0], sizes = [16, 16], strides = [1, 1]} : vector<22x16xf32> to vector<16x16xf32>
      %721 = vector.broadcast %719 : f32 to vector<16x16xf32>
      %722 = arith.mulf %720, %721 : vector<16x16xf32>
      %723 = arith.addf %718, %722 : vector<16x16xf32>
      %c97 = arith.constant 97 : index
      %724 = memref.load %arg2[%c97] : memref<98xf32, #tpu.memory_space<smem>>
      %725 = vector.extract_strided_slice %693 {offsets = [6, 0], sizes = [16, 16], strides = [1, 1]} : vector<22x16xf32> to vector<16x16xf32>
      %726 = vector.broadcast %724 : f32 to vector<16x16xf32>
      %727 = arith.mulf %725, %726 : vector<16x16xf32>
      %728 = arith.addf %723, %727 : vector<16x16xf32>
      %729 = arith.negf %728 : vector<16x16xf32>
      %730 = math.exp %729 : vector<16x16xf32>
      %cst_257 = arith.constant 1.000000e+00 : f32
      %731 = vector.broadcast %cst_257 : f32 to vector<16x16xf32>
      %732 = arith.addf %731, %730 : vector<16x16xf32>
      %733 = arith.divf %731, %732 : vector<16x16xf32>
      %734 = vector.extract_strided_slice %733 {offsets = [0, 0], sizes = [1, 16], strides = [1, 1]} : vector<16x16xf32> to vector<1x16xf32>
      %c0_258 = arith.constant 0 : index
      %c0_259 = arith.constant 0 : index
      %c0_260 = arith.constant 0 : index
      %735 = vector.load %arg4[%c0_258, %c0_259, %c0_260] : memref<1x1x256xf32, #tpu.memory_space<vmem>>, vector<1x1x16xf32>
      %736 = vector.shape_cast %735 : vector<1x1x16xf32> to vector<1x16xf32>
      %737 = vector.shape_cast %734 : vector<1x16xf32> to vector<1x1x16xf32>
      tpu.vector_store %arg4[%c0_258, %c0_259, %c0_260], %737 {strides = array<i32>} : memref<1x1x256xf32, #tpu.memory_space<vmem>>, vector<1x1x16xf32>,
      %738 = vector.extract_strided_slice %733 {offsets = [1, 0], sizes = [1, 16], strides = [1, 1]} : vector<16x16xf32> to vector<1x16xf32>
      %c0_261 = arith.constant 0 : index
      %c0_262 = arith.constant 0 : index
      %c16_263 = arith.constant 16 : index
      %739 = vector.load %arg4[%c0_261, %c0_262, %c16_263] : memref<1x1x256xf32, #tpu.memory_space<vmem>>, vector<1x1x16xf32>
      %740 = vector.shape_cast %739 : vector<1x1x16xf32> to vector<1x16xf32>
      %741 = vector.shape_cast %738 : vector<1x16xf32> to vector<1x1x16xf32>
      tpu.vector_store %arg4[%c0_261, %c0_262, %c16_263], %741 {strides = array<i32>} : memref<1x1x256xf32, #tpu.memory_space<vmem>>, vector<1x1x16xf32>,
      %742 = vector.extract_strided_slice %733 {offsets = [2, 0], sizes = [1, 16], strides = [1, 1]} : vector<16x16xf32> to vector<1x16xf32>
      %c0_264 = arith.constant 0 : index
      %c0_265 = arith.constant 0 : index
      %c32_266 = arith.constant 32 : index
      %743 = vector.load %arg4[%c0_264, %c0_265, %c32_266] : memref<1x1x256xf32, #tpu.memory_space<vmem>>, vector<1x1x16xf32>
      %744 = vector.shape_cast %743 : vector<1x1x16xf32> to vector<1x16xf32>
      %745 = vector.shape_cast %742 : vector<1x16xf32> to vector<1x1x16xf32>
      tpu.vector_store %arg4[%c0_264, %c0_265, %c32_266], %745 {strides = array<i32>} : memref<1x1x256xf32, #tpu.memory_space<vmem>>, vector<1x1x16xf32>,
      %746 = vector.extract_strided_slice %733 {offsets = [3, 0], sizes = [1, 16], strides = [1, 1]} : vector<16x16xf32> to vector<1x16xf32>
      %c0_267 = arith.constant 0 : index
      %c0_268 = arith.constant 0 : index
      %c48_269 = arith.constant 48 : index
      %747 = vector.load %arg4[%c0_267, %c0_268, %c48_269] : memref<1x1x256xf32, #tpu.memory_space<vmem>>, vector<1x1x16xf32>
      %748 = vector.shape_cast %747 : vector<1x1x16xf32> to vector<1x16xf32>
      %749 = vector.shape_cast %746 : vector<1x16xf32> to vector<1x1x16xf32>
      tpu.vector_store %arg4[%c0_267, %c0_268, %c48_269], %749 {strides = array<i32>} : memref<1x1x256xf32, #tpu.memory_space<vmem>>, vector<1x1x16xf32>,
      %750 = vector.extract_strided_slice %733 {offsets = [4, 0], sizes = [1, 16], strides = [1, 1]} : vector<16x16xf32> to vector<1x16xf32>
      %c0_270 = arith.constant 0 : index
      %c0_271 = arith.constant 0 : index
      %c64_272 = arith.constant 64 : index
      %751 = vector.load %arg4[%c0_270, %c0_271, %c64_272] : memref<1x1x256xf32, #tpu.memory_space<vmem>>, vector<1x1x16xf32>
      %752 = vector.shape_cast %751 : vector<1x1x16xf32> to vector<1x16xf32>
      %753 = vector.shape_cast %750 : vector<1x16xf32> to vector<1x1x16xf32>
      tpu.vector_store %arg4[%c0_270, %c0_271, %c64_272], %753 {strides = array<i32>} : memref<1x1x256xf32, #tpu.memory_space<vmem>>, vector<1x1x16xf32>,
      %754 = vector.extract_strided_slice %733 {offsets = [5, 0], sizes = [1, 16], strides = [1, 1]} : vector<16x16xf32> to vector<1x16xf32>
      %c0_273 = arith.constant 0 : index
      %c0_274 = arith.constant 0 : index
      %c80_275 = arith.constant 80 : index
      %755 = vector.load %arg4[%c0_273, %c0_274, %c80_275] : memref<1x1x256xf32, #tpu.memory_space<vmem>>, vector<1x1x16xf32>
      %756 = vector.shape_cast %755 : vector<1x1x16xf32> to vector<1x16xf32>
      %757 = vector.shape_cast %754 : vector<1x16xf32> to vector<1x1x16xf32>
      tpu.vector_store %arg4[%c0_273, %c0_274, %c80_275], %757 {strides = array<i32>} : memref<1x1x256xf32, #tpu.memory_space<vmem>>, vector<1x1x16xf32>,
      %758 = vector.extract_strided_slice %733 {offsets = [6, 0], sizes = [1, 16], strides = [1, 1]} : vector<16x16xf32> to vector<1x16xf32>
      %c0_276 = arith.constant 0 : index
      %c0_277 = arith.constant 0 : index
      %c96_278 = arith.constant 96 : index
      %759 = vector.load %arg4[%c0_276, %c0_277, %c96_278] : memref<1x1x256xf32, #tpu.memory_space<vmem>>, vector<1x1x16xf32>
      %760 = vector.shape_cast %759 : vector<1x1x16xf32> to vector<1x16xf32>
      %761 = vector.shape_cast %758 : vector<1x16xf32> to vector<1x1x16xf32>
      tpu.vector_store %arg4[%c0_276, %c0_277, %c96_278], %761 {strides = array<i32>} : memref<1x1x256xf32, #tpu.memory_space<vmem>>, vector<1x1x16xf32>,
      %762 = vector.extract_strided_slice %733 {offsets = [7, 0], sizes = [1, 16], strides = [1, 1]} : vector<16x16xf32> to vector<1x16xf32>
      %c0_279 = arith.constant 0 : index
      %c0_280 = arith.constant 0 : index
      %c112_281 = arith.constant 112 : index
      %763 = vector.load %arg4[%c0_279, %c0_280, %c112_281] : memref<1x1x256xf32, #tpu.memory_space<vmem>>, vector<1x1x16xf32>
      %764 = vector.shape_cast %763 : vector<1x1x16xf32> to vector<1x16xf32>
      %765 = vector.shape_cast %762 : vector<1x16xf32> to vector<1x1x16xf32>
      tpu.vector_store %arg4[%c0_279, %c0_280, %c112_281], %765 {strides = array<i32>} : memref<1x1x256xf32, #tpu.memory_space<vmem>>, vector<1x1x16xf32>,
      %766 = vector.extract_strided_slice %733 {offsets = [8, 0], sizes = [1, 16], strides = [1, 1]} : vector<16x16xf32> to vector<1x16xf32>
      %c0_282 = arith.constant 0 : index
      %c0_283 = arith.constant 0 : index
      %c128_284 = arith.constant 128 : index
      %767 = vector.load %arg4[%c0_282, %c0_283, %c128_284] : memref<1x1x256xf32, #tpu.memory_space<vmem>>, vector<1x1x16xf32>
      %768 = vector.shape_cast %767 : vector<1x1x16xf32> to vector<1x16xf32>
      %769 = vector.shape_cast %766 : vector<1x16xf32> to vector<1x1x16xf32>
      tpu.vector_store %arg4[%c0_282, %c0_283, %c128_284], %769 {strides = array<i32>} : memref<1x1x256xf32, #tpu.memory_space<vmem>>, vector<1x1x16xf32>,
      %770 = vector.extract_strided_slice %733 {offsets = [9, 0], sizes = [1, 16], strides = [1, 1]} : vector<16x16xf32> to vector<1x16xf32>
      %c0_285 = arith.constant 0 : index
      %c0_286 = arith.constant 0 : index
      %c144_287 = arith.constant 144 : index
      %771 = vector.load %arg4[%c0_285, %c0_286, %c144_287] : memref<1x1x256xf32, #tpu.memory_space<vmem>>, vector<1x1x16xf32>
      %772 = vector.shape_cast %771 : vector<1x1x16xf32> to vector<1x16xf32>
      %773 = vector.shape_cast %770 : vector<1x16xf32> to vector<1x1x16xf32>
      tpu.vector_store %arg4[%c0_285, %c0_286, %c144_287], %773 {strides = array<i32>} : memref<1x1x256xf32, #tpu.memory_space<vmem>>, vector<1x1x16xf32>,
      %774 = vector.extract_strided_slice %733 {offsets = [10, 0], sizes = [1, 16], strides = [1, 1]} : vector<16x16xf32> to vector<1x16xf32>
      %c0_288 = arith.constant 0 : index
      %c0_289 = arith.constant 0 : index
      %c160_290 = arith.constant 160 : index
      %775 = vector.load %arg4[%c0_288, %c0_289, %c160_290] : memref<1x1x256xf32, #tpu.memory_space<vmem>>, vector<1x1x16xf32>
      %776 = vector.shape_cast %775 : vector<1x1x16xf32> to vector<1x16xf32>
      %777 = vector.shape_cast %774 : vector<1x16xf32> to vector<1x1x16xf32>
      tpu.vector_store %arg4[%c0_288, %c0_289, %c160_290], %777 {strides = array<i32>} : memref<1x1x256xf32, #tpu.memory_space<vmem>>, vector<1x1x16xf32>,
      %778 = vector.extract_strided_slice %733 {offsets = [11, 0], sizes = [1, 16], strides = [1, 1]} : vector<16x16xf32> to vector<1x16xf32>
      %c0_291 = arith.constant 0 : index
      %c0_292 = arith.constant 0 : index
      %c176_293 = arith.constant 176 : index
      %779 = vector.load %arg4[%c0_291, %c0_292, %c176_293] : memref<1x1x256xf32, #tpu.memory_space<vmem>>, vector<1x1x16xf32>
      %780 = vector.shape_cast %779 : vector<1x1x16xf32> to vector<1x16xf32>
      %781 = vector.shape_cast %778 : vector<1x16xf32> to vector<1x1x16xf32>
      tpu.vector_store %arg4[%c0_291, %c0_292, %c176_293], %781 {strides = array<i32>} : memref<1x1x256xf32, #tpu.memory_space<vmem>>, vector<1x1x16xf32>,
      %782 = vector.extract_strided_slice %733 {offsets = [12, 0], sizes = [1, 16], strides = [1, 1]} : vector<16x16xf32> to vector<1x16xf32>
      %c0_294 = arith.constant 0 : index
      %c0_295 = arith.constant 0 : index
      %c192_296 = arith.constant 192 : index
      %783 = vector.load %arg4[%c0_294, %c0_295, %c192_296] : memref<1x1x256xf32, #tpu.memory_space<vmem>>, vector<1x1x16xf32>
      %784 = vector.shape_cast %783 : vector<1x1x16xf32> to vector<1x16xf32>
      %785 = vector.shape_cast %782 : vector<1x16xf32> to vector<1x1x16xf32>
      tpu.vector_store %arg4[%c0_294, %c0_295, %c192_296], %785 {strides = array<i32>} : memref<1x1x256xf32, #tpu.memory_space<vmem>>, vector<1x1x16xf32>,
      %786 = vector.extract_strided_slice %733 {offsets = [13, 0], sizes = [1, 16], strides = [1, 1]} : vector<16x16xf32> to vector<1x16xf32>
      %c0_297 = arith.constant 0 : index
      %c0_298 = arith.constant 0 : index
      %c208_299 = arith.constant 208 : index
      %787 = vector.load %arg4[%c0_297, %c0_298, %c208_299] : memref<1x1x256xf32, #tpu.memory_space<vmem>>, vector<1x1x16xf32>
      %788 = vector.shape_cast %787 : vector<1x1x16xf32> to vector<1x16xf32>
      %789 = vector.shape_cast %786 : vector<1x16xf32> to vector<1x1x16xf32>
      tpu.vector_store %arg4[%c0_297, %c0_298, %c208_299], %789 {strides = array<i32>} : memref<1x1x256xf32, #tpu.memory_space<vmem>>, vector<1x1x16xf32>,
      %790 = vector.extract_strided_slice %733 {offsets = [14, 0], sizes = [1, 16], strides = [1, 1]} : vector<16x16xf32> to vector<1x16xf32>
      %c0_300 = arith.constant 0 : index
      %c0_301 = arith.constant 0 : index
      %c224_302 = arith.constant 224 : index
      %791 = vector.load %arg4[%c0_300, %c0_301, %c224_302] : memref<1x1x256xf32, #tpu.memory_space<vmem>>, vector<1x1x16xf32>
      %792 = vector.shape_cast %791 : vector<1x1x16xf32> to vector<1x16xf32>
      %793 = vector.shape_cast %790 : vector<1x16xf32> to vector<1x1x16xf32>
      tpu.vector_store %arg4[%c0_300, %c0_301, %c224_302], %793 {strides = array<i32>} : memref<1x1x256xf32, #tpu.memory_space<vmem>>, vector<1x1x16xf32>,
      %794 = vector.extract_strided_slice %733 {offsets = [15, 0], sizes = [1, 16], strides = [1, 1]} : vector<16x16xf32> to vector<1x16xf32>
      %c0_303 = arith.constant 0 : index
      %c0_304 = arith.constant 0 : index
      %c240_305 = arith.constant 240 : index
      %795 = vector.load %arg4[%c0_303, %c0_304, %c240_305] : memref<1x1x256xf32, #tpu.memory_space<vmem>>, vector<1x1x16xf32>
      %796 = vector.shape_cast %795 : vector<1x1x16xf32> to vector<1x16xf32>
      %797 = vector.shape_cast %794 : vector<1x16xf32> to vector<1x1x16xf32>
      tpu.vector_store %arg4[%c0_303, %c0_304, %c240_305], %797 {strides = array<i32>} : memref<1x1x256xf32, #tpu.memory_space<vmem>>, vector<1x1x16xf32>,
    } else {
    }
    return
  }
  func.func @transform_0(%arg0: i32, %arg1: i32) -> i32 {
    %c0_i32 = arith.constant 0 : i32
    %c0_i32_0 = arith.constant 0 : i32
    return %c0_i32 : i32
  }
  func.func @transform_1(%arg0: i32, %arg1: i32) -> (i32, i32, i32) {
    %c0_i32 = arith.constant 0 : i32
    %c0_i32_0 = arith.constant 0 : i32
    return %arg0, %arg1, %c0_i32 : i32, i32, i32
  }
  func.func @transform_2(%arg0: i32, %arg1: i32) -> (i32, i32, i32) {
    %c0_i32 = arith.constant 0 : i32
    %c0_i32_0 = arith.constant 0 : i32
    %c0_i32_1 = arith.constant 0 : i32
    return %arg0, %c0_i32, %c0_i32_0 : i32, i32, i32
  }
}

</mosaic_0001>

<bundles_post_ra>
// kernel: tpu_custom_call.1
= control target key start
LH: loop header
LB: loop body
LE: loop exit
PB: predicated region body
PF: predicated region fallthrough
CT: control target
= control target key end

     0   :  { %7 = vsyncpa [#allocation8], 0  ;;  %s5494_s0 = inlined_call_operand.hbm [shape: f32[98], index: 0, kind: input, shape index: {}]   ;;  %s5495_s1 = inlined_call_operand.hbm [shape: f32[2,4,256], index: 1, kind: input, shape index: {}]   ;;  %s5496_s2 = inlined_call_operand.hbm [shape: f32[2,1,256], index: 2, kind: output, shape index: {}]  }
   0x1   :  { %8 = vsyncpa [#allocation6], 0 }
   0x2   :  { %10 = vsyncpa [#allocation6 + $0x1], 0 }
   0x3   :  { %11 = vsyncpa [#allocation7], 0 }
   0x4   :  { %13 = vsyncpa [#allocation7 + $0x1], 0  ;;  %s3260_s9 = smov 0   ;;  %s3262_s10 = smov 0  }
   0x5   :  { %s3264_s11 = smov 0   ;;  %s3266_s12 = smov 0  }
   0x6   :  { %s3268_s13 = smov 0   ;;  %s3270_s14 = smov 0  }
   0x7 LB: > { %s2841_s15 = sadd.s32 4294967295, %s3216_s14   ;;  %s2842_s16 = sadd.s32 4294967294, %s3216_s14   ;;  %s3216_s14 = sphi %s3270_s14, %s19_s14   ;;  %s3212_s13 = sphi %s3268_s13, %s5606_s13   ;;  %s3208_s12 = sphi %s3266_s12, %s5605_s12   ;;  %s3204_s11 = sphi %s3264_s11, %s5604_s11   ;;  %s3200_s10 = sphi %s3262_s10, %s5603_s10   ;;  %s3196_s9 = sphi %s3260_s9, %s5602_s9  }
   0x8   : > { %p74_p0 = scmp.ne.s32.totalorder %s3200_s10, %s3196_s9  ;;  %p3294_p1 = scmp.eq.s32.totalorder %s2841_s15, 0 }
   0x9   : > { %p3298_p2 = scmp.eq.s32.totalorder %s2841_s15, 1  ;;  %p104_p3 = scmp.eq.s32.totalorder %s2842_s16, 1 }
   0xa   : > { %s5516_s17 = scalar_select %p3294_p1, 1, 0 }
   0xb   : > { %p3304_p4 = por %p3294_p1, %p74_p0  ;;  %p2843_p5 = scmp.ge.s32.totalorder %s3216_s14, 1 }
   0xc   : > { %p3309_p6 = por %p104_p3, %p74_p0  ;;  %p111_p7 = scmp.lt.s32.totalorder %s3216_s14, 3 }
   0xd   : > { %s5518_s19 = scalar_select %p3304_p4, 1, 0 }
   0xe   : > { %s5519_s20 = scalar_select %p3309_p6, 1, 0 }
   0xf   : > { %p3314_p8 = pnand %p2843_p5, %p111_p7  ;;  %s31_s22 = sadd.s32 1, %s3212_s13 }
  0x10   : > { %p3328_p12 = scmp.ge.s32.totalorder %s31_s22, 2  ;;  %s61_s25 = sadd.s32 1, %s3204_s11 }
  0x11   : > { %p2983_p10 = pneg %p3314_p8  ;;  %p68_p13 = scmp.ne.s32.totalorder %s3204_s11, %s3200_s10 }
  0x12   : > { %p69_p0 = scmp.eq.s32.totalorder %s3216_s14, 0  ;;  %s3087_s28 = scalar_lea.hbm %s5494_s0, 16 }
  0x13   : > { %p3324_p11 = pnand %p2983_p10, %p3294_p1  ;;  %p3088_p3 = scmp.ne.s32.totalorder %s5494_s0, %s3087_s28 }
  0x14   : > { %p3094_p9 = scmp.lt.u32.totalorder %s3087_s28, %s5494_s0 }
  0x15   : > { %p3089_p5 = pneg %p3324_p11 }
  0x17   : > { %p3090_p7 = pnand %p3089_p5, %p3088_p3 }
  0x19   : > { %p3091_p10 = pneg %p3090_p7 }
  0x1b   : > { %p3096_p6 = pnand %p3094_p9, %p3091_p10 }
  0x1d   : > { %3099 = shalt.err (!%p3096_p6)
}
  0x1e   : > { %s3218_s5 = smov [#allocation5]   ;;  %s5608_s22 = smov (%p3328_p12, %s31_s22), 0 }
  0x1f   : > { %2986 = dma.hbm_to_smem (!%p3324_p11), %s5494_s0, 16, %s3218_s5, [#allocation8]  }
  0x20   : > { %p3359_p6 = por %p69_p0, %p68_p13  ;;  %p3368_p9 = por %p3298_p2, %p68_p13 }
  0x21   : > { %s56_s16 = ssub.s32 %s3212_s13, %s5608_s22  ;;  %p2996_p3 = scmp.lt.s32.totalorder %s3216_s14, 2 }
  0x22   : > { %s5524_s15 = scalar_select %p3368_p9, 1, 0 }
  0x23   : > { %p59_p5 = scmp.eq.s32.totalorder %s56_s16, 0  ;;  %s133_s23 = sand.u32 1, %s3204_s11  }
  0x24   : > { %s2846_s24 = sshll.u32 %s133_s23, 3  ;;  %s2973_s27 = sshll.u32 %s3212_s13, 7 }
  0x25   : > { %s3377_s26 = scalar_select %p59_p5, %s3204_s11, %s61_s25  }
  0x26   : > { %s3383_s30 = scalar_lea.hbm %s5495_s1, %s2973_s27  ;;  %s137_s18 = scalar_lea.vmem [#allocation9], %s2846_s24 }
  0x27   : > { %s147_s3 = sshll.u32 %s137_s18, 4  ;;  %p3389_p2 = pnand %p2996_p3, %p3359_p6  ;;  %s3385_s3 = int_to_ptr.vmem [resolvable:$true] %s147_s3 }
  0x28   : > { %s134_s25 = scalar_lea.sflag [#allocation6], %s133_s23  ;;  %s3100_s5 = scalar_lea.hbm %s3383_s30, 128 }
  0x29   : > { %p3101_p11 = scmp.ne.s32.totalorder %s3383_s30, %s3100_s5  ;;  %p3102_p12 = pneg %p3389_p2 }
  0x2a   : > { %s3105_s16 = scalar_lea.hbm %s5495_s1, 256  ;;  %p3106_p7 = scmp.lt.u32.totalorder %s3383_s30, %s5495_s1 }
  0x2b   : > { %p3103_p13 = pnand %p3102_p12, %p3101_p11  ;;  %p3107_p10 = scmp.lt.u32.totalorder %s3105_s16, %s3100_s5 }
  0x2c   : > { %p3109_p3 = scmp.lt.u32.totalorder %s3100_s5, %s3383_s30 }
  0x2d   : > { %p3104_p0 = pneg %p3103_p13  ;;  %p3108_p6 = por %p3107_p10, %p3106_p7 }
  0x2f   : > { %p3110_p5 = por %p3109_p3, %p3108_p6 }
  0x31   : > { %p3111_p9 = pnand %p3110_p5, %p3104_p0 }
  0x33   : > { %3114 = shalt.err (!%p3111_p9)
}
  0x34   : > { %s3115_s23 = scalar_lea.vmem %s3385_s3, 128  ;;  %s3219_s27 = smov [#allocation9]  }
  0x35   : > { %p3116_p11 = scmp.ne.s32.totalorder %s3385_s3, %s3115_s23  ;;  %s3120_s28 = sshll.u32 %s3219_s27, 4  ;;  %s3121_s28 = int_to_ptr.vmem [resolvable:$false] %s3120_s28 }
  0x36   : > { %s3122_s29 = scalar_lea.vmem %s3121_s28, 256  ;;  %p3123_p1 = scmp.lt.s32.totalorder %s3385_s3, %s3121_s28 }
  0x37   : > { %p3118_p13 = pnand %p3116_p11, %p3102_p12  ;;  %p3124_p7 = scmp.lt.s32.totalorder %s3122_s29, %s3115_s23 }
  0x39   : > { %p3119_p4 = pneg %p3118_p13  ;;  %p3125_p10 = por %p3124_p7, %p3123_p1 }
  0x3b   : > { %p3126_p6 = pnand %p3125_p10, %p3119_p4 }
  0x3d   : > { %3129 = shalt.err (!%p3126_p6)
}
  0x3e   : > { %2990 = dma.hbm_to_vmem [thread:$0]  (!%p3389_p2), %s3383_s30, 128, %s3385_s3, %s134_s25  }
  0x3f   : > { %156 = sbr.rel (%p3314_p8) target bundleno = 903 (0x387), region = 28 }
  0x46   : > { %p5526_p9 = scmp.ne.s32.totalorder %s5516_s17, 0 }
  0x48   : > { %3183 = dma.done.wait (%p5526_p9), [#allocation8], 16  }
  0x49   : > { %3185 = vsyncadd (%p5526_p9), [#allocation8], 4294967280  ;;  %s3425_s18 = sand.u32 1, %s3200_s10   ;;  %p5527_p1 = scmp.ne.s32.totalorder %s5518_s19, 0 }
  0x4a   : > { %s2851_s5 = sshll.u32 %s3425_s18, 3  ;;  %s163_s4 = scalar_lea.sflag [#allocation6], %s3425_s18 }
  0x4b   : > { %s166_s6 = scalar_lea.vmem [#allocation9], %s2851_s5 }
  0x4c   : > { %3187 = dma.done.wait (%p5527_p1), %s163_s4, 128  }
  0x4d   : > { %3189 = vsyncadd (%p5527_p1), %s163_s4, 4294967168 }
  0x4e   : > { %171 = sfence }
  0x4f   : > { %v188_v0 = vld [vmem:[%s166_s6] sm:$0xff]  ;;  %vm192_vm0 = vcmask 1043456   ;;  %v5503_v1 = vlaneseq  ;;  %v3220_v9 = vmov 0.0   ;;  %v3221_v10 = vmov -inf   ;;  %s3223_s17 = smov 115   ;;  %s3224_s19 = smov 3  }
  0x50   : > { %v190_v2 = vcombine.high %v188_v0, %v188_v0  ;;  %v193_v3 = vsel %vm192_vm0, %v188_v0, 0.0  ;;  %v207_v4 = vsel %vm192_vm0, %v188_v0, -inf  ;;  %vm283_vm2 = vcmask 23552   ;;  %s3225_s21 = smov 99   ;;  %s3226_s30 = smov 83  }
  0x51   : > { %v194_v5 = vrot.slane %v193_v3, 4  ;;  %v208_v6 = vrot.slane %v207_v4, 4  ;;  %vm3436_vm1 = vcmp.lt.s32.totalorder %v5503_v1, 256  ;;  %292 = vst.msk [vmem:[#allocation4 + $0x1b] sm:$0xff] %vm283_vm2, %v3220_v9  ;;  %284 = vst.msk [vmem:[#allocation4 + $0x3] sm:$0xff] %vm283_vm2, %v3220_v9  ;;  %vm286_vm3 = vcmask 179352  }
  0x52   : > { %v214_v8 = vsel %vm192_vm0, %v190_v2, -inf  ;;  %229 = vst.msk [vmem:[#allocation2] sm:$0x3] %vm3436_vm1, %v3220_v9  ;;  %230 = vst.msk [vmem:[#allocation3] sm:$0x3] %vm3436_vm1, %v3221_v10  ;;  %v200_v11 = vsel %vm192_vm0, %v190_v2, 0.0 }
  0x53   : > { %v209_v12 = vmax.f32 %v207_v4, %v208_v6  ;;  %v215_v13 = vrot.slane %v214_v8, 4  ;;  %v201_v14 = vrot.slane %v200_v11, 4  ;;  %285 = vst.msk [vmem:[#allocation4 + $0xb] sm:$0xff] %vm283_vm2, %v3220_v9  ;;  %293 = vst.msk [vmem:[#allocation4 + $0x23] sm:$0xff] %vm283_vm2, %v3220_v9  ;;  %v195_v15 = vadd.f32 %v194_v5, %v193_v3  ;;  %s3227_s3 = smov 67   ;;  %s3228_s25 = smov 35  }
  0x54   : > { %v3222_v18 = vmov 1966171168   ;;  %294 = vst.msk [vmem:[#allocation4 + $0x1b] sm:$0xff] %vm286_vm3, %v3220_v9  ;;  %287 = vst.msk [vmem:[#allocation4 + $0x3] sm:$0xff] %vm286_vm3, %v3220_v9  ;;  %v239_v25 = vshrl.u32 %v5503_v1, 7  ;;  %vm280_vm4 = vcmask 174080  }
  0x55   : > { %v210_v16 = vrot.slane %v209_v12, 2  ;;  %v216_v17 = vmax.f32 %v214_v8, %v215_v13  ;;  %v236_v19 = vunpack.c.l.s4 %v3222_v18  ;;  %v202_v20 = vadd.f32 %v201_v14, %v200_v11  ;;  %288 = vst.msk [vmem:[#allocation4 + $0xb] sm:$0xff] %vm286_vm3, %v3220_v9  ;;  %295 = vst.msk [vmem:[#allocation4 + $0x23] sm:$0xff] %vm286_vm3, %v3220_v9  ;;  %s3229_s7 = smov 51   ;;  %s3230_s16 = smov 19  }
  0x56   : > { %v196_v21 = vrot.slane %v195_v15, 2  ;;  %290 = vst.msk [vmem:[#allocation4 + $0x18] sm:$0x7] %vm280_vm4, %v3220_v9  ;;  %281 = vst.msk [vmem:[#allocation4] sm:$0x7] %vm280_vm4, %v3220_v9  ;;  %v3457_v49 = vsub.s32 0, %v239_v25 }
  0x57   : > { %v211_v22 = vmax.f32 %v209_v12, %v210_v16  ;;  %v217_v23 = vrot.slane %v216_v17, 2  ;;  %v203_v24 = vrot.slane %v202_v20, 2  ;;  %v237_v29 = vunpack.c.0.s8 %v236_v19  ;;  %282 = vst.msk [vmem:[#allocation4 + $0x13] sm:$0x7] %vm280_vm4, %v3220_v9  ;;  %291 = vst.msk [vmem:[#allocation4 + $0x2b] sm:$0x7] %vm280_vm4, %v3220_v9 }
  0x58   : > { %v197_v26 = vadd.f32 %v196_v21, %v195_v15  ;;  %vm306_vm5 = vcmask 147480   ;;  %s3525_s8 = sld [smem:[#allocation5 + $0x1]]  ;;  %s3529_s24 = sld [smem:[#allocation5 + $0x2]]  ;;  %vm650_vm6 = vcmask 1046528   ;;  %vm668_vm7 = vcmask 1045504  }
  0x59   : > { %v212_v27 = vrot.slane %v211_v22, 1  ;;  %v218_v28 = vmax.f32 %v216_v17, %v217_v23  ;;  %v204_v30 = vadd.f32 %v203_v24, %v202_v20  ;;  %v3447_v37 = vsub.s32 %v237_v29, %v239_v25  ;;  %v256_v43 = vld [vmem:[#allocation3] sm:$0x3]  ;;  %v231_v44 = vld [vmem:[#allocation2] sm:$0x3]  ;;  %s3534_s23 = sld [smem:[#allocation5 + $0x3]] }
  0x5a   : > { %v198_v31 = vrot.slane %v197_v26, 1  ;;  %s3542_s27 = sld [smem:[#allocation5 + $0x4]]  ;;  %s3231_s28 = smov 127   ;;  %vm686_vm8 = vcmask 1044480   ;;  %vm721_vm9 = vcmask 1042432   ;;  %vm739_vm10 = vcmask 1041408  }
  0x5b   : > { %v213_v32 = vmax.f32 %v211_v22, %v212_v27  ;;  %v219_v33 = vrot.slane %v218_v28, 1  ;;  %v205_v34 = vrot.slane %v204_v30, 1  ;;  %5530 = vst [vmem:[#allocation14_spill] sm:$0xff] %v3447_v37  ;;  %s2876_s29 = sld [smem:[#allocation5 + $0x8]]  ;;  %s3232_s5 = smov 126  }
  0x5c   : > { %v199_v35 = vadd.f32 %v198_v31, %v197_v26  ;;  %s2877_s4 = sld [smem:[#allocation5 + $0xf]]  ;;  %s3233_s6 = smov 125  }
  0x5d   : > { %v220_v36 = vmax.f32 %v218_v28, %v219_v33  ;;  %v206_v38 = vadd.f32 %v205_v34, %v204_v30  ;;  %p5599_p8 = scmp.ne.s32.totalorder %s5524_s15, 0 }
  0x5f   : > { %v259_v39 = vcombine.low %v213_v32, %v220_v36  ;;  %v234_v40 = vcombine.low %v199_v35, %v206_v38 }
  0x61   : > { %v266_v41 = vrot.slane %v259_v39, %v3447_v37  ;;  %v241_v42 = vrot.slane %v234_v40, %v3447_v37 }
  0x63   : > { %v273_v45 = vrot.slane %v266_v41, %v3447_v37  ;;  %v248_v46 = vrot.slane %v241_v42, %v3447_v37 }
  0x65   : > { %v275_v47 = vmax.f32 %v256_v43, %v273_v45  ;;  %v250_v48 = vadd.f32 %v248_v46, %v231_v44 }
  0x67   : > { %276 = vst.msk [vmem:[#allocation3] sm:$0x3] %vm3436_vm1, %v275_v47  ;;  %255 = vst.msk [vmem:[#allocation2] sm:$0x3] %vm3436_vm1, %v250_v48 }
  0x6e   : > { %v3459_v50 = vld [vmem:[#allocation3] ss:$0 sm:$0xff]  ;;  %v296_v51 = vld [vmem:[#allocation2] sm:$0x1]  ;;  %v465_v7 = vld [vmem:[#allocation2 + $0x1] sm:$0x1] }
  0x6f   : > { %v339_v52 = vld [vmem:[#allocation2] sm:$0x1]  ;;  %335 = vrot.lane.b32.xlu1 %v3459_v50, %s3223_s17  ;;  %314 = vrot.lane.b32.xlu0 %v3459_v50, %s3224_s19  ;;  %v297_v53 = vmul.f32 0.25, %v296_v51  ;;  %v466_v11 = vmul.f32 0.25, %v465_v7  ;;  %v507_v13 = vld [vmem:[#allocation2 + $0x1] sm:$0x1] }
  0x70   : > { %v340_v54 = vmul.f32 0.25, %v339_v52  ;;  %v360_v55 = vld [vmem:[#allocation2] sm:$0x1]  ;;  %v486_v14 = vld [vmem:[#allocation2 + $0x1] sm:$0x1]  ;;  %v508_v17 = vmul.f32 0.25, %v507_v13 }
  0x71   : > { %v302_v56 = vrot.slane %v297_v53, %v3457_v49  ;;  %v361_v58 = vmul.f32 0.25, %v360_v55  ;;  %v318_v59 = vld [vmem:[#allocation2] sm:$0x1]  ;;  %v471_v15 = vrot.slane %v466_v11, %v3457_v49  ;;  %v487_v18 = vmul.f32 0.25, %v486_v14  ;;  %v549_v19 = vld [vmem:[#allocation2 + $0x1] sm:$0x1] }
  0x72   : > { %v345_v57 = vrot.slane %v340_v54, %v3457_v49  ;;  %v381_v60 = vld [vmem:[#allocation2] sm:$0x1]  ;;  %v319_v62 = vmul.f32 0.25, %v318_v59  ;;  %v528_v20 = vld [vmem:[#allocation2 + $0x1] sm:$0x1]  ;;  %v513_v21 = vrot.slane %v508_v17, %v3457_v49  ;;  %v550_v23 = vmul.f32 0.25, %v549_v19 }
  0x73   : > { %356 = vrot.lane.b32.xlu1 %v3459_v50, %s3225_s21  ;;  %303 = vrot.lane.b32.xlu0 %v302_v56, %s3224_s19  ;;  %v366_v61 = vrot.slane %v361_v58, %v3457_v49  ;;  %v382_v63 = vmul.f32 0.25, %v381_v60  ;;  %v423_v0 = vld [vmem:[#allocation2] sm:$0x1]  ;;  %v492_v22 = vrot.slane %v487_v18, %v3457_v49  ;;  %v529_v24 = vmul.f32 0.25, %v528_v20  ;;  %v570_v25 = vld [vmem:[#allocation2 + $0x1] sm:$0x1] }
  0x74   : > { %v402_v2 = vld [vmem:[#allocation2] sm:$0x1]  ;;  %v324_v3 = vrot.slane %v319_v62, %v3457_v49  ;;  %v424_v5 = vmul.f32 0.25, %v423_v0  ;;  %v591_v26 = vld [vmem:[#allocation2 + $0x1] sm:$0x1]  ;;  %v555_v27 = vrot.slane %v550_v23, %v3457_v49  ;;  %v571_v29 = vmul.f32 0.25, %v570_v25 }
  0x75   : > { %v387_v4 = vrot.slane %v382_v63, %v3457_v49  ;;  %v403_v6 = vmul.f32 0.25, %v402_v2  ;;  %v444_v8 = vld [vmem:[#allocation2] sm:$0x1]  ;;  %v534_v28 = vrot.slane %v529_v24, %v3457_v49  ;;  %v592_v30 = vmul.f32 0.25, %v591_v26  ;;  %v612_v31 = vld [vmem:[#allocation2 + $0x1] sm:$0x1] }
  0x76   : > { %v429_v9 = vrot.slane %v424_v5, %v3457_v49  ;;  %v445_v12 = vmul.f32 0.25, %v444_v8  ;;  %v576_v32 = vrot.slane %v571_v29, %v3457_v49  ;;  %v613_v34 = vmul.f32 0.25, %v612_v31  ;;  %v2861_v36 = vld [vmem:[#allocation3 + $0x1] ss:$0 sm:$0xff] }
  0x77   : > { %377 = vrot.lane.b32.xlu1 %v3459_v50, %s3226_s30  ;;  %346 = vrot.lane.b32.xlu0 %v345_v57, %s3225_s21  ;;  %v408_v10 = vrot.slane %v403_v6, %v3457_v49  ;;  %v597_v33 = vrot.slane %v592_v30, %v3457_v49  ;;  %v890_v55 = vstv %s3529_s24  ;;  %v1030_v59 = vstv %s3534_s23  ;;  %s2887_s24 = sld [smem:[#allocation5 + $0x25]]  ;;  %s2888_s23 = sld [smem:[#allocation5 + $0x2c]] }
  0x78   : > { %v450_v16 = vrot.slane %v445_v12, %v3457_v49  ;;  %v618_v35 = vrot.slane %v613_v34, %v3457_v49  ;;  %v1170_v63 = vstv %s3542_s27  ;;  %s2890_s27 = sld [smem:[#allocation5 + $0xa]] }
  0x7b   : > { %398 = vrot.lane.b32.xlu1 %v3459_v50, %s3227_s3  ;;  %367 = vrot.lane.b32.xlu0 %v366_v61, %s3226_s30 }
  0x7f   : > { %325 = vrot.lane.b32.xlu1 %v324_v3, %s3223_s17  ;;  %388 = vrot.lane.b32.xlu0 %v387_v4, %s3227_s3  ;;  %v764_v3 = vstv %s2876_s29  ;;  %s2891_s29 = sld [smem:[#allocation5 + $0x11]] }
  0x83   : > { %430 = vrot.lane.b32.xlu1 %v429_v9, %s3228_s25  ;;  %409 = vrot.lane.b32.xlu0 %v408_v10, %s3229_s7  ;;  %v785_v9 = vstv %s2877_s4  ;;  %s2892_s4 = sld [smem:[#allocation5 + $0x18]] }
  0x87   : > { %472 = vrot.lane.b32.xlu1 %v471_v15, %s3224_s19  ;;  %451 = vrot.lane.b32.xlu0 %v450_v16, %s3230_s16 }
  0x8b   : > { %514 = vrot.lane.b32.xlu1 %v513_v21, %s3225_s21  ;;  %493 = vrot.lane.b32.xlu0 %v492_v22, %s3223_s17 }
  0x8f   : > { %556 = vrot.lane.b32.xlu1 %v555_v27, %s3227_s3  ;;  %535 = vrot.lane.b32.xlu0 %v534_v28, %s3226_s30 }
  0x93   : > { %577 = vrot.lane.b32.xlu0 %v576_v32, %s3229_s7  ;;  %598 = vrot.lane.b32.xlu1 %v597_v33, %s3228_s25 }
  0x97   : > { %619 = vrot.lane.b32.xlu0 %v618_v35, %s3230_s16  ;;  %419 = vrot.lane.b32.xlu1 %v3459_v50, %s3229_s7 }
  0x9b   : > { %440 = vrot.lane.b32.xlu0 %v3459_v50, %s3228_s25  ;;  %461 = vrot.lane.b32.xlu1 %v3459_v50, %s3230_s16  ;;  %v750_v50 = vstv %s3525_s8  ;;  %s2886_s8 = sld [smem:[#allocation5 + $0x1e]] }
  0x9f   : > { %482 = vrot.lane.b32.xlu0 %v2861_v36, %s3224_s19  ;;  %503 = vrot.lane.b32.xlu1 %v2861_v36, %s3223_s17  ;;  %s2878_s17 = sld [smem:[#allocation5 + $0x16]]  ;;  %s3234_s19 = smov 124  }
  0xa3   : > { %524 = vrot.lane.b32.xlu0 %v2861_v36, %s3225_s21  ;;  %545 = vrot.lane.b32.xlu1 %v2861_v36, %s3226_s30  ;;  %s2879_s21 = sld [smem:[#allocation5 + $0x1d]]  ;;  %s3576_s30 = sld [smem:[#allocation5 + $0x24]] }
  0xa5   : > { %v806_v18 = vstv %s2878_s17  ;;  %s2893_s17 = sld [smem:[#allocation5 + $0x1f]] }
  0xa7   : > { %566 = vrot.lane.b32.xlu0 %v2861_v36, %s3227_s3  ;;  %587 = vrot.lane.b32.xlu1 %v2861_v36, %s3229_s7  ;;  %s2881_s3 = sld [smem:[#allocation5 + $0x2b]]  ;;  %s3622_s7 = sld [smem:[#allocation5 + $0x10]] }
  0xa9   : > { %v827_v28 = vstv %s2879_s21  ;;  %s2894_s21 = sld [smem:[#allocation5 + $0x26]] }
  0xab   : > { %629 = vrot.lane.b32.xlu1 %v2861_v36, %s3230_s16  ;;  %608 = vrot.lane.b32.xlu0 %v2861_v36, %s3228_s25  ;;  %s2883_s25 = sld [smem:[#allocation5 + $0x9]]  ;;  %s2885_s16 = sld [smem:[#allocation5 + $0x17]] }
  0xe1   : > { %v336_v38 = vpop.permute.xlu1 %335  ;;  %v315_v39 = vpop.permute.xlu0 %314 }
  0xe2   : > { %338 = vst.msk [vmem:[#allocation4 + $0x1c] sm:$0x1] %vm306_vm5, %v336_v38  ;;  %317 = vst.msk [vmem:[#allocation4 + $0x1b] sm:$0x1] %vm306_vm5, %v315_v39  ;;  %v848_v39 = vstv %s3576_s30  ;;  %s2895_s30 = sld [smem:[#allocation5 + $0x2d]] }
  0xe5   : > { %v357_v40 = vpop.permute.xlu1 %356  ;;  %v304_v41 = vpop.permute.xlu0 %303 }
  0xe6   : > { %359 = vst.msk [vmem:[#allocation4 + $0x1d] sm:$0x1] %vm306_vm5, %v357_v40  ;;  %307 = vst.msk [vmem:[#allocation4 + $0x3] sm:$0x1] %vm306_vm5, %v304_v41 }
  0xe9   : > { %v378_v42 = vpop.permute.xlu1 %377  ;;  %v347_v43 = vpop.permute.xlu0 %346 }
  0xea   : > { %380 = vst.msk [vmem:[#allocation4 + $0x1e] sm:$0x1] %vm306_vm5, %v378_v42  ;;  %349 = vst.msk [vmem:[#allocation4 + $0x5] sm:$0x1] %vm306_vm5, %v347_v43 }
  0xed   : > { %v399_v44 = vpop.permute.xlu1 %398  ;;  %v368_v45 = vpop.permute.xlu0 %367 }
  0xee   : > { %401 = vst.msk [vmem:[#allocation4 + $0x1f] sm:$0x1] %vm306_vm5, %v399_v44  ;;  %370 = vst.msk [vmem:[#allocation4 + $0x6] sm:$0x1] %vm306_vm5, %v368_v45 }
  0xf1   : > { %v326_v46 = vpop.permute.xlu1 %325  ;;  %v389_v47 = vpop.permute.xlu0 %388 }
  0xf2   : > { %328 = vst.msk [vmem:[#allocation4 + $0x4] sm:$0x1] %vm306_vm5, %v326_v46  ;;  %391 = vst.msk [vmem:[#allocation4 + $0x7] sm:$0x1] %vm306_vm5, %v389_v47 }
  0xf5   : > { %v431_v48 = vpop.permute.xlu1 %430  ;;  %v410_v49 = vpop.permute.xlu0 %409 }
  0xf6   : > { %433 = vst.msk [vmem:[#allocation4 + $0x9] sm:$0x1] %vm306_vm5, %v431_v48  ;;  %412 = vst.msk [vmem:[#allocation4 + $0x8] sm:$0x1] %vm306_vm5, %v410_v49  ;;  %v869_v49 = vstv %s2881_s3  ;;  %s2897_s3 = sld [smem:[#allocation5 + $0xb]] }
  0xf9   : > { %v3536_v51 = vld [vmem:[#allocation4] sm:$0xff]  ;;  %v473_v52 = vpop.permute.xlu1 %472  ;;  %v452_v53 = vpop.permute.xlu0 %451 }
  0xfa   : > { %475 = vst.msk [vmem:[#allocation4 + $0xb] sm:$0x1] %vm306_vm5, %v473_v52  ;;  %454 = vst.msk [vmem:[#allocation4 + $0xa] sm:$0x1] %vm306_vm5, %v452_v53  ;;  %v751_v54 = vmul.f32 %v750_v50, %v3536_v51  ;;  %v891_v58 = vmul.f32 %v890_v55, %v3536_v51  ;;  %v1031_v62 = vmul.f32 %v1030_v59, %v3536_v51 }
  0xfb   : > { %v1171_v4 = vmul.f32 %v1170_v63, %v3536_v51  ;;  %v765_v5 = vmul.f32 %v764_v3, %v3536_v51  ;;  %v786_v15 = vmul.f32 %v785_v9, %v3536_v51  ;;  %v807_v24 = vmul.f32 %v806_v18, %v3536_v51 }
  0xfc   : > { %755 = vrot.lane.b32.xlu0 %v751_v54, %s3231_s28  ;;  %v828_v35 = vmul.f32 %v827_v28, %v3536_v51  ;;  %v849_v47 = vmul.f32 %v848_v39, %v3536_v51 }
  0xfd   : > { %v515_v56 = vpop.permute.xlu1 %514  ;;  %v494_v57 = vpop.permute.xlu0 %493  ;;  %v771_v13 = vrot.slane %v765_v5, 1  ;;  %v792_v23 = vrot.slane %v786_v15, 2  ;;  %v813_v34 = vrot.slane %v807_v24, 3 }
  0xfe   : > { %517 = vst.msk [vmem:[#allocation4 + $0xd] sm:$0x1] %vm306_vm5, %v515_v56  ;;  %496 = vst.msk [vmem:[#allocation4 + $0xc] sm:$0x1] %vm306_vm5, %v494_v57  ;;  %v834_v46 = vrot.slane %v828_v35, 4 }
 0x100   : > { %895 = vrot.lane.b32.xlu0 %v891_v58, %s3232_s5  ;;  %v855_v58 = vrot.slane %v849_v47, 5  ;;  %v1009_v47 = vstv %s2888_s23  ;;  %s2904_s23 = sld [smem:[#allocation5 + $0xc]] }
 0x101   : > { %v557_v60 = vpop.permute.xlu1 %556  ;;  %v536_v61 = vpop.permute.xlu0 %535 }
 0x102   : > { %559 = vst.msk [vmem:[#allocation4 + $0xf] sm:$0x1] %vm306_vm5, %v557_v60  ;;  %538 = vst.msk [vmem:[#allocation4 + $0xe] sm:$0x1] %vm306_vm5, %v536_v61  ;;  %v904_v60 = vstv %s2883_s25  ;;  %s2898_s25 = sld [smem:[#allocation5 + $0x12]] }
 0x104   : > { %1035 = vrot.lane.b32.xlu0 %v1031_v62, %s3233_s6 }
 0x105   : > { %v578_v0 = vpop.permute.xlu0 %577  ;;  %v599_v2 = vpop.permute.xlu1 %598 }
 0x106   : > { %580 = vst.msk [vmem:[#allocation4 + $0x10] sm:$0x1] %vm306_vm5, %v578_v0  ;;  %601 = vst.msk [vmem:[#allocation4 + $0x11] sm:$0x1] %vm306_vm5, %v599_v2 }
 0x108   : > { %1175 = vrot.lane.b32.xlu0 %v1171_v4, %s3234_s19 }
 0x109   : > { %v3562_v6 = vld [vmem:[#allocation4 + $0x8] sm:$0xff]  ;;  %v620_v7 = vpop.permute.xlu0 %619  ;;  %v420_v8 = vpop.permute.xlu1 %419 }
 0x10a   : > { %622 = vst.msk [vmem:[#allocation4 + $0x12] sm:$0x1] %vm306_vm5, %v620_v7  ;;  %v752_v10 = vmul.f32 %v750_v50, %v3562_v6  ;;  %422 = vst.msk [vmem:[#allocation4 + $0x20] sm:$0x1] %vm306_vm5, %v420_v8  ;;  %v3568_v11 = vmul.f32 %v764_v3, %v3562_v6  ;;  %v3571_v12 = vmul.f32 %v785_v9, %v3562_v6 }
 0x10b   : > { %v892_v20 = vmul.f32 %v890_v55, %v3562_v6  ;;  %v3584_v22 = vmul.f32 %v806_v18, %v3562_v6  ;;  %v1032_v30 = vmul.f32 %v1030_v59, %v3562_v6  ;;  %v3599_v32 = vmul.f32 %v827_v28, %v3562_v6 }
 0x10c   : > { %757 = vrot.lane.b32.xlu1 %v752_v10, %s3231_s28  ;;  %v772_v14 = vrot.slane %v3568_v11, 1  ;;  %v793_v21 = vrot.slane %v3571_v12, 2  ;;  %v1172_v41 = vmul.f32 %v1170_v63, %v3562_v6  ;;  %v3616_v43 = vmul.f32 %v848_v39, %v3562_v6 }
 0x10d   : > { %v441_v16 = vpop.permute.xlu0 %440  ;;  %v462_v17 = vpop.permute.xlu1 %461  ;;  %v814_v31 = vrot.slane %v3584_v22, 3  ;;  %v835_v42 = vrot.slane %v3599_v32, 4  ;;  %v3628_v54 = vmul.f32 %v869_v49, %v3562_v6  ;;  %v870_v59 = vmul.f32 %v869_v49, %v3536_v51 }
 0x10e   : > { %443 = vst.msk [vmem:[#allocation4 + $0x21] sm:$0x1] %vm306_vm5, %v441_v16  ;;  %v773_v19 = vsel %vm650_vm6, %v771_v13, %v772_v14  ;;  %464 = vst.msk [vmem:[#allocation4 + $0x22] sm:$0x1] %vm306_vm5, %v462_v17  ;;  %v794_v29 = vsel %vm668_vm7, %v792_v23, %v793_v21  ;;  %v856_v53 = vrot.slane %v3616_v43, 5  ;;  %v3639_v2 = vmul.f32 %v904_v60, %v3562_v6 }
 0x10f   : > { %776 = vrot.lane.b32.xlu0 %v773_v19, %s3231_s28  ;;  %v815_v40 = vsel %vm686_vm8, %v813_v34, %v814_v31  ;;  %v836_v52 = vsel %vm192_vm0, %v834_v46, %v835_v42  ;;  %v877_v0 = vrot.slane %v3628_v54, 6  ;;  %v876_v7 = vrot.slane %v870_v59, 6 }
 0x110   : > { %897 = vrot.lane.b32.xlu1 %v892_v20, %s3232_s5  ;;  %v857_v63 = vsel %vm721_vm9, %v855_v58, %v856_v53  ;;  %v905_v8 = vmul.f32 %v904_v60, %v3536_v51  ;;  %v912_v11 = vrot.slane %v3639_v2, 1 }
 0x111   : > { %v3589_v25 = vld [vmem:[#allocation4 + $0x10] sm:$0x3f]  ;;  %v483_v26 = vpop.permute.xlu0 %482  ;;  %v504_v27 = vpop.permute.xlu1 %503  ;;  %v878_v10 = vsel %vm739_vm10, %v876_v7, %v877_v0 }
 0x112   : > { %485 = vst.msk [vmem:[#allocation4 + $0x23] sm:$0x1] %vm306_vm5, %v483_v26  ;;  %506 = vst.msk [vmem:[#allocation4 + $0x24] sm:$0x1] %vm306_vm5, %v504_v27  ;;  %v767_v33 = vmul.f32 %v764_v3, %v3589_v25  ;;  %v788_v45 = vmul.f32 %v785_v9, %v3589_v25  ;;  %v809_v57 = vmul.f32 %v806_v18, %v3589_v25  ;;  %v925_v9 = vstv %s3622_s7  ;;  %s2899_s7 = sld [smem:[#allocation5 + $0x19]] }
 0x113   : > { %797 = vrot.lane.b32.xlu0 %v794_v29, %s3231_s28  ;;  %v830_v5 = vmul.f32 %v827_v28, %v3589_v25  ;;  %v3654_v13 = vmul.f32 %v925_v9, %v3562_v6  ;;  %v851_v15 = vmul.f32 %v848_v39, %v3589_v25  ;;  %v911_v16 = vrot.slane %v905_v8, 1 }
 0x114   : > { %1037 = vrot.lane.b32.xlu1 %v1032_v30, %s3233_s6  ;;  %v774_v44 = vrot.slane %v767_v33, 1  ;;  %v795_v56 = vrot.slane %v788_v45, 2  ;;  %v816_v4 = vrot.slane %v809_v57, 3  ;;  %v926_v17 = vmul.f32 %v925_v9, %v3536_v51 }
 0x115   : > { %v525_v36 = vpop.permute.xlu0 %524  ;;  %v546_v38 = vpop.permute.xlu1 %545  ;;  %v946_v18 = vstv %s2885_s16  ;;  %v913_v19 = vsel %vm650_vm6, %v911_v16, %v912_v11  ;;  %v933_v20 = vrot.slane %v3654_v13, 2  ;;  %v858_v23 = vrot.slane %v851_v15, 5  ;;  %s2900_s16 = sld [smem:[#allocation5 + $0x20]] }
 0x116   : > { %527 = vst.msk [vmem:[#allocation4 + $0x25] sm:$0x1] %vm306_vm5, %v525_v36  ;;  %548 = vst.msk [vmem:[#allocation4 + $0x26] sm:$0x1] %vm306_vm5, %v546_v38  ;;  %v775_v55 = vsel %vm650_vm6, %v772_v14, %v774_v44  ;;  %v796_v3 = vsel %vm668_vm7, %v793_v21, %v795_v56  ;;  %v817_v12 = vsel %vm686_vm8, %v814_v31, %v816_v4  ;;  %v837_v14 = vrot.slane %v830_v5, 4 }
 0x117   : > { %818 = vrot.lane.b32.xlu0 %v815_v40, %s3231_s28  ;;  %v3666_v21 = vmul.f32 %v946_v18, %v3562_v6  ;;  %v872_v24 = vmul.f32 %v869_v49, %v3589_v25  ;;  %v932_v26 = vrot.slane %v926_v17, 2  ;;  %v947_v27 = vmul.f32 %v946_v18, %v3536_v51 }
 0x118   : > { %1177 = vrot.lane.b32.xlu1 %v1172_v41, %s3234_s19  ;;  %v838_v22 = vsel %vm192_vm0, %v835_v42, %v837_v14  ;;  %v967_v28 = vstv %s2886_s8  ;;  %v859_v32 = vsel %vm721_vm9, %v856_v53, %v858_v23  ;;  %v907_v34 = vmul.f32 %v904_v60, %v3589_v25  ;;  %s2901_s8 = sld [smem:[#allocation5 + $0x27]] }
 0x119   : > { %v567_v48 = vpop.permute.xlu0 %566  ;;  %v588_v50 = vpop.permute.xlu1 %587  ;;  %v934_v29 = vsel %vm668_vm7, %v932_v26, %v933_v20  ;;  %v954_v30 = vrot.slane %v3666_v21, 3  ;;  %v3676_v31 = vmul.f32 %v967_v28, %v3562_v6  ;;  %v879_v33 = vrot.slane %v872_v24, 6 }
 0x11a   : > { %569 = vst.msk [vmem:[#allocation4 + $0x27] sm:$0x1] %vm306_vm5, %v567_v48  ;;  %590 = vst.msk [vmem:[#allocation4 + $0x28] sm:$0x1] %vm306_vm5, %v588_v50  ;;  %v953_v35 = vrot.slane %v947_v27, 3  ;;  %v968_v36 = vmul.f32 %v967_v28, %v3536_v51  ;;  %v988_v38 = vstv %s2887_s24  ;;  %v914_v43 = vrot.slane %v907_v34, 1 }
 0x11b   : > { %839 = vrot.lane.b32.xlu0 %v836_v52, %s3231_s28  ;;  %v975_v40 = vrot.slane %v3676_v31, 4  ;;  %v3686_v41 = vmul.f32 %v988_v38, %v3562_v6  ;;  %v880_v42 = vsel %vm739_vm10, %v877_v0, %v879_v33  ;;  %v928_v44 = vmul.f32 %v925_v9, %v3589_v25  ;;  %s2902_s24 = sld [smem:[#allocation5 + $0x2e]] }
 0x11c   : > { %778 = vrot.lane.b32.xlu1 %v775_v55, %s3231_s28  ;;  %v955_v39 = vsel %vm686_vm8, %v953_v35, %v954_v30  ;;  %v974_v45 = vrot.slane %v968_v36, 4  ;;  %v989_v46 = vmul.f32 %v988_v38, %v3536_v51  ;;  %v3696_v50 = vmul.f32 %v1009_v47, %v3562_v6 }
 0x11d   : > { %v630_v61 = vpop.permute.xlu1 %629  ;;  %v609_v62 = vpop.permute.xlu0 %608  ;;  %v996_v49 = vrot.slane %v3686_v41, 5  ;;  %v915_v52 = vsel %vm650_vm6, %v912_v11, %v914_v43  ;;  %v935_v53 = vrot.slane %v928_v44, 2  ;;  %v949_v54 = vmul.f32 %v946_v18, %v3589_v25 }
 0x11e   : > { %632 = vst.msk [vmem:[#allocation4 + $0x2a] sm:$0x1] %vm306_vm5, %v630_v61  ;;  %611 = vst.msk [vmem:[#allocation4 + $0x29] sm:$0x1] %vm306_vm5, %v609_v62  ;;  %v976_v48 = vsel %vm192_vm0, %v974_v45, %v975_v40  ;;  %v995_v55 = vrot.slane %v989_v46, 5  ;;  %v1010_v56 = vmul.f32 %v1009_v47, %v3536_v51  ;;  %v1044_v57 = vstv %s2890_s27  ;;  %s3809_s27 = sld [smem:[#allocation5 + $0x5]] }
 0x11f   : > { %860 = vrot.lane.b32.xlu0 %v857_v63, %s3231_s28  ;;  %v1017_v59 = vrot.slane %v3696_v50, 6  ;;  %v3706_v60 = vmul.f32 %v1044_v57, %v3562_v6  ;;  %v936_v61 = vsel %vm668_vm7, %v933_v20, %v935_v53  ;;  %v956_v62 = vrot.slane %v949_v54, 3 }
 0x120   : > { %799 = vrot.lane.b32.xlu1 %v796_v3, %s3231_s28  ;;  %v997_v58 = vsel %vm721_vm9, %v995_v55, %v996_v49  ;;  %v970_v63 = vmul.f32 %v967_v28, %v3589_v25  ;;  %v1016_v0 = vrot.slane %v1010_v56, 6  ;;  %v1045_v2 = vmul.f32 %v1044_v57, %v3536_v51 }
 0x121   : > { %v1065_v3 = vstv %s2891_s29  ;;  %v1052_v5 = vrot.slane %v3706_v60, 1  ;;  %v957_v8 = vsel %vm686_vm8, %v954_v30, %v956_v62  ;;  %s2905_s29 = sld [smem:[#allocation5 + $0x13]] }
 0x122   : > { %v1018_v4 = vsel %vm739_vm10, %v1016_v0, %v1017_v59  ;;  %v3716_v7 = vmul.f32 %v1065_v3, %v3562_v6  ;;  %v977_v9 = vrot.slane %v970_v63, 4  ;;  %v1051_v11 = vrot.slane %v1045_v2, 1 }
 0x123   : > { %881 = vrot.lane.b32.xlu0 %v878_v10, %s3231_s28  ;;  %v991_v10 = vmul.f32 %v988_v38, %v3589_v25  ;;  %v1066_v13 = vmul.f32 %v1065_v3, %v3536_v51 }
 0x124   : > { %820 = vrot.lane.b32.xlu1 %v817_v12, %s3231_s28  ;;  %v1086_v12 = vstv %s2892_s4  ;;  %v1053_v14 = vsel %vm650_vm6, %v1051_v11, %v1052_v5  ;;  %v1073_v15 = vrot.slane %v3716_v7, 2  ;;  %v978_v17 = vsel %vm192_vm0, %v975_v40, %v977_v9  ;;  %s2906_s4 = sld [smem:[#allocation5 + $0x1a]] }
 0x125   : > { %v3726_v16 = vmul.f32 %v1086_v12, %v3562_v6  ;;  %v998_v18 = vrot.slane %v991_v10, 5  ;;  %v1072_v20 = vrot.slane %v1066_v13, 2  ;;  %v1087_v21 = vmul.f32 %v1086_v12, %v3536_v51 }
 0x127   : > { %916 = vrot.lane.b32.xlu0 %v913_v19, %s3232_s5  ;;  %v1012_v19 = vmul.f32 %v1009_v47, %v3589_v25  ;;  %v1074_v23 = vsel %vm668_vm7, %v1072_v20, %v1073_v15  ;;  %v1094_v24 = vrot.slane %v3726_v16, 3  ;;  %v999_v27 = vsel %vm721_vm9, %v996_v49, %v998_v18 }
 0x128   : > { %841 = vrot.lane.b32.xlu1 %v838_v22, %s3231_s28  ;;  %v1107_v22 = vstv %s2893_s17  ;;  %v1093_v30 = vrot.slane %v1087_v21, 3  ;;  %s2907_s17 = sld [smem:[#allocation5 + $0x21]] }
 0x129   : > { %v3736_v26 = vmul.f32 %v1107_v22, %v3562_v6  ;;  %v1019_v28 = vrot.slane %v1012_v19, 6  ;;  %v1108_v31 = vmul.f32 %v1107_v22, %v3536_v51 }
 0x12a   : > { %v1095_v33 = vsel %vm686_vm8, %v1093_v30, %v1094_v24 }
 0x12b   : > { %937 = vrot.lane.b32.xlu0 %v934_v29, %s3232_s5  ;;  %v1047_v29 = vmul.f32 %v1044_v57, %v3589_v25  ;;  %v1115_v34 = vrot.slane %v3736_v26, 4  ;;  %v1020_v36 = vsel %vm739_vm10, %v1017_v59, %v1019_v28  ;;  %v1114_v40 = vrot.slane %v1108_v31, 4 }
 0x12c   : > { %862 = vrot.lane.b32.xlu1 %v859_v32, %s3231_s28  ;;  %v1128_v32 = vstv %s2894_s21  ;;  %s5501_s21 = smov 123  }
 0x12d   : > { %v3746_v35 = vmul.f32 %v1128_v32, %v3562_v6  ;;  %v1054_v38 = vrot.slane %v1047_v29, 1  ;;  %v1129_v41 = vmul.f32 %v1128_v32, %v3536_v51  ;;  %v1116_v43 = vsel %vm192_vm0, %v1114_v40, %v1115_v34 }
 0x12f   : > { %958 = vrot.lane.b32.xlu0 %v955_v39, %s3232_s5  ;;  %v1068_v39 = vmul.f32 %v1065_v3, %v3589_v25  ;;  %v1136_v44 = vrot.slane %v3746_v35, 5  ;;  %v1055_v46 = vsel %vm650_vm6, %v1052_v5, %v1054_v38  ;;  %v1135_v49 = vrot.slane %v1129_v41, 5 }
 0x130   : > { %883 = vrot.lane.b32.xlu1 %v880_v42, %s3231_s28  ;;  %v1149_v42 = vstv %s2895_s30  ;;  %s2908_s30 = sld [smem:[#allocation5 + $0x28]] }
 0x131   : > { %v3756_v45 = vmul.f32 %v1149_v42, %v3562_v6  ;;  %v1075_v47 = vrot.slane %v1068_v39, 2  ;;  %v1150_v50 = vmul.f32 %v1149_v42, %v3536_v51  ;;  %v1137_v53 = vsel %vm721_vm9, %v1135_v49, %v1136_v44 }
 0x133   : > { %979 = vrot.lane.b32.xlu0 %v976_v48, %s3232_s5  ;;  %v1089_v48 = vmul.f32 %v1086_v12, %v3589_v25  ;;  %v1157_v54 = vrot.slane %v3756_v45, 6  ;;  %v1076_v56 = vsel %vm668_vm7, %v1073_v15, %v1075_v47  ;;  %v1156_v59 = vrot.slane %v1150_v50, 6 }
 0x134   : > { %918 = vrot.lane.b32.xlu1 %v915_v52, %s3232_s5  ;;  %v1184_v52 = vstv %s2897_s3  ;;  %s2909_s3 = sld [smem:[#allocation5 + $0x2f]] }
 0x135   : > { %v3766_v55 = vmul.f32 %v1184_v52, %v3562_v6  ;;  %v1096_v57 = vrot.slane %v1089_v48, 3  ;;  %v1185_v60 = vmul.f32 %v1184_v52, %v3536_v51  ;;  %v1158_v62 = vsel %vm739_vm10, %v1156_v59, %v1157_v54 }
 0x137   : > { %1000 = vrot.lane.b32.xlu0 %v997_v58, %s3232_s5  ;;  %v1110_v58 = vmul.f32 %v1107_v22, %v3589_v25  ;;  %v1192_v63 = vrot.slane %v3766_v55, 1  ;;  %v1097_v2 = vsel %vm686_vm8, %v1094_v24, %v1096_v57  ;;  %v1191_v5 = vrot.slane %v1185_v60, 1 }
 0x138   : > { %939 = vrot.lane.b32.xlu1 %v936_v61, %s3232_s5  ;;  %v1205_v61 = vstv %s2898_s25  ;;  %v1310_v55 = vstv %s3809_s27  ;;  %s2911_s25 = sld [smem:[#allocation5 + $0xd]]  ;;  %s2869_s27 = sld [smem:[#allocation5 + $0x7]] }
 0x139   : > { %v1207_v0 = vmul.f32 %v1205_v61, %v3562_v6  ;;  %v1117_v3 = vrot.slane %v1110_v58, 4  ;;  %v1206_v7 = vmul.f32 %v1205_v61, %v3536_v51  ;;  %v1193_v9 = vsel %vm650_vm6, %v1191_v5, %v1192_v63 }
 0x13b   : > { %1021 = vrot.lane.b32.xlu0 %v1018_v4, %s3232_s5  ;;  %v1131_v4 = vmul.f32 %v1128_v32, %v3589_v25  ;;  %v1213_v10 = vrot.slane %v1207_v0, 2  ;;  %v1118_v13 = vsel %vm192_vm0, %v1115_v34, %v1117_v3  ;;  %v1212_v15 = vrot.slane %v1206_v7, 2 }
 0x13c   : > { %960 = vrot.lane.b32.xlu1 %v957_v8, %s3232_s5  ;;  %v1226_v8 = vstv %s2899_s7  ;;  %s3886_s7 = sld [smem:[#allocation5 + $0x6]] }
 0x13d   : > { %v1228_v11 = vmul.f32 %v1226_v8, %v3562_v6  ;;  %v1138_v12 = vrot.slane %v1131_v4, 5  ;;  %v1227_v16 = vmul.f32 %v1226_v8, %v3536_v51  ;;  %v1214_v18 = vsel %vm668_vm7, %v1212_v15, %v1213_v10 }
 0x13f   : > { %1056 = vrot.lane.b32.xlu0 %v1053_v14, %s3233_s6  ;;  %v1152_v14 = vmul.f32 %v1149_v42, %v3589_v25  ;;  %v1234_v19 = vrot.slane %v1228_v11, 3  ;;  %v1139_v21 = vsel %vm721_vm9, %v1136_v44, %v1138_v12  ;;  %v1233_v24 = vrot.slane %v1227_v16, 3 }
 0x140   : > { %981 = vrot.lane.b32.xlu1 %v978_v17, %s3232_s5  ;;  %v1247_v17 = vstv %s2900_s16  ;;  %s2912_s16 = sld [smem:[#allocation5 + $0x14]] }
 0x141   : > { %v1249_v20 = vmul.f32 %v1247_v17, %v3562_v6  ;;  %v1159_v22 = vrot.slane %v1152_v14, 6  ;;  %v1248_v26 = vmul.f32 %v1247_v17, %v3536_v51  ;;  %v1235_v28 = vsel %vm686_vm8, %v1233_v24, %v1234_v19 }
 0x142   : > { %v1250_v50 = vmul.f32 %v1247_v17, %v3589_v25 }
 0x143   : > { %1077 = vrot.lane.b32.xlu0 %v1074_v23, %s3233_s6  ;;  %v1187_v23 = vmul.f32 %v1184_v52, %v3589_v25  ;;  %v1255_v29 = vrot.slane %v1249_v20, 4  ;;  %v1160_v31 = vsel %vm739_vm10, %v1157_v54, %v1159_v22  ;;  %v1254_v34 = vrot.slane %v1248_v26, 4 }
 0x144   : > { %1002 = vrot.lane.b32.xlu1 %v999_v27, %s3232_s5  ;;  %v1268_v27 = vstv %s2901_s8  ;;  %v1257_v58 = vrot.slane %v1250_v50, 4  ;;  %s2913_s8 = sld [smem:[#allocation5 + $0x1b]] }
 0x145   : > { %v3797_v30 = vmul.f32 %v1268_v27, %v3562_v6  ;;  %v1194_v32 = vrot.slane %v1187_v23, 1  ;;  %v1269_v35 = vmul.f32 %v1268_v27, %v3536_v51  ;;  %v1256_v38 = vsel %vm192_vm0, %v1254_v34, %v1255_v29 }
 0x146   : > { %v1271_v59 = vmul.f32 %v1268_v27, %v3589_v25  ;;  %v1258_v3 = vsel %vm192_vm0, %v1255_v29, %v1257_v58 }
 0x147   : > { %1098 = vrot.lane.b32.xlu0 %v1095_v33, %s3233_s6  ;;  %v1208_v33 = vmul.f32 %v1205_v61, %v3589_v25  ;;  %v1276_v39 = vrot.slane %v3797_v30, 5  ;;  %v1195_v41 = vsel %vm650_vm6, %v1192_v63, %v1194_v32  ;;  %v1275_v44 = vrot.slane %v1269_v35, 5 }
 0x148   : > { %1023 = vrot.lane.b32.xlu1 %v1020_v36, %s3232_s5  ;;  %v1289_v36 = vstv %s2902_s24  ;;  %v1311_v61 = vmul.f32 %v1310_v55, %v3536_v51  ;;  %v1278_v4 = vrot.slane %v1271_v59, 5  ;;  %v1312_v30 = vmul.f32 %v1310_v55, %v3562_v6  ;;  %s2914_s24 = sld [smem:[#allocation5 + $0x22]] }
 0x149   : > { %v3807_v40 = vmul.f32 %v1289_v36, %v3562_v6  ;;  %v1215_v42 = vrot.slane %v1208_v33, 2  ;;  %v1290_v45 = vmul.f32 %v1289_v36, %v3536_v51  ;;  %v1292_v5 = vmul.f32 %v1289_v36, %v3589_v25 }
 0x14a   : > { %v1279_v14 = vsel %vm721_vm9, %v1276_v39, %v1278_v4  ;;  %v1464_v59 = vstv %s2911_s25  ;;  %s3981_s25 = sld [smem:[#allocation5 + $0x1c]] }
 0x14b   : > { %1119 = vrot.lane.b32.xlu0 %v1116_v43, %s3233_s6  ;;  %v1229_v43 = vmul.f32 %v1226_v8, %v3589_v25  ;;  %v1297_v47 = vrot.slane %v3807_v40, 6  ;;  %v1216_v48 = vsel %vm668_vm7, %v1213_v10, %v1215_v42  ;;  %v1296_v52 = vrot.slane %v1290_v45, 6 }
 0x14c   : > { %1058 = vrot.lane.b32.xlu1 %v1055_v46, %s3233_s6  ;;  %v1277_v46 = vsel %vm721_vm9, %v1275_v44, %v1276_v39  ;;  %v1299_v15 = vrot.slane %v1292_v5, 6  ;;  %v1429_v39 = vstv %s2909_s3  ;;  %v1465_v5 = vmul.f32 %v1464_v59, %v3536_v51  ;;  %s3974_s3 = sld [smem:[#allocation5 + $0x15]] }
 0x14d   : > { %v1236_v49 = vrot.slane %v1229_v43, 3  ;;  %v1298_v54 = vsel %vm739_vm10, %v1296_v52, %v1297_v47  ;;  %v3884_v43 = vmul.f32 %v1429_v39, %v3562_v6 }
 0x14e   : > { %v1300_v23 = vsel %vm739_vm10, %v1297_v47, %v1299_v15 }
 0x14f   : > { %1140 = vrot.lane.b32.xlu0 %v1137_v53, %s3233_s6  ;;  %v1324_v53 = vstv %s2904_s23  ;;  %v1237_v57 = vsel %vm686_vm8, %v1234_v19, %v1236_v49  ;;  %s3236_s23 = smov 122  }
 0x150   : > { %1079 = vrot.lane.b32.xlu1 %v1076_v56, %s3233_s6  ;;  %v3825_v56 = vmul.f32 %v1324_v53, %v3562_v6  ;;  %v1325_v60 = vmul.f32 %v1324_v53, %v3536_v51  ;;  %v1327_v24 = vmul.f32 %v1324_v53, %v3589_v25  ;;  %v1437_v53 = vrot.slane %v3884_v43, 6 }
 0x152   : > { %v1332_v0 = vrot.slane %v3825_v56, 1  ;;  %v1331_v7 = vrot.slane %v1325_v60, 1  ;;  %v1334_v33 = vrot.slane %v1327_v24, 1 }
 0x153   : > { %1161 = vrot.lane.b32.xlu0 %v1158_v62, %s3233_s6  ;;  %v1345_v62 = vstv %s2905_s29  ;;  %s3937_s29 = sld [smem:[#allocation5 + $0x29]] }
 0x154   : > { %1100 = vrot.lane.b32.xlu1 %v1097_v2, %s3233_s6  ;;  %v3837_v2 = vmul.f32 %v1345_v62, %v3562_v6  ;;  %v1346_v8 = vmul.f32 %v1345_v62, %v3536_v51  ;;  %v1333_v11 = vsel %vm650_vm6, %v1331_v7, %v1332_v0  ;;  %v1348_v34 = vmul.f32 %v1345_v62, %v3589_v25 }
 0x155   : > { %v1335_v44 = vsel %vm650_vm6, %v1332_v0, %v1334_v33  ;;  %v1450_v62 = vstv %s3886_s7  ;;  %v3910_v0 = vmul.f32 %v1464_v59, %v3562_v6  ;;  %s4021_s7 = sld [smem:[#allocation5 + $0x39]] }
 0x156   : > { %v1352_v16 = vrot.slane %v1346_v8, 2  ;;  %v1355_v45 = vrot.slane %v1348_v34, 2  ;;  %v1451_v8 = vmul.f32 %v1450_v62, %v3536_v51 }
 0x157   : > { %1196 = vrot.lane.b32.xlu0 %v1193_v9, %s3234_s19  ;;  %v1366_v9 = vstv %s2906_s4  ;;  %s3951_s4 = sld [smem:[#allocation5]] }
 0x158   : > { %1121 = vrot.lane.b32.xlu1 %v1118_v13, %s3233_s6  ;;  %v1353_v13 = vrot.slane %v3837_v2, 2  ;;  %v3849_v12 = vmul.f32 %v1366_v9, %v3562_v6  ;;  %v1367_v17 = vmul.f32 %v1366_v9, %v3536_v51 }
 0x15a   : > { %v1354_v19 = vsel %vm668_vm7, %v1352_v16, %v1353_v13  ;;  %v1374_v20 = vrot.slane %v3849_v12, 3  ;;  %v1373_v26 = vrot.slane %v1367_v17, 3  ;;  %v1432_v16 = vmul.f32 %v1429_v39, %v3589_v25 }
 0x15b   : > { %1217 = vrot.lane.b32.xlu0 %v1214_v18, %s3234_s19  ;;  %v1387_v18 = vstv %s2907_s17  ;;  %v1471_v17 = vrot.slane %v1465_v5, 1  ;;  %s3956_s17 = sld [smem:[#allocation5 + $0xe]] }
 0x15c   : > { %1142 = vrot.lane.b32.xlu1 %v1139_v21, %s3233_s6  ;;  %v3858_v21 = vmul.f32 %v1387_v18, %v3562_v6  ;;  %v1388_v27 = vmul.f32 %v1387_v18, %v3536_v51  ;;  %v1375_v29 = vsel %vm686_vm8, %v1373_v26, %v1374_v20  ;;  %v1390_v56 = vmul.f32 %v1387_v18, %v3589_v25 }
 0x15e   : > { %v1394_v35 = vrot.slane %v1388_v27, 4 }
 0x15f   : > { %1238 = vrot.lane.b32.xlu0 %v1235_v28, %s3234_s19  ;;  %v1408_v28 = vstv %s2908_s30  ;;  %s3962_s30 = sld [smem:[#allocation5 + $0x30]] }
 0x160   : > { %1163 = vrot.lane.b32.xlu1 %v1160_v31, %s3233_s6  ;;  %v1395_v31 = vrot.slane %v3858_v21, 4  ;;  %v3871_v32 = vmul.f32 %v1408_v28, %v3562_v6  ;;  %v1409_v36 = vmul.f32 %v1408_v28, %v3536_v51  ;;  %v1411_v4 = vmul.f32 %v1408_v28, %v3589_v25 }
 0x161   : > { %v1439_v28 = vrot.slane %v1432_v16, 6  ;;  %v4050_v16 = vstv %s3974_s3  ;;  %s4330_s3 = sld [smem:[#allocation5 + $0x41]] }
 0x162   : > { %v1416_v42 = vrot.slane %v3871_v32, 5  ;;  %v1415_v47 = vrot.slane %v1409_v36, 5  ;;  %v1418_v15 = vrot.slane %v1411_v4, 5  ;;  %v3960_v32 = vstv %s2914_s24  ;;  %s3999_s24 = sld [smem:[#allocation5 + $0x32]] }
 0x163   : > { %1259 = vrot.lane.b32.xlu0 %v1256_v38, %s3234_s19  ;;  %v3972_v36 = vmul.f32 %v3960_v32, %v3562_v6 }
 0x164   : > { %1198 = vrot.lane.b32.xlu1 %v1195_v41, %s3234_s19  ;;  %v1396_v41 = vsel %vm192_vm0, %v1394_v35, %v1395_v31  ;;  %v1417_v52 = vsel %vm721_vm9, %v1415_v47, %v1416_v42  ;;  %v1419_v27 = vsel %vm721_vm9, %v1416_v42, %v1418_v15  ;;  %v3979_v42 = vstv %s2869_s27  ;;  %s4023_s27 = sld [smem:[#allocation5 + $0x40]] }
 0x165   : > { %v3997_v47 = vstv %s3937_s29  ;;  %v4032_v5 = vstv %s3962_s30  ;;  %s4034_s29 = sld [smem:[#allocation5 + $0x47]]  ;;  %s4301_s30 = sld [smem:[#allocation5 + $0x3a]] }
 0x166   : > { %v4047_v15 = vmul.f32 %v4032_v5, %v3562_v6 }
 0x167   : > { %1280 = vrot.lane.b32.xlu0 %v1277_v46, %s3234_s19  ;;  %v1369_v46 = vmul.f32 %v1366_v9, %v3589_v25  ;;  %v1485_v9 = vstv %s2912_s16  ;;  %s3983_s16 = sld [smem:[#allocation5 + $0x23]] }
 0x168   : > { %1219 = vrot.lane.b32.xlu1 %v1216_v48, %s3234_s19  ;;  %v1430_v48 = vmul.f32 %v1429_v39, %v3536_v51  ;;  %v3926_v12 = vmul.f32 %v1485_v9, %v3562_v6  ;;  %v1486_v18 = vmul.f32 %v1485_v9, %v3536_v51  ;;  %v1440_v39 = vsel %vm739_vm10, %v1437_v53, %v1439_v28 }
 0x169   : > { %v1376_v55 = vrot.slane %v1369_v46, 3 }
 0x16a   : > { %v1493_v24 = vrot.slane %v3926_v12, 2  ;;  %v4114_v12 = vstv %s4021_s7  ;;  %s4488_s7 = sld [smem:[#allocation5 + $0x34]] }
 0x16b   : > { %1301 = vrot.lane.b32.xlu0 %v1298_v54, %s3234_s19  ;;  %v1356_v54 = vsel %vm668_vm7, %v1353_v13, %v1355_v45  ;;  %v1377_v2 = vsel %vm686_vm8, %v1374_v20, %v1376_v55  ;;  %v1472_v13 = vrot.slane %v3910_v0, 1  ;;  %v3935_v20 = vstv %s2913_s8  ;;  %s3992_s8 = sld [smem:[#allocation5 + $0x2a]] }
 0x16c   : > { %1240 = vrot.lane.b32.xlu1 %v1237_v57, %s3234_s19  ;;  %v1436_v57 = vrot.slane %v1430_v48, 6  ;;  %v3947_v26 = vmul.f32 %v3935_v20, %v3562_v6  ;;  %v3990_v45 = vmul.f32 %v3979_v42, %v3562_v6  ;;  %v4012_v55 = vmul.f32 %v3997_v47, %v3562_v6 }
 0x16e   : > { %v3833_v63 = vpop.permute.xlu0 %755  ;;  %v1514_v35 = vrot.slane %v3947_v26, 3  ;;  %v646_v26 = vmul.f32 %v3979_v42, %v3589_v25 }
 0x16f   : > { %1315 = vrot.lane.b32.xlu0 %v1311_v61, %s5501_s21  ;;  %v1438_v61 = vsel %vm739_vm10, %v1436_v57, %v1437_v53  ;;  %v1452_v53 = vmul.f32 %v1450_v62, %v3562_v6  ;;  %v1488_v57 = vmul.f32 %v1485_v9, %v3589_v25  ;;  %v1549_v62 = vmul.f32 %v3997_v47, %v3536_v51 }
 0x170   : > { %1261 = vrot.lane.b32.xlu1 %v1258_v3, %s3234_s19  ;;  %v1397_v3 = vrot.slane %v1390_v56, 4 }
 0x172   : > { %v3844_v10 = vpop.permute.xlu0 %895 }
 0x173   : > { %1336 = vrot.lane.b32.xlu0 %v1333_v11, %s5501_s21 }
 0x174   : > { %1282 = vrot.lane.b32.xlu1 %v1279_v14, %s3234_s19  ;;  %v1398_v14 = vsel %vm192_vm0, %v1395_v31, %v1397_v3  ;;  %v4027_v3 = vstv %s3956_s17  ;;  %s4079_s17 = sld [smem:[#allocation5 + $0x55]] }
 0x175   : > { %v4060_v28 = vmul.f32 %v4027_v3, %v3562_v6 }
 0x176   : > { %v3860_v22 = vpop.permute.xlu0 %1035 }
 0x177   : > { %5531 = vst [vmem:[#allocation15_spill] sm:$0xff] %v3860_v22  ;;  %1357 = vrot.lane.b32.xlu0 %v1354_v19, %s5501_s21 }
 0x178   : > { %1303 = vrot.lane.b32.xlu1 %v1300_v23, %s3234_s19  ;;  %v1473_v23 = vsel %vm650_vm6, %v1471_v17, %v1472_v13 }
 0x17a   : > { %v3877_v38 = vpop.permute.xlu0 %1175 }
 0x17b   : > { %1378 = vrot.lane.b32.xlu0 %v1375_v29, %s5501_s21  ;;  %5532 = vst [vmem:[#allocation16_spill] sm:$0xff] %v3877_v38  ;;  %v1492_v29 = vrot.slane %v1486_v18, 2  ;;  %v1495_v18 = vrot.slane %v1488_v57, 2 }
 0x17c   : > { %1317 = vrot.lane.b32.xlu1 %v1312_v30, %s5501_s21  ;;  %v1507_v30 = vmul.f32 %v3935_v20, %v3536_v51 }
 0x17d   : > { %v1494_v34 = vsel %vm668_vm7, %v1492_v29, %v1493_v24  ;;  %v1555_v29 = vrot.slane %v1549_v62, 5  ;;  %v1530_v62 = vmul.f32 %v3960_v32, %v3589_v25 }
 0x17e   : > { %v3879_v40 = vpop.permute.xlu1 %757  ;;  %v1513_v43 = vrot.slane %v1507_v30, 3  ;;  %v4063_v30 = vld [vmem:[#allocation4] sm:$0xff] }
 0x17f   : > { %1399 = vrot.lane.b32.xlu0 %v1396_v41, %s5501_s21  ;;  %v1467_v41 = vmul.f32 %v1464_v59, %v3589_v25  ;;  %v644_v59 = vmul.f32 %v3979_v42, %v3536_v51  ;;  %v1570_v0 = vmul.f32 %v4063_v30, %v4032_v5 }
 0x180   : > { %1338 = vrot.lane.b32.xlu1 %v1335_v44, %s5501_s21  ;;  %v1528_v44 = vmul.f32 %v3960_v32, %v3536_v51  ;;  %v4122_v32 = vstv %s4034_s29  ;;  %s4517_s29 = sld [smem:[#allocation5 + $0x49]] }
 0x181   : > { %v3893_v49 = vpop.permute.xlu0 %776  ;;  %v1474_v56 = vrot.slane %v1467_v41, 1  ;;  %v5513_v41 = vstv %s3999_s24 }
 0x182   : > { %v3895_v50 = vpop.permute.xlu1 %897 }
 0x183   : > { %5533 = vst [vmem:[#allocation17_spill] sm:$0xff] %v3895_v50  ;;  %1420 = vrot.lane.b32.xlu0 %v1417_v52, %s5501_s21  ;;  %v1515_v52 = vsel %vm686_vm8, %v1513_v43, %v1514_v35  ;;  %v1475_v17 = vsel %vm650_vm6, %v1472_v13, %v1474_v56  ;;  %v4071_v13 = vstv %s3983_s16  ;;  %v662_v43 = vmul.f32 %v4063_v30, %v4027_v3  ;;  %v4092_v56 = vld [vmem:[#allocation4 + $0x20] sm:$0xff]  ;;  %s4383_s16 = sld [smem:[#allocation5 + $0x4f]] }
 0x184   : > { %1359 = vrot.lane.b32.xlu1 %v1356_v54, %s5501_s21  ;;  %v5508_v54 = vrot.slane %v3972_v36, 4 }
 0x185   : > { %v3903_v58 = vpop.permute.xlu0 %797 }
 0x186   : > { %v3905_v60 = vpop.permute.xlu1 %1037 }
 0x187   : > { %5534 = vst [vmem:[#allocation18_spill] sm:$0xff] %v3905_v60  ;;  %1441 = vrot.lane.b32.xlu0 %v1438_v61, %s5501_s21  ;;  %v1534_v61 = vrot.slane %v1528_v44, 4 }
 0x188   : > { %1380 = vrot.lane.b32.xlu1 %v1377_v2, %s5501_s21  ;;  %v5505_v2 = vstv %s3951_s4 }
 0x189   : > { %v3917_v7 = vpop.permute.xlu0 %818  ;;  %v1536_v51 = vsel %vm192_vm0, %v1534_v61, %v5508_v54  ;;  %v638_v57 = vmul.f32 %v4063_v30, %v5505_v2  ;;  %v669_v2 = vrot.slane %v662_v43, 2  ;;  %v1551_v54 = vmul.f32 %v3997_v47, %v3589_v25 }
 0x18a   : > { %v3922_v11 = vpop.permute.xlu1 %1177 }
 0x18b   : > { %5535 = vst [vmem:[#allocation19_spill] sm:$0xff] %v3922_v11  ;;  %1455 = vrot.lane.b32.xlu0 %v1451_v8, %s3236_s23  ;;  %v5506_v8 = vrot.slane %v3990_v45, 1 }
 0x18c   : > { %1401 = vrot.lane.b32.xlu1 %v1398_v14, %s5501_s21  ;;  %v5507_v14 = vrot.slane %v4012_v55, 5 }
 0x18d   : > { %v3933_v19 = vpop.permute.xlu0 %839 }
 0x18e   : > { %v3939_v21 = vpop.permute.xlu1 %778 }
 0x18f   : > { %1476 = vrot.lane.b32.xlu0 %v1473_v23, %s3236_s23  ;;  %v1509_v23 = vmul.f32 %v3935_v20, %v3589_v25 }
 0x190   : > { %1422 = vrot.lane.b32.xlu1 %v1419_v27, %s5501_s21  ;;  %v651_v27 = vrot.slane %v644_v59, 1  ;;  %v1496_v59 = vsel %vm668_vm7, %v1493_v24, %v1495_v18 }
 0x191   : > { %v3958_v31 = vpop.permute.xlu0 %860  ;;  %v1516_v61 = vrot.slane %v1509_v23, 3  ;;  %v4119_v23 = vstv %s4023_s27  ;;  %s2940_s27 = sld [smem:[#allocation5 + $0x42]] }
 0x192   : > { %v3964_v33 = vpop.permute.xlu1 %799  ;;  %v653_v6 = vsel %vm650_vm6, %v651_v27, %v5506_v8  ;;  %v4106_v27 = vld [vmem:[#allocation4 + $0x8] sm:$0xff]  ;;  %v680_v8 = vmul.f32 %v4063_v30, %v4050_v16  ;;  %v4174_v42 = vmul.f32 %v4119_v23, %v4092_v56 }
 0x193   : > { %1497 = vrot.lane.b32.xlu0 %v1494_v34, %s3236_s23  ;;  %v4068_v34 = vstv %s3981_s25  ;;  %v658_v24 = vadd.f32 %v653_v6, %v638_v57  ;;  %v4136_v6 = vmul.f32 %v4114_v12, %v4092_v56  ;;  %v1517_v43 = vsel %vm686_vm8, %v1514_v35, %v1516_v61  ;;  %s4354_s25 = sld [smem:[#allocation5 + $0x48]] }
 0x194   : > { %1443 = vrot.lane.b32.xlu1 %v1440_v39, %s5501_s21  ;;  %s4036_s21 = sld [smem:[#allocation5 + $0x4e]]  ;;  %v4074_v39 = vstv %s3992_s8  ;;  %v1537_v57 = vrot.slane %v1530_v62, 4  ;;  %v4165_v62 = vstv %s4079_s17  ;;  %s4543_s17 = sld [smem:[#allocation5 + $0x50]] }
 0x195   : > { %v3994_v46 = vpop.permute.xlu0 %881  ;;  %v5540_v60 = vrot.slane %v4136_v6, 1  ;;  %v4225_v50 = vmul.f32 %v4106_v27, %v4074_v39  ;;  %s4408_s8 = sld [smem:[#allocation5 + $0x56]] }
 0x196   : > { %v4001_v48 = vpop.permute.xlu1 %820 }
 0x197   : > { %1518 = vrot.lane.b32.xlu0 %v1515_v52, %s3236_s23  ;;  %v1557_v52 = vsel %vm721_vm9, %v1555_v29, %v5507_v14  ;;  %v4110_v29 = vmul.f32 %v4106_v27, %v4050_v16 }
 0x198   : > { %1457 = vrot.lane.b32.xlu1 %v1452_v53, %s3236_s23  ;;  %v5509_v53 = vrot.slane %v4047_v15, 6 }
 0x199   : > { %v4029_v4 = vpop.permute.xlu0 %916  ;;  %v5538_v38 = vrot.slane %v4110_v29, 3 }
 0x19a   : > { %v4039_v9 = vpop.permute.xlu1 %841  ;;  %v4125_v1 = vstv %s4036_s21  ;;  %s4238_s21 = sld [smem:[#allocation5 + $0x5c]] }
 0x19b   : > { %1539 = vrot.lane.b32.xlu0 %v1536_v51, %s3236_s23  ;;  %v4103_v51 = vld [vmem:[#allocation4 + $0x18] sm:$0xff] }
 0x19c   : > { %1478 = vrot.lane.b32.xlu1 %v1475_v17, %s3236_s23  ;;  %v5510_v17 = vrot.slane %v4060_v28, 2  ;;  %v1702_v47 = vmul.f32 %v5513_v41, %v4103_v51  ;;  %v1558_v41 = vrot.slane %v1551_v54, 5  ;;  %v715_v54 = vmul.f32 %v4063_v30, %v4071_v13 }
 0x19d   : > { %v4076_v20 = vpop.permute.xlu0 %937 }
 0x19e   : > { %v4086_v44 = vpop.permute.xlu1 %862 }
 0x19f   : > { %1560 = vrot.lane.b32.xlu0 %v1557_v52, %s3236_s23  ;;  %v1576_v52 = vrot.slane %v1570_v0, 6 }
 0x1a0   : > { %1499 = vrot.lane.b32.xlu1 %v1496_v59, %s3236_s23  ;;  %v1716_v59 = vmul.f32 %v4114_v12, %v4103_v51 }
 0x1a1   : > { %v4116_v18 = vpop.permute.xlu0 %958  ;;  %v1578_v0 = vsel %vm739_vm10, %v1576_v52, %v5509_v53  ;;  %v671_v52 = vsel %vm668_vm7, %v669_v2, %v5510_v17  ;;  %v1737_v2 = vmul.f32 %v4119_v23, %v4103_v51  ;;  %v687_v17 = vrot.slane %v680_v8, 3  ;;  %v4180_v8 = vld [vmem:[#allocation4 + $0x10] sm:$0x3f] }
 0x1a2   : > { %v4129_v14 = vpop.permute.xlu1 %883  ;;  %v676_v35 = vadd.f32 %v671_v52, %v658_v24  ;;  %v698_v53 = vmul.f32 %v4063_v30, %v4068_v34  ;;  %v5537_v24 = vrot.slane %v3972_v36, 4  ;;  %v1722_v52 = vrot.slane %v1716_v59, 1 }
 0x1a3   : > { %1581 = vrot.lane.b32.xlu0 %v1578_v0, %s3236_s23  ;;  %v4152_v0 = vmul.f32 %v4106_v27, %v4068_v34  ;;  %v1572_v11 = vmul.f32 %v4180_v8, %v4032_v5  ;;  %v689_v25 = vsel %vm686_vm8, %v687_v17, %v5538_v38  ;;  %v654_v36 = vrot.slane %v646_v26, 1 }
 0x1a4   : > { %1520 = vrot.lane.b32.xlu1 %v1517_v43, %s3236_s23  ;;  %v1538_v43 = vsel %vm192_vm0, %v5537_v24, %v1537_v57  ;;  %v694_v57 = vadd.f32 %v689_v25, %v676_v35  ;;  %v664_v5 = vmul.f32 %v4180_v8, %v4027_v3  ;;  %v1758_v38 = vmul.f32 %v4122_v32, %v4103_v51 }
 0x1a5   : > { %v4157_v61 = vpop.permute.xlu0 %979  ;;  %v704_v17 = vrot.slane %v698_v53, 4  ;;  %v1724_v26 = vsel %vm650_vm6, %v1722_v52, %v5540_v60  ;;  %v4209_v25 = vmul.f32 %v4122_v32, %v4092_v56  ;;  %v733_v3 = vmul.f32 %v4063_v30, %v4074_v39 }
 0x1a6   : > { %v4169_v37 = vpop.permute.xlu1 %918  ;;  %v5541_v53 = vrot.slane %v4012_v55, 5  ;;  %v1579_v22 = vrot.slane %v1572_v11, 6  ;;  %v5542_v60 = vrot.slane %v4152_v0, 4  ;;  %v5543_v30 = vrot.slane %v3990_v45, 1 }
 0x1a7   : > { %5536 = vst [vmem:[#allocation20_spill] sm:$0xff] %v4169_v37  ;;  %1706 = vrot.lane.b32.xlu0 %v1702_v47, %s3231_s28  ;;  %v4190_v47 = vmul.f32 %v4106_v27, %v4071_v13  ;;  %v4217_v37 = vld [vmem:[#allocation4 + $0x28] sm:$0x3f]  ;;  %v5544_v11 = vstv %s3951_s4  ;;  %v5545_v45 = vrot.slane %v4174_v42, 2  ;;  %s4299_s4 = sld [smem:[#allocation5 + $0x33]] }
 0x1a8   : > { %1541 = vrot.lane.b32.xlu1 %v1538_v43, %s3236_s23  ;;  %v1559_v43 = vsel %vm721_vm9, %v5541_v53, %v1558_v41  ;;  %v706_v52 = vsel %vm192_vm0, %v704_v17, %v5542_v60  ;;  %v655_v55 = vsel %vm650_vm6, %v5543_v30, %v654_v36  ;;  %v682_v17 = vmul.f32 %v4180_v8, %v4050_v16 }
 0x1a9   : > { %v4197_v59 = vpop.permute.xlu0 %1000  ;;  %v711_v41 = vadd.f32 %v706_v52, %v694_v57  ;;  %v722_v60 = vrot.slane %v715_v54, 5  ;;  %v5546_v16 = vrot.slane %v4047_v15, 6  ;;  %v5547_v52 = vrot.slane %v4190_v47, 5 }
 0x1aa   : > { %v4201_v24 = vpop.permute.xlu1 %939 }
 0x1ab   : > { %5539 = vst [vmem:[#allocation21_spill] sm:$0xff] %v4201_v24  ;;  %1727 = vrot.lane.b32.xlu0 %v1724_v26, %s3231_s28  ;;  %v1743_v24 = vrot.slane %v1737_v2, 2  ;;  %v639_v2 = vmul.f32 %v4106_v27, %v5544_v11  ;;  %v672_v26 = vrot.slane %v664_v5, 2  ;;  %v4248_v27 = vmul.f32 %v4125_v1, %v4092_v56 }
 0x1ac   : > { %1562 = vrot.lane.b32.xlu1 %v1559_v43, %s3236_s23  ;;  %v1580_v54 = vsel %vm739_vm10, %v5546_v16, %v1579_v22  ;;  %v1779_v43 = vmul.f32 %v4125_v1, %v4103_v51  ;;  %v724_v30 = vsel %vm721_vm9, %v722_v60, %v5547_v52  ;;  %v740_v11 = vrot.slane %v733_v3, 6 }
 0x1ad   : > { %v4236_v53 = vpop.permute.xlu0 %1021  ;;  %v1745_v36 = vsel %vm668_vm7, %v1743_v24, %v5545_v45  ;;  %v659_v5 = vadd.f32 %v655_v55, %v639_v2  ;;  %v1718_v24 = vmul.f32 %v4114_v12, %v4217_v37  ;;  %v741_v55 = vrot.slane %v4225_v50, 6 }
 0x1ae   : > { %v4240_v35 = vpop.permute.xlu1 %960  ;;  %v1764_v2 = vrot.slane %v1758_v38, 3  ;;  %v729_v15 = vadd.f32 %v724_v30, %v711_v41  ;;  %v5548_v45 = vrot.slane %v4060_v28, 2  ;;  %v700_v16 = vmul.f32 %v4180_v8, %v4068_v34 }
 0x1af   : > { %1748 = vrot.lane.b32.xlu0 %v1745_v36, %s3231_s28  ;;  %v690_v36 = vrot.slane %v682_v17, 3  ;;  %v5549_v3 = vrot.slane %v4209_v25, 3  ;;  %v5514_v28 = vrot.slane %v4248_v27, 4  ;;  %v4281_v41 = vmul.f32 %v4165_v62, %v4092_v56 }
 0x1b0   : > { %1583 = vrot.lane.b32.xlu1 %v1580_v54, %s3236_s23  ;;  %v673_v22 = vsel %vm668_vm7, %v5548_v45, %v672_v26  ;;  %v5550_v54 = vstv %s3999_s24  ;;  %v1725_v34 = vrot.slane %v1718_v24, 1  ;;  %v1739_v17 = vmul.f32 %v4119_v23, %v4217_v37  ;;  %s4431_s24 = sld [smem:[#allocation5 + $0x5d]] }
 0x1b1   : > { %v4268_v12 = vpop.permute.xlu0 %1056  ;;  %v1766_v60 = vsel %vm686_vm8, %v1764_v2, %v5549_v3  ;;  %v1703_v38 = vmul.f32 %v5550_v54, %v4092_v56  ;;  %v677_v26 = vadd.f32 %v673_v22, %v659_v5  ;;  %v742_v52 = vsel %vm739_vm10, %v740_v11, %v741_v55 }
 0x1b2   : > { %v4270_v57 = vpop.permute.xlu1 %981  ;;  %v1785_v30 = vrot.slane %v1779_v43, 4  ;;  %v1800_v2 = vmul.f32 %v4165_v62, %v4103_v51  ;;  %v747_v45 = vadd.f32 %v742_v52, %v729_v15  ;;  %v707_v3 = vrot.slane %v700_v16, 4 }
 0x1b3   : > { %1769 = vrot.lane.b32.xlu0 %v1766_v60, %s3231_s28  ;;  %v717_v5 = vmul.f32 %v4180_v8, %v4071_v13  ;;  %v4297_v24 = vstv %s4238_s21  ;;  %v5551_v23 = vrot.slane %v4110_v29, 3  ;;  %v1807_v13 = vrot.slane %v4281_v41, 5  ;;  %s4565_s21 = sld [smem:[#allocation5 + $0x57]] }
 0x1b4   : > { %1708 = vrot.lane.b32.xlu1 %v1703_v38, %s3231_s28  ;;  %v1787_v15 = vsel %vm192_vm0, %v1785_v30, %v5514_v28  ;;  %v4314_v16 = vmul.f32 %v4297_v24, %v4092_v56  ;;  %v5552_v54 = vrot.slane %v4136_v6, 1  ;;  %v1760_v38 = vmul.f32 %v4122_v32, %v4217_v37 }
 0x1b5   : > { %v4294_v22 = vpop.permute.xlu0 %1077  ;;  %v691_v43 = vsel %vm686_vm8, %v5551_v23, %v690_v36  ;;  %v1746_v36 = vrot.slane %v1739_v17, 2  ;;  %v761_v52 = vadd.f32 %v3833_v63, %v747_v45  ;;  %v1806_v30 = vrot.slane %v1800_v2, 5 }
 0x1b6   : > { %v4306_v11 = vpop.permute.xlu1 %1002  ;;  %v695_v60 = vadd.f32 %v691_v43, %v677_v26  ;;  %v1726_v29 = vsel %vm650_vm6, %v5552_v54, %v1725_v34  ;;  %v1821_v23 = vmul.f32 %v4297_v24, %v4103_v51  ;;  %v725_v28 = vrot.slane %v717_v5, 5 }
 0x1b7   : > { %1790 = vrot.lane.b32.xlu0 %v1787_v15, %s3231_s28  ;;  %v735_v26 = vmul.f32 %v4180_v8, %v4074_v39  ;;  %v5553_v6 = vrot.slane %v4152_v0, 4  ;;  %v782_v63 = vadd.f32 %v3893_v49, %v761_v52  ;;  %v1808_v17 = vsel %vm721_vm9, %v1806_v30, %v1807_v13 }
 0x1b8   : > { %1729 = vrot.lane.b32.xlu1 %v1726_v29, %s3231_s28  ;;  %v1828_v39 = vrot.slane %v4314_v16, 6  ;;  %v5554_v2 = vrot.slane %v4174_v42, 2  ;;  %v1767_v45 = vrot.slane %v1760_v38, 3  ;;  %v1827_v5 = vrot.slane %v1821_v23, 6 }
 0x1b9   : > { %v4328_v43 = vpop.permute.xlu0 %1098  ;;  %v708_v32 = vsel %vm192_vm0, %v5553_v6, %v707_v3  ;;  %v1781_v3 = vmul.f32 %v4125_v1, %v4217_v37  ;;  %v803_v49 = vadd.f32 %v3903_v58, %v782_v63  ;;  %v743_v15 = vrot.slane %v735_v26, 6 }
 0x1ba   : > { %v4336_v34 = vpop.permute.xlu1 %1023  ;;  %v712_v8 = vadd.f32 %v708_v32, %v695_v60  ;;  %v1747_v0 = vsel %vm668_vm7, %v5554_v2, %v1746_v36  ;;  %v1841_v29 = vstv %s4299_s4  ;;  %v1855_v60 = vstv %s4301_s30  ;;  %s4590_s4 = sld [smem:[#allocation5 + $0x5e]]  ;;  %s4616_s30 = sld [smem:[#allocation5 + $0x3c]] }
 0x1bb   : > { %1811 = vrot.lane.b32.xlu0 %v1808_v17, %s3231_s28  ;;  %v5555_v42 = vrot.slane %v4190_v47, 5  ;;  %v824_v1 = vadd.f32 %v3917_v7, %v803_v49  ;;  %v1829_v58 = vsel %vm739_vm10, %v1827_v5, %v1828_v39  ;;  %v4366_v52 = vmul.f32 %v1855_v60, %v4092_v56 }
 0x1bc   : > { %1750 = vrot.lane.b32.xlu1 %v1747_v0, %s3231_s28  ;;  %v5556_v23 = vrot.slane %v4209_v25, 3  ;;  %v1788_v26 = vrot.slane %v1781_v3, 4  ;;  %v1802_v7 = vmul.f32 %v4165_v62, %v4217_v37  ;;  %v1856_v6 = vmul.f32 %v1855_v60, %v4103_v51 }
 0x1bd   : > { %v4350_v54 = vpop.permute.xlu0 %1119  ;;  %v726_v36 = vsel %vm721_vm9, %v5555_v42, %v725_v28  ;;  %v845_v28 = vadd.f32 %v3933_v19, %v824_v1  ;;  %v1842_v63 = vmul.f32 %v1841_v29, %v4103_v51  ;;  %v1876_v17 = vstv %s4330_s3  ;;  %s4651_s3 = sld [smem:[#allocation5 + $0x35]] }
 0x1be   : > { %v4360_v38 = vpop.permute.xlu1 %1058  ;;  %v730_v30 = vadd.f32 %v726_v36, %v712_v8  ;;  %v1768_v47 = vsel %vm686_vm8, %v5556_v23, %v1767_v45  ;;  %v744_v25 = vsel %vm739_vm10, %v741_v55, %v743_v15  ;;  %v1863_v8 = vrot.slane %v4366_v52, 1 }
 0x1bf   : > { %1832 = vrot.lane.b32.xlu0 %v1829_v58, %s3231_s28  ;;  %v866_v62 = vadd.f32 %v3958_v31, %v845_v28  ;;  %v4393_v2 = vmul.f32 %v1876_v17, %v4092_v56  ;;  %v5557_v45 = vrot.slane %v4248_v27, 4  ;;  %v1809_v50 = vrot.slane %v1802_v7, 5 }
 0x1c0   : > { %1771 = vrot.lane.b32.xlu1 %v1768_v47, %s3231_s28  ;;  %v748_v0 = vadd.f32 %v744_v25, %v730_v30  ;;  %v1823_v55 = vmul.f32 %v4297_v24, %v4217_v37  ;;  %v1862_v49 = vrot.slane %v1856_v6, 1  ;;  %v1877_v5 = vmul.f32 %v1876_v17, %v4103_v51 }
 0x1c1   : > { %v4377_v32 = vpop.permute.xlu0 %1140  ;;  %v1789_v3 = vsel %vm192_vm0, %v5557_v45, %v1788_v26  ;;  %v887_v31 = vadd.f32 %v3994_v46, %v866_v62  ;;  %v1897_v36 = vstv %s4354_s25  ;;  %v1884_v46 = vrot.slane %v4393_v2, 2  ;;  %s4659_s25 = sld [smem:[#allocation5 + $0x4a]] }
 0x1c2   : > { %v4389_v19 = vpop.permute.xlu1 %1079  ;;  %v762_v15 = vadd.f32 %v3879_v40, %v748_v0  ;;  %v1864_v24 = vsel %vm650_vm6, %v1862_v49, %v1863_v8  ;;  %v4417_v1 = vmul.f32 %v1897_v36, %v4092_v56  ;;  %v1810_v40 = vsel %vm721_vm9, %v1807_v13, %v1809_v50 }
 0x1c3   : > { %1846 = vrot.lane.b32.xlu0 %v1842_v63, %s3232_s5  ;;  %v1830_v30 = vrot.slane %v1823_v55, 6  ;;  %v901_v23 = vadd.f32 %v3844_v10, %v887_v31  ;;  %v1883_v47 = vrot.slane %v1877_v5, 2  ;;  %v1898_v26 = vmul.f32 %v1897_v36, %v4103_v51 }
 0x1c4   : > { %1792 = vrot.lane.b32.xlu1 %v1789_v3, %s3231_s28  ;;  %v783_v58 = vadd.f32 %v3939_v21, %v762_v15  ;;  %v1918_v6 = vstv %s4383_s16  ;;  %v1905_v41 = vrot.slane %v4417_v1, 3  ;;  %v1858_v25 = vmul.f32 %v1855_v60, %v4217_v37  ;;  %s4676_s16 = sld [smem:[#allocation5 + $0x51]] }
 0x1c5   : > { %v4405_v42 = vpop.permute.xlu0 %1161  ;;  %v1885_v10 = vsel %vm668_vm7, %v1883_v47, %v1884_v46  ;;  %v4440_v13 = vmul.f32 %v1918_v6, %v4092_v56  ;;  %v1831_v63 = vsel %vm739_vm10, %v1828_v39, %v1830_v30  ;;  %v922_v62 = vadd.f32 %v4029_v4, %v901_v23 }
 0x1c6   : > { %v4410_v27 = vpop.permute.xlu1 %1100  ;;  %v804_v7 = vadd.f32 %v3964_v33, %v783_v58  ;;  %v1904_v0 = vrot.slane %v1898_v26, 3  ;;  %v1919_v45 = vmul.f32 %v1918_v6, %v4103_v51  ;;  %v1939_v55 = vstv %s4408_s8  ;;  %s4698_s8 = sld [smem:[#allocation5 + $0x58]] }
 0x1c7   : > { %1867 = vrot.lane.b32.xlu0 %v1864_v24, %s3232_s5  ;;  %v943_v16 = vadd.f32 %v4076_v20, %v922_v62  ;;  %v1926_v60 = vrot.slane %v4440_v13, 4  ;;  %v4466_v31 = vmul.f32 %v1939_v55, %v4092_v56  ;;  %v1879_v49 = vmul.f32 %v1876_v17, %v4217_v37 }
 0x1c8   : > { %1813 = vrot.lane.b32.xlu1 %v1810_v40, %s3231_s28  ;;  %v825_v33 = vadd.f32 %v4001_v48, %v804_v7  ;;  %v1843_v48 = vmul.f32 %v1841_v29, %v4092_v56  ;;  %v1906_v4 = vsel %vm686_vm8, %v1904_v0, %v1905_v41  ;;  %v1865_v29 = vrot.slane %v1858_v25, 1 }
 0x1c9   : > { %v4428_v28 = vpop.permute.xlu0 %1196  ;;  %v964_v20 = vadd.f32 %v4116_v18, %v943_v16  ;;  %v1925_v5 = vrot.slane %v1919_v45, 4  ;;  %v1940_v15 = vmul.f32 %v1939_v55, %v4103_v51  ;;  %v1960_v40 = vstv %s4431_s24  ;;  %s4714_s24 = sld [smem:[#allocation5 + $0x5f]] }
 0x1ca   : > { %v4433_v21 = vpop.permute.xlu1 %1121  ;;  %v846_v3 = vadd.f32 %v4039_v9, %v825_v33  ;;  %v1947_v18 = vrot.slane %v4466_v31, 5  ;;  %v4486_v23 = vmul.f32 %v1960_v40, %v4092_v56  ;;  %v1900_v47 = vmul.f32 %v1897_v36, %v4217_v37  ;;  %v5558_v33 = vld [vmem:[#allocation17_spill] sm:$0xff] }
 0x1cb   : > { %1888 = vrot.lane.b32.xlu0 %v1885_v10, %s3232_s5  ;;  %v1927_v17 = vsel %vm192_vm0, %v1925_v5, %v1926_v60  ;;  %v1946_v7 = vrot.slane %v1940_v15, 5  ;;  %v1961_v10 = vmul.f32 %v1960_v40, %v4103_v51  ;;  %v1921_v45 = vmul.f32 %v1918_v6, %v4217_v37 }
 0x1cc   : > { %1834 = vrot.lane.b32.xlu1 %v1831_v63, %s3231_s28  ;;  %v867_v9 = vadd.f32 %v4086_v44, %v846_v3  ;;  %s2939_s28 = sld [smem:[#allocation5 + $0x3b]]  ;;  %v985_v44 = vadd.f32 %v4157_v61, %v964_v20  ;;  %v1886_v61 = vrot.slane %v1879_v49, 2  ;;  %v1907_v0 = vrot.slane %v1900_v47, 3  ;;  %v5559_v3 = vld [vmem:[#allocation20_spill] sm:$0xff]  ;;  %v5561_v20 = vld [vmem:[#allocation21_spill] sm:$0xff] }
 0x1cd   : > { %v4452_v50 = vpop.permute.xlu0 %1217 }
 0x1ce   : > { %v4459_v39 = vpop.permute.xlu1 %1142  ;;  %v888_v24 = vadd.f32 %v4129_v14, %v867_v9  ;;  %v1866_v14 = vsel %vm650_vm6, %v1863_v8, %v1865_v29  ;;  %v1006_v26 = vadd.f32 %v4197_v59, %v985_v44  ;;  %v1948_v8 = vsel %vm721_vm9, %v1946_v7, %v1947_v18  ;;  %v5560_v9 = vld [vmem:[#allocation15_spill] sm:$0xff] }
 0x1cf   : > { %1909 = vrot.lane.b32.xlu0 %v1906_v4, %s3232_s5  ;;  %v1968_v59 = vrot.slane %v4486_v23, 6  ;;  %v1887_v36 = vsel %vm668_vm7, %v1884_v46, %v1886_v61  ;;  %v1981_v46 = vstv %s4488_s7  ;;  %v1908_v15 = vsel %vm686_vm8, %v1905_v41, %v1907_v0  ;;  %s4767_s7 = sld [smem:[#allocation5 + $0x3f]] }
 0x1d0   : > { %1848 = vrot.lane.b32.xlu1 %v1843_v48, %s3232_s5  ;;  %v902_v63 = vadd.f32 %v5558_v33, %v888_v24  ;;  %v1027_v62 = vadd.f32 %v4236_v53, %v1006_v26  ;;  %v1967_v53 = vrot.slane %v1961_v10, 6  ;;  %v1928_v24 = vrot.slane %v1921_v45, 4 }
 0x1d1   : > { %v4475_v58 = vpop.permute.xlu0 %1238  ;;  %v1942_v44 = vmul.f32 %v1939_v55, %v4217_v37  ;;  %v1982_v47 = vmul.f32 %v1981_v46, %v4103_v51  ;;  %v2016_v26 = vstv %s2940_s27  ;;  %s4780_s27 = sld [smem:[#allocation5 + $0x46]] }
 0x1d2   : > { %v4479_v30 = vpop.permute.xlu1 %1163  ;;  %v923_v48 = vadd.f32 %v5559_v3, %v902_v63  ;;  %v1995_v4 = vstv %s2939_s28  ;;  %v1041_v29 = vadd.f32 %v5560_v9, %v1027_v62  ;;  %v1969_v2 = vsel %vm739_vm10, %v1967_v53, %v1968_v59  ;;  %s4756_s28 = sld [smem:[#allocation5 + $0x38]] }
 0x1d3   : > { %1930 = vrot.lane.b32.xlu0 %v1927_v17, %s3232_s5  ;;  %v4527_v6 = vmul.f32 %v1995_v4, %v4092_v56  ;;  %v1996_v17 = vmul.f32 %v1995_v4, %v4103_v51  ;;  %v4550_v7 = vmul.f32 %v2016_v26, %v4092_v56  ;;  %v1929_v10 = vsel %vm192_vm0, %v1926_v60, %v1928_v24 }
 0x1d4   : > { %1869 = vrot.lane.b32.xlu1 %v1866_v14, %s3232_s5  ;;  %v944_v5 = vadd.f32 %v5561_v20, %v923_v48  ;;  %v1062_v1 = vadd.f32 %v4268_v12, %v1041_v29  ;;  %v1949_v33 = vrot.slane %v1942_v44, 5  ;;  %v1963_v63 = vmul.f32 %v1960_v40, %v4217_v37 }
 0x1d5   : > { %v4499_v25 = vpop.permute.xlu0 %1259  ;;  %v2003_v55 = vrot.slane %v4527_v6, 1  ;;  %v2002_v62 = vrot.slane %v1996_v17, 1  ;;  %v2024_v40 = vrot.slane %v4550_v7, 2  ;;  %v1998_v24 = vmul.f32 %v1995_v4, %v4217_v37 }
 0x1d6   : > { %v4502_v52 = vpop.permute.xlu1 %1198  ;;  %v965_v14 = vadd.f32 %v4240_v35, %v944_v5  ;;  %v1083_v12 = vadd.f32 %v4294_v22, %v1062_v1  ;;  %v1950_v53 = vsel %vm721_vm9, %v1947_v18, %v1949_v33  ;;  %v5562_v5 = vld [vmem:[#allocation18_spill] sm:$0xff]  ;;  %v2079_v1 = vstv %s4565_s21  ;;  %s4815_s21 = sld [smem:[#allocation5 + $0x54]] }
 0x1d7   : > { %1951 = vrot.lane.b32.xlu0 %v1948_v8, %s3232_s5  ;;  %v2017_v8 = vmul.f32 %v2016_v26, %v4103_v51  ;;  %v2004_v22 = vsel %vm650_vm6, %v2002_v62, %v2003_v55  ;;  %v4628_v4 = vmul.f32 %v2079_v1, %v4092_v56  ;;  %v2005_v33 = vrot.slane %v1998_v24, 1 }
 0x1d8   : > { %1890 = vrot.lane.b32.xlu1 %v1887_v36, %s3232_s5  ;;  %v986_v35 = vadd.f32 %v4270_v57, %v965_v14  ;;  %v2037_v57 = vstv %s4517_s29  ;;  %v1104_v13 = vadd.f32 %v4328_v43, %v1083_v12  ;;  %v1970_v43 = vrot.slane %v1963_v63, 6  ;;  %v5563_v12 = vld [vmem:[#allocation16_spill] sm:$0xff]  ;;  %s4790_s29 = sld [smem:[#allocation5 + $0x31]] }
 0x1d9   : > { %v4515_v16 = vpop.permute.xlu0 %1280  ;;  %v4575_v45 = vmul.f32 %v2037_v57, %v4092_v56  ;;  %v2023_v48 = vrot.slane %v2017_v8, 2  ;;  %v2038_v9 = vmul.f32 %v2037_v57, %v4103_v51  ;;  %v2019_v63 = vmul.f32 %v2016_v26, %v4217_v37 }
 0x1da   : > { %v4520_v49 = vpop.permute.xlu1 %1219  ;;  %v1007_v36 = vadd.f32 %v4306_v11, %v986_v35  ;;  %v1125_v3 = vadd.f32 %v4350_v54, %v1104_v13  ;;  %v2087_v26 = vrot.slane %v4628_v4, 5  ;;  %v2135_v6 = vstv %s4616_s30  ;;  %s4878_s30 = sld [smem:[#allocation5 + $0x36]] }
 0x1db   : > { %1972 = vrot.lane.b32.xlu0 %v1969_v2, %s3232_s5  ;;  %v4588_v2 = vstv %s4543_s17  ;;  %v2025_v54 = vsel %vm668_vm7, %v2023_v48, %v2024_v40  ;;  %v2045_v18 = vrot.slane %v4575_v45, 3  ;;  %v2044_v17 = vrot.slane %v2038_v9, 3  ;;  %s4794_s17 = sld [smem:[#allocation5 + $0x4d]] }
 0x1dc   : > { %1911 = vrot.lane.b32.xlu1 %v1908_v15, %s3232_s5  ;;  %v1028_v11 = vadd.f32 %v4336_v34, %v1007_v36  ;;  %v1146_v34 = vadd.f32 %v4377_v32, %v1125_v3  ;;  %v4601_v20 = vmul.f32 %v4588_v2, %v4092_v56  ;;  %v1971_v32 = vsel %vm739_vm10, %v1968_v59, %v1970_v43 }
 0x1dd   : > { %v4538_v61 = vpop.permute.xlu0 %1301  ;;  %v2059_v14 = vmul.f32 %v4588_v2, %v4103_v51  ;;  %v2046_v23 = vsel %vm686_vm8, %v2044_v17, %v2045_v18  ;;  %v2026_v3 = vrot.slane %v2019_v63, 2  ;;  %v2040_v48 = vmul.f32 %v2037_v57, %v4217_v37 }
 0x1de   : > { %v4546_v41 = vpop.permute.xlu1 %1240  ;;  %v1042_v15 = vadd.f32 %v5562_v5, %v1028_v11  ;;  %v1167_v44 = vadd.f32 %v4405_v42, %v1146_v34  ;;  %v1983_v42 = vmul.f32 %v1981_v46, %v4092_v56  ;;  %v2066_v59 = vrot.slane %v4601_v20, 4 }
 0x1df   : > { %1986 = vrot.lane.b32.xlu0 %v1982_v47, %s3233_s6  ;;  %v2065_v8 = vrot.slane %v2059_v14, 4  ;;  %v2080_v46 = vmul.f32 %v2079_v1, %v4103_v51 }
 0x1e0   : > { %1932 = vrot.lane.b32.xlu1 %v1929_v10, %s3232_s5  ;;  %v1063_v10 = vadd.f32 %v4360_v38, %v1042_v15  ;;  %v1181_v62 = vadd.f32 %v5563_v12, %v1167_v44  ;;  %v2061_v44 = vmul.f32 %v4588_v2, %v4217_v37  ;;  %v4712_v12 = vstv %s4659_s25  ;;  %s4975_s25 = sld [smem:[#allocation5 + $0x52]] }
 0x1e1   : > { %v4562_v0 = vpop.permute.xlu0 %1315  ;;  %v2067_v38 = vsel %vm192_vm0, %v2065_v8, %v2066_v59  ;;  %v2086_v34 = vrot.slane %v2080_v46, 5 }
 0x1e2   : > { %v4568_v60 = vpop.permute.xlu1 %1261  ;;  %v1084_v36 = vadd.f32 %v4389_v19, %v1063_v10  ;;  %v2006_v19 = vsel %vm650_vm6, %v2003_v55, %v2005_v33  ;;  %v1202_v9 = vadd.f32 %v4428_v28, %v1181_v62  ;;  %v2068_v63 = vrot.slane %v2061_v44, 4 }
 0x1e3   : > { %2007 = vrot.lane.b32.xlu0 %v2004_v22, %s3233_s6  ;;  %v2100_v22 = vstv %s4590_s4  ;;  %v2088_v57 = vsel %vm721_vm9, %v2086_v34, %v2087_v26  ;;  %v4736_v34 = vstv %s4676_s16  ;;  %s4869_s4 = sld [smem:[#allocation5 + $0x3d]]  ;;  %s5565_s16 = smov 123  }
 0x1e4   : > { %1953 = vrot.lane.b32.xlu1 %v1950_v53, %s3232_s5  ;;  %v4649_v53 = vmul.f32 %v2100_v22, %v4092_v56  ;;  %v1105_v43 = vadd.f32 %v4410_v27, %v1084_v36  ;;  %v1223_v15 = vadd.f32 %v4452_v50, %v1202_v9  ;;  %v2047_v50 = vrot.slane %v2040_v48, 3  ;;  %v5564_v36 = vld [vmem:[#allocation19_spill] sm:$0xff] }
 0x1e5   : > { %v4585_v29 = vpop.permute.xlu0 %1336  ;;  %v2103_v48 = vmul.f32 %v2100_v22, %v4217_v37  ;;  %v4733_v9 = vmul.f32 %v4712_v12, %v4092_v56 }
 0x1e6   : > { %v4593_v31 = vpop.permute.xlu1 %1282  ;;  %v1126_v27 = vadd.f32 %v4433_v21, %v1105_v43  ;;  %v2108_v28 = vrot.slane %v4649_v53, 6  ;;  %v2027_v21 = vsel %vm668_vm7, %v2024_v40, %v2026_v3  ;;  %v1244_v17 = vadd.f32 %v4475_v58, %v1223_v15 }
 0x1e7   : > { %2028 = vrot.lane.b32.xlu0 %v2025_v54, %s3233_s6  ;;  %v2101_v54 = vmul.f32 %v2100_v22, %v4103_v51  ;;  %v2136_v40 = vmul.f32 %v2135_v6, %v4103_v51  ;;  %v2138_v22 = vmul.f32 %v2135_v6, %v4217_v37  ;;  %v2110_v44 = vrot.slane %v2103_v48, 6 }
 0x1e8   : > { %1974 = vrot.lane.b32.xlu1 %v1971_v32, %s3232_s5  ;;  %s4630_s5 = sld [smem:[#allocation5 + $0x43]]  ;;  %v1147_v24 = vadd.f32 %v4459_v39, %v1126_v27  ;;  %v2082_v39 = vmul.f32 %v2079_v1, %v4217_v37  ;;  %v1265_v58 = vadd.f32 %v4499_v25, %v1244_v17  ;;  %v2121_v1 = vstv %s4651_s3 }
 0x1e9   : > { %v4613_v47 = vpop.permute.xlu0 %1357  ;;  %v2107_v14 = vrot.slane %v2101_v54, 6  ;;  %v2142_v43 = vrot.slane %v2136_v40, 1  ;;  %v2069_v54 = vsel %vm192_vm0, %v2066_v59, %v2068_v63  ;;  %v4746_v27 = vmul.f32 %v4736_v34, %v4092_v56  ;;  %s4945_s3 = sld [smem:[#allocation5 + $0x4b]] }
 0x1ea   : > { %v4618_v35 = vpop.permute.xlu1 %1303  ;;  %v1168_v7 = vadd.f32 %v4479_v30, %v1147_v24  ;;  %v2048_v30 = vsel %vm686_vm8, %v2045_v18, %v2047_v50  ;;  %v1286_v25 = vadd.f32 %v4515_v16, %v1265_v58  ;;  %v2089_v8 = vrot.slane %v2082_v39, 5 }
 0x1eb   : > { %2049 = vrot.lane.b32.xlu0 %v2046_v23, %s3233_s6  ;;  %v4688_v23 = vmul.f32 %v2135_v6, %v4092_v56  ;;  %v2109_v33 = vsel %vm739_vm10, %v2107_v14, %v2108_v28  ;;  %v2122_v18 = vmul.f32 %v2121_v1, %v4103_v51  ;;  %v4764_v6 = vstv %s4698_s8  ;;  %s5005_s8 = sld [smem:[#allocation5 + $0x59]] }
 0x1ec   : > { %1988 = vrot.lane.b32.xlu1 %v1983_v42, %s3233_s6  ;;  %v1182_v45 = vadd.f32 %v5564_v36, %v1168_v7  ;;  %v1307_v3 = vadd.f32 %v4538_v61, %v1286_v25  ;;  %v2178_v61 = vmul.f32 %v4712_v12, %v4103_v51  ;;  %v2090_v20 = vsel %vm721_vm9, %v2087_v26, %v2089_v8 }
 0x1ed   : > { %v4639_v13 = vpop.permute.xlu0 %1378  ;;  %v2143_v62 = vrot.slane %v4688_v23, 1  ;;  %v2185_v17 = vrot.slane %v4733_v9, 3  ;;  %v2206_v23 = vrot.slane %v4746_v27, 4  ;;  %v2145_v39 = vrot.slane %v2138_v22, 1  ;;  %v4919_v9 = vld [vmem:[#allocation4 + $0x18] sm:$0xff] }
 0x1ee   : > { %v4642_v11 = vpop.permute.xlu1 %1317  ;;  %v2156_v32 = vstv %s4630_s5  ;;  %v1321_v15 = vadd.f32 %v4562_v0, %v1307_v3  ;;  %v1203_v24 = vadd.f32 %v4502_v52, %v1182_v45  ;;  %v2199_v0 = vmul.f32 %v4736_v34, %v4103_v51  ;;  %s4899_s5 = sld [smem:[#allocation5 + $0x44]] }
 0x1ef   : > { %2070 = vrot.lane.b32.xlu0 %v2067_v38, %s3233_s6  ;;  %v4696_v10 = vmul.f32 %v2156_v32, %v4103_v51  ;;  %v4720_v46 = vmul.f32 %v2156_v32, %v4092_v56  ;;  %v2159_v50 = vmul.f32 %v2156_v32, %v4217_v37  ;;  %v2123_v52 = vmul.f32 %v2121_v1, %v4092_v56 }
 0x1f0   : > { %2009 = vrot.lane.b32.xlu1 %v2006_v19, %s3233_s6  ;;  %v1342_v4 = vadd.f32 %v4585_v29, %v1321_v15  ;;  %v1224_v14 = vadd.f32 %v4520_v49, %v1203_v24  ;;  %v4778_v7 = vstv %s4714_s24  ;;  %v2184_v32 = vrot.slane %v2178_v61, 3  ;;  %s5041_s24 = sld [smem:[#allocation5 + $0x60]] }
 0x1f1   : > { %v4665_v5 = vpop.permute.xlu0 %1399  ;;  %v2163_v19 = vrot.slane %v4696_v10, 2  ;;  %v2164_v59 = vrot.slane %v4720_v46, 2  ;;  %v2220_v40 = vmul.f32 %v4764_v6, %v4103_v51  ;;  %v4788_v49 = vmul.f32 %v4764_v6, %v4092_v56 }
 0x1f2   : > { %v4669_v55 = vpop.permute.xlu1 %1338  ;;  %v1363_v29 = vadd.f32 %v4613_v47, %v1342_v4  ;;  %v1245_v10 = vadd.f32 %v4546_v41, %v1224_v14  ;;  %v2205_v1 = vrot.slane %v2199_v0, 4  ;;  %v2111_v25 = vsel %vm739_vm10, %v2108_v28, %v2110_v44 }
 0x1f3   : > { %2091 = vrot.lane.b32.xlu0 %v2088_v57, %s3233_s6  ;;  %v2144_v57 = vsel %vm650_vm6, %v2142_v43, %v2143_v62  ;;  %v2186_v41 = vsel %vm686_vm8, %v2184_v32, %v2185_v17  ;;  %v2241_v8 = vmul.f32 %v4778_v7, %v4103_v51  ;;  %v2146_v53 = vsel %vm650_vm6, %v2143_v62, %v2145_v39 }
 0x1f4   : > { %2030 = vrot.lane.b32.xlu1 %v2027_v21, %s3233_s6  ;;  %v1384_v47 = vadd.f32 %v4639_v13, %v1363_v29  ;;  %v1266_v46 = vadd.f32 %v4568_v60, %v1245_v10  ;;  %v2207_v13 = vsel %vm192_vm0, %v2205_v1, %v2206_v23  ;;  %v2180_v28 = vmul.f32 %v4712_v12, %v4217_v37 }
 0x1f5   : > { %v4692_v42 = vpop.permute.xlu0 %1420  ;;  %v2226_v45 = vrot.slane %v2220_v40, 5  ;;  %v2227_v60 = vrot.slane %v4788_v49, 5  ;;  %v4827_v12 = vmul.f32 %v4778_v7, %v4092_v56  ;;  %v4830_v3 = vstv %s4767_s7  ;;  %s5116_s7 = sld [smem:[#allocation5 + $0x45]] }
 0x1f6   : > { %v4701_v2 = vpop.permute.xlu1 %1359  ;;  %v1405_v36 = vadd.f32 %v4665_v5, %v1384_v47  ;;  %v1287_v43 = vadd.f32 %v4593_v31, %v1266_v46  ;;  %v4841_v31 = vmul.f32 %v4830_v3, %v4092_v56  ;;  %v2187_v15 = vrot.slane %v2180_v28, 3 }
 0x1f7   : > { %2112 = vrot.lane.b32.xlu0 %v2109_v33, %s3233_s6  ;;  %v2165_v33 = vsel %vm668_vm7, %v2163_v19, %v2164_v59  ;;  %v1593_v24 = vstv %s4790_s29  ;;  %v2248_v4 = vrot.slane %v4827_v12, 6  ;;  %v4867_v44 = vstv %s4794_s17  ;;  %s5161_s29 = sld [smem:[#allocation5 + $0x53]]  ;;  %s5176_s17 = sld [smem:[#allocation5 + $0x5a]] }
 0x1f8   : > { %2051 = vrot.lane.b32.xlu1 %v2048_v30, %s3233_s6  ;;  %v2166_v30 = vrot.slane %v2159_v50, 2  ;;  %v1426_v5 = vadd.f32 %v4692_v42, %v1405_v36  ;;  %v1308_v22 = vadd.f32 %v4618_v35, %v1287_v43  ;;  %v1617_v35 = vmul.f32 %v4830_v3, %v4103_v51 }
 0x1f9   : > { %v4723_v38 = vpop.permute.xlu0 %1441  ;;  %v4885_v32 = vmul.f32 %v1593_v24, %v4103_v51  ;;  %v4888_v40 = vstv %s4815_s21  ;;  %v1651_v1 = vmul.f32 %v4867_v44, %v4103_v51  ;;  %s2965_s21 = sld [smem:[#allocation5 + $0x61]] }
 0x1fa   : > { %v4728_v16 = vpop.permute.xlu1 %1380  ;;  %v2167_v62 = vsel %vm668_vm7, %v2164_v59, %v2166_v30  ;;  %v2228_v59 = vsel %vm721_vm9, %v2226_v45, %v2227_v60  ;;  %v1322_v0 = vadd.f32 %v4642_v11, %v1308_v22  ;;  %v1624_v11 = vrot.slane %v4841_v31, 2  ;;  %v4893_v30 = vld [vmem:[#allocation4 + $0x20] sm:$0xff] }
 0x1fb   : > { %2126 = vrot.lane.b32.xlu0 %v2122_v18, %s3234_s19  ;;  %v4821_v18 = vstv %s4756_s28  ;;  %v2201_v45 = vmul.f32 %v4736_v34, %v4217_v37  ;;  %v2222_v34 = vmul.f32 %v4764_v6, %v4217_v37  ;;  %s5105_s28 = sld [smem:[#allocation5 + $0x37]] }
 0x1fc   : > { %2072 = vrot.lane.b32.xlu1 %v2069_v54, %s3233_s6  ;;  %v2247_v54 = vrot.slane %v2241_v8, 6  ;;  %v4837_v61 = vmul.f32 %v4821_v18, %v4092_v56  ;;  %v1600_v42 = vmul.f32 %v4821_v18, %v4103_v51 }
 0x1fd   : > { %v4759_v21 = vpop.permute.xlu0 %1455 }
 0x1fe   : > { %v4770_v26 = vpop.permute.xlu1 %1401  ;;  %v1607_v39 = vrot.slane %v4837_v61, 1 }
 0x1ff   : > { %2147 = vrot.lane.b32.xlu0 %v2144_v57, %s3234_s19  ;;  %v4848_v57 = vstv %s4780_s27  ;;  %s5139_s27 = sld [smem:[#allocation5 + $0x4c]] }
 0x200   : > { %2093 = vrot.lane.b32.xlu1 %v2090_v20, %s3233_s6  ;;  %v1447_v20 = vadd.f32 %v4723_v38, %v1426_v5  ;;  %v4864_v38 = vmul.f32 %v4848_v57, %v4092_v56  ;;  %v1634_v29 = vmul.f32 %v4848_v57, %v4103_v51  ;;  %v1343_v56 = vadd.f32 %v4669_v55, %v1322_v0 }
 0x201   : > { %v1477_v58 = vpop.permute.xlu0 %1476  ;;  %v4897_v55 = vmul.f32 %v4893_v30, %v4867_v44  ;;  %v2188_v51 = vsel %vm686_vm8, %v2185_v17, %v2187_v15  ;;  %v1668_v17 = vmul.f32 %v4919_v9, %v4888_v40 }
 0x202   : > { %v4797_v63 = vpop.permute.xlu1 %1422  ;;  %v1364_v47 = vadd.f32 %v4701_v2, %v1343_v56 }
 0x203   : > { %2168 = vrot.lane.b32.xlu0 %v2165_v33, %s3234_s19  ;;  %v1623_v33 = vrot.slane %v1617_v35, 2  ;;  %v1658_v5 = vrot.slane %v4897_v55, 4 }
 0x204   : > { %2114 = vrot.lane.b32.xlu1 %v2111_v25, %s3233_s6  ;;  %s4850_s6 = sld [smem:[#allocation5 + $0x5b]]  ;;  %v1385_v28 = vadd.f32 %v4728_v16, %v1364_v47  ;;  %v4932_v16 = vmul.f32 %v4893_v30, %v4888_v40  ;;  %v2229_v47 = vrot.slane %v2222_v34, 5 }
 0x205   : > { %v1498_v19 = vpop.permute.xlu0 %1497  ;;  %v4915_v2 = vsel %vm668_vm7, %v1623_v33, %v1624_v11 }
 0x206   : > { %v4833_v48 = vpop.permute.xlu1 %1443  ;;  %v1675_v56 = vrot.slane %v4932_v16, 5 }
 0x207   : > { %2189 = vrot.lane.b32.xlu0 %v2186_v41, %s3234_s19  ;;  %v1641_v41 = vrot.slane %v4864_v38, 3 }
 0x208   : > { %2128 = vrot.lane.b32.xlu1 %v2123_v52, %s3234_s19  ;;  %v1461_v52 = vadd.f32 %v4759_v21, %v1447_v20  ;;  %v1606_v21 = vrot.slane %v1600_v42, 1  ;;  %v4941_v42 = vstv %s4869_s4  ;;  %s3237_s4 = smov 16  }
 0x209   : > { %v1519_v50 = vpop.permute.xlu0 %1518  ;;  %v4952_v35 = vmul.f32 %v4893_v30, %v4941_v42 }
 0x20a   : > { %v4872_v14 = vpop.permute.xlu1 %1457  ;;  %v1482_v10 = vadd.f32 %v1477_v58, %v1461_v52  ;;  %v2249_v58 = vsel %vm739_vm10, %v2247_v54, %v2248_v4  ;;  %v4924_v36 = vstv %s4850_s6  ;;  %v1406_v54 = vadd.f32 %v4770_v26, %v1385_v28 }
 0x20b   : > { %2210 = vrot.lane.b32.xlu0 %v2207_v13, %s3234_s19  ;;  %v1608_v13 = vsel %vm650_vm6, %v1606_v21, %v1607_v39  ;;  %v1685_v26 = vmul.f32 %v4919_v9, %v4924_v36  ;;  %v4958_v6 = vmul.f32 %v4893_v30, %v4924_v36  ;;  %v2208_v52 = vrot.slane %v2201_v45, 4 }
 0x20c   : > { %2149 = vrot.lane.b32.xlu1 %v2146_v53, %s3234_s19  ;;  %v1503_v8 = vadd.f32 %v1498_v19, %v1482_v10  ;;  %v1640_v53 = vrot.slane %v1634_v29, 3  ;;  %v1657_v19 = vrot.slane %v1651_v1, 4  ;;  %v1427_v0 = vadd.f32 %v4797_v63, %v1406_v54 }
 0x20d   : > { %v1540_v25 = vpop.permute.xlu0 %1539  ;;  %v2276_v21 = vmul.f32 %v4919_v9, %v4941_v42  ;;  %v4965_v10 = vstv %s4899_s5  ;;  %v1692_v54 = vrot.slane %v4958_v6, 6  ;;  %s3239_s5 = smov 64  }
 0x20e   : > { %v1479_v46 = vpop.permute.xlu1 %1478  ;;  %v1524_v43 = vadd.f32 %v1519_v50, %v1503_v8  ;;  %v4938_v15 = vsel %vm686_vm8, %v1640_v53, %v1641_v41  ;;  %v1674_v50 = vrot.slane %v1668_v17, 5  ;;  %v1448_v63 = vadd.f32 %v4833_v48, %v1427_v0 }
 0x20f   : > { %2231 = vrot.lane.b32.xlu0 %v2228_v59, %s3234_s19  ;;  %v2261_v59 = vstv %s4878_s30  ;;  %v2283_v48 = vrot.slane %v4952_v35, 1  ;;  %v2209_v17 = vsel %vm192_vm0, %v2206_v23, %v2208_v52  ;;  %v2297_v45 = vmul.f32 %v4919_v9, %v4965_v10  ;;  %s3238_s30 = smov 32  }
 0x210   : > { %2170 = vrot.lane.b32.xlu1 %v2167_v62, %s3234_s19  ;;  %v1545_v62 = vadd.f32 %v1540_v25, %v1524_v43  ;;  %v2262_v1 = vmul.f32 %v4919_v9, %v2261_v59  ;;  %v4973_v25 = vmul.f32 %v4893_v30, %v4965_v10  ;;  %v1462_v28 = vadd.f32 %v4872_v14, %v1448_v63 }
 0x211   : > { %v1561_v22 = vpop.permute.xlu0 %1560  ;;  %v2243_v43 = vmul.f32 %v4778_v7, %v4217_v37  ;;  %v2230_v23 = vsel %vm721_vm9, %v2227_v60, %v2229_v47  ;;  %v5003_v7 = vstv %s4945_s3  ;;  %v5039_v47 = vstv %s4975_s25  ;;  %s3240_s3 = smov 48   ;;  %s3241_s25 = smov 80  }
 0x212   : > { %v1500_v20 = vpop.permute.xlu1 %1499  ;;  %v1566_v29 = vadd.f32 %v1561_v22, %v1545_v62  ;;  %v2282_v22 = vrot.slane %v2276_v21, 1  ;;  %v1483_v27 = vadd.f32 %v1479_v46, %v1462_v28  ;;  %v2304_v37 = vrot.slane %v4973_v25, 2  ;;  %v5010_v46 = vld [vmem:[#allocation4 + $0x28] sm:$0x3f] }
 0x213   : > { %2252 = vrot.lane.b32.xlu0 %v2249_v58, %s3234_s19  ;;  %v1659_v58 = vsel %vm192_vm0, %v1657_v19, %v1658_v5  ;;  %v1676_v19 = vsel %vm721_vm9, %v1674_v50, %v1675_v56  ;;  %v1602_v49 = vmul.f32 %v5010_v46, %v4821_v18  ;;  %v5016_v60 = vmul.f32 %v4893_v30, %v5003_v7 }
 0x214   : > { %2191 = vrot.lane.b32.xlu1 %v2188_v51, %s3234_s19  ;;  %v1691_v51 = vrot.slane %v1685_v26, 6  ;;  %v1504_v0 = vadd.f32 %v1500_v20, %v1483_v27  ;;  %v2303_v50 = vrot.slane %v2297_v45, 2  ;;  %v1619_v52 = vmul.f32 %v5010_v46, %v4830_v3 }
 0x215   : > { %v1582_v33 = vpop.permute.xlu0 %1581  ;;  %v1595_v18 = vmul.f32 %v4893_v30, %v1593_v24  ;;  %v2318_v20 = vmul.f32 %v4919_v9, %v5003_v7  ;;  %v2341_v38 = vmul.f32 %v5010_v46, %v5039_v47 }
 0x216   : > { %v1587_v8 = vadd.f32 %v1582_v33, %v1566_v29  ;;  %v1521_v53 = vpop.permute.xlu1 %1520  ;;  %v1693_v29 = vsel %vm739_vm10, %v1691_v51, %v1692_v54  ;;  %v2305_v3 = vsel %vm668_vm7, %v2303_v50, %v2304_v37  ;;  %v1609_v51 = vrot.slane %v1602_v49, 1 }
 0x217   : > { %2266 = vrot.lane.b32.xlu0 %v2262_v1, %s5565_s16  ;;  %v1525_v63 = vadd.f32 %v1521_v53, %v1504_v0  ;;  %v5036_v1 = vmul.f32 %v5010_v46, %v4848_v57  ;;  %v5047_v53 = vmul.f32 %v4893_v30, %v5039_v47  ;;  %v1670_v0 = vmul.f32 %v5010_v46, %v4888_v40 }
 0x218   : > { %v1596_v14 = vadd.f32 %v4885_v32, %v1587_v8  ;;  %2212 = vrot.lane.b32.xlu1 %v2209_v17, %s3234_s19  ;;  %v2284_v32 = vsel %vm650_vm6, %v2282_v22, %v2283_v48  ;;  %v2325_v8 = vrot.slane %v5016_v60, 3  ;;  %v1626_v17 = vrot.slane %v1619_v52, 2 }
 0x219   : > { %v4996_v34 = vpop.permute.xlu0 %1706  ;;  %v2339_v22 = vmul.f32 %v4919_v9, %v5039_v47  ;;  %v1643_v12 = vrot.slane %v5036_v1, 3  ;;  %v1610_v40 = vsel %vm650_vm6, %v1607_v39, %v1609_v51  ;;  %v2320_v1 = vmul.f32 %v5010_v46, %v5003_v7 }
 0x21a   : > { %v1613_v62 = vadd.f32 %v1608_v13, %v1596_v14  ;;  %v1542_v26 = vpop.permute.xlu1 %1541  ;;  %v2250_v13 = vrot.slane %v2243_v43, 6  ;;  %v1653_v43 = vmul.f32 %v5010_v46, %v4867_v44  ;;  %v2324_v14 = vrot.slane %v2318_v20, 3 }
 0x21b   : > { %2287 = vrot.lane.b32.xlu0 %v2284_v32, %s5565_s16  ;;  %v1546_v28 = vadd.f32 %v1542_v26, %v1525_v63  ;;  %v2346_v44 = vrot.slane %v5047_v53, 4  ;;  %v2345_v52 = vrot.slane %v2339_v22, 4  ;;  %v1627_v63 = vsel %vm668_vm7, %v1624_v11, %v1626_v17 }
 0x21c   : > { %v1630_v21 = vadd.f32 %v4915_v2, %v1613_v62  ;;  %2233 = vrot.lane.b32.xlu1 %v2230_v23, %s3234_s19  ;;  %v2251_v57 = vsel %vm739_vm10, %v2248_v4, %v2250_v13  ;;  %v2263_v4 = vmul.f32 %v4893_v30, %v2261_v59  ;;  %v5065_v62 = vstv %s5005_s8  ;;  %s3243_s8 = smov 112  }
 0x21d   : > { %v1728_v33 = vpop.permute.xlu0 %1727  ;;  %v2326_v26 = vsel %vm686_vm8, %v2324_v14, %v2325_v8  ;;  %v5073_v32 = vmul.f32 %v4893_v30, %v5065_v62  ;;  %v1687_v13 = vmul.f32 %v5010_v46, %v4924_v36  ;;  %v1677_v17 = vrot.slane %v1670_v0, 5 }
 0x21e   : > { %v1647_v2 = vadd.f32 %v4938_v15, %v1630_v21  ;;  %v1563_v24 = vpop.permute.xlu1 %1562  ;;  %v2278_v15 = vmul.f32 %v5010_v46, %v4941_v42  ;;  %v2360_v21 = vmul.f32 %v4919_v9, %v5065_v62  ;;  %v2327_v22 = vrot.slane %v2320_v1, 3 }
 0x21f   : > { %2308 = vrot.lane.b32.xlu0 %v2305_v3, %s5565_s16  ;;  %v1567_v27 = vadd.f32 %v1563_v24, %v1546_v28  ;;  %v2367_v61 = vrot.slane %v5073_v32, 5  ;;  %v1660_v24 = vrot.slane %v1653_v43, 4  ;;  %v1678_v25 = vsel %vm721_vm9, %v1675_v56, %v1677_v17 }
 0x220   : > { %v1664_v45 = vadd.f32 %v1659_v58, %v1647_v2  ;;  %2254 = vrot.lane.b32.xlu1 %v2251_v57, %s3234_s19  ;;  %v2285_v59 = vrot.slane %v2278_v15, 1  ;;  %s5094_s19 = sld [smem:[#allocation5 + $0x3e]]  ;;  %v2366_v51 = vrot.slane %v2360_v21, 5  ;;  %v2328_v16 = vsel %vm686_vm8, %v2325_v8, %v2327_v22 }
 0x221   : > { %v1749_v23 = vpop.permute.xlu0 %1748  ;;  %v2348_v56 = vrot.slane %v2341_v38, 4  ;;  %v2362_v0 = vmul.f32 %v5010_v46, %v5065_v62  ;;  %v2436_v60 = vstv %s5116_s7 }
 0x222   : > { %v1681_v42 = vadd.f32 %v1676_v19, %v1664_v45  ;;  %v1584_v58 = vpop.permute.xlu1 %1583  ;;  %v2299_v19 = vmul.f32 %v5010_v46, %v4965_v10  ;;  %v2286_v11 = vsel %vm650_vm6, %v2283_v48, %v2285_v59  ;;  %v1644_v48 = vsel %vm686_vm8, %v1641_v41, %v1643_v12 }
 0x223   : > { %v1588_v49 = vadd.f32 %v1584_v58, %v1567_v27  ;;  %2329 = vrot.lane.b32.xlu0 %v2326_v26, %s5565_s16  ;;  %v2368_v7 = vsel %vm721_vm9, %v2366_v51, %v2367_v61  ;;  %v1661_v41 = vsel %vm192_vm0, %v1658_v5, %v1660_v24  ;;  %v1694_v27 = vrot.slane %v1687_v13, 6 }
 0x224   : > { %v1698_v50 = vadd.f32 %v1693_v29, %v1681_v42  ;;  %2268 = vrot.lane.b32.xlu1 %v2263_v4, %s5565_s16  ;;  %v5092_v29 = vstv %s5041_s24  ;;  %v2401_v5 = vstv %s5105_s28  ;;  %v5165_v6 = vmul.f32 %v4893_v30, %v2436_v60  ;;  %s2974_s24 = sshll.u32 %s3208_s12, 5  ;;  %s2734_s12 = scalar_lea.sflag [#allocation7], %s3425_s18 }
 0x225   : > { %v1597_v20 = vadd.f32 %v1595_v18, %v1588_v49  ;;  %v1770_v10 = vpop.permute.xlu0 %1769  ;;  %v2347_v18 = vsel %vm192_vm0, %v2345_v52, %v2346_v44  ;;  %v5103_v39 = vmul.f32 %v4893_v30, %v5092_v29  ;;  %v2381_v28 = vmul.f32 %v4919_v9, %v5092_v29 }
 0x226   : > { %v1712_v36 = vadd.f32 %v4996_v34, %v1698_v50  ;;  %v1709_v3 = vpop.permute.xlu1 %1708  ;;  %v2306_v34 = vrot.slane %v2299_v19, 2  ;;  %v2415_v42 = vstv %s5094_s19  ;;  %v1695_v59 = vsel %vm739_vm10, %v1692_v54, %v1694_v27 }
 0x227   : > { %v1614_v31 = vadd.f32 %v1610_v40, %v1597_v20  ;;  %2350 = vrot.lane.b32.xlu0 %v2347_v18, %s5565_s16  ;;  %v2387_v12 = vrot.slane %v2381_v28, 6  ;;  %v5146_v26 = vmul.f32 %v4893_v30, %v2415_v42  ;;  %v2416_v50 = vmul.f32 %v4919_v9, %v2415_v42 }
 0x228   : > { %v1733_v2 = vadd.f32 %v1728_v33, %v1712_v36  ;;  %2289 = vrot.lane.b32.xlu1 %v2286_v11, %s5565_s16  ;;  %v2388_v33 = vrot.slane %v5103_v39, 6  ;;  %v2307_v14 = vsel %vm668_vm7, %v2304_v37, %v2306_v34  ;;  %v2402_v21 = vmul.f32 %v4919_v9, %v2401_v5 }
 0x229   : > { %v1631_v57 = vadd.f32 %v1627_v63, %v1614_v31  ;;  %v1791_v15 = vpop.permute.xlu0 %1790  ;;  %v2423_v62 = vrot.slane %v5146_v26, 1  ;;  %v2349_v40 = vsel %vm192_vm0, %v2346_v44, %v2348_v56  ;;  %v2369_v63 = vrot.slane %v2362_v0, 5 }
 0x22a   : > { %v1754_v35 = vadd.f32 %v1749_v23, %v1733_v2  ;;  %v1730_v45 = vpop.permute.xlu1 %1729  ;;  %v2389_v55 = vsel %vm739_vm10, %v2387_v12, %v2388_v33  ;;  %v2422_v36 = vrot.slane %v2416_v50, 1  ;;  %v2437_v18 = vmul.f32 %v4919_v9, %v2436_v60 }
 0x22b   : > { %v1648_v43 = vadd.f32 %v1644_v48, %v1631_v57  ;;  %2371 = vrot.lane.b32.xlu0 %v2368_v7, %s5565_s16  ;;  %v2457_v34 = vstv %s5139_s27  ;;  %v2444_v44 = vrot.slane %v5165_v6, 2  ;;  %v2370_v24 = vsel %vm721_vm9, %v2367_v61, %v2369_v63  ;;  %s5444_s27 = scalar_lea.hbm %s5496_s2, %s2974_s24 }
 0x22c   : > { %v1775_v23 = vadd.f32 %v1770_v10, %v1754_v35  ;;  %2310 = vrot.lane.b32.xlu1 %v2307_v14, %s5565_s16  ;;  %v2383_v10 = vmul.f32 %v5010_v46, %v5092_v29  ;;  %v2424_v53 = vsel %vm650_vm6, %v2422_v36, %v2423_v62  ;;  %v5183_v29 = vmul.f32 %v4893_v30, %v2457_v34 }
 0x22d   : > { %v1665_v4 = vadd.f32 %v1661_v41, %v1648_v43  ;;  %v1812_v37 = vpop.permute.xlu0 %1811  ;;  %v2443_v28 = vrot.slane %v2437_v18, 2  ;;  %v2458_v57 = vmul.f32 %v4919_v9, %v2457_v34  ;;  %v2478_v35 = vstv %s5161_s29 }
 0x22e   : > { %v1796_v58 = vadd.f32 %v1791_v15, %v1775_v23  ;;  %v1751_v47 = vpop.permute.xlu1 %1750  ;;  %v2390_v51 = vrot.slane %v2383_v10, 6  ;;  %v2465_v43 = vrot.slane %v5183_v29, 3  ;;  %v2480_v32 = vmul.f32 %v4893_v30, %v2478_v35 }
 0x22f   : > { %v1682_v49 = vadd.f32 %v1678_v25, %v1665_v4  ;;  %2392 = vrot.lane.b32.xlu0 %v2389_v55, %s5565_s16  ;;  %v2445_v7 = vsel %vm668_vm7, %v2443_v28, %v2444_v44  ;;  %v2418_v22 = vmul.f32 %v5010_v46, %v2415_v42  ;;  %v2464_v38 = vrot.slane %v2458_v57, 3 }
 0x230   : > { %v1817_v19 = vadd.f32 %v1812_v37, %v1796_v58  ;;  %2331 = vrot.lane.b32.xlu1 %v2328_v16, %s5565_s16  ;;  %v2391_v14 = vsel %vm739_vm10, %v2388_v33, %v2390_v51  ;;  %v2479_v41 = vmul.f32 %v4919_v9, %v2478_v35  ;;  %v2403_v12 = vmul.f32 %v4893_v30, %v2401_v5 }
 0x231   : > { %v1699_v13 = vadd.f32 %v1695_v59, %v1682_v49  ;;  %v1833_v52 = vpop.permute.xlu0 %1832  ;;  %v2499_v4 = vstv %s5176_s17  ;;  %v2466_v58 = vsel %vm686_vm8, %v2464_v38, %v2465_v43  ;;  %v2486_v39 = vrot.slane %v2480_v32, 4  ;;  %s3244_s17 = smov [#allocation10]  }
 0x232   : > { %v1838_v8 = vadd.f32 %v1833_v52, %v1817_v19  ;;  %v1772_v20 = vpop.permute.xlu1 %1771  ;;  %v2501_v33 = vmul.f32 %v4893_v30, %v2499_v4  ;;  %v2425_v42 = vrot.slane %v2418_v22, 1  ;;  %v2439_v55 = vmul.f32 %v5010_v46, %v2436_v60 }
 0x233   : > { %v1713_v54 = vadd.f32 %v1709_v3, %v1699_v13  ;;  %2406 = vrot.lane.b32.xlu0 %v2402_v21, %s3236_s23  ;;  %v2485_v49 = vrot.slane %v2479_v41, 4  ;;  %v2500_v5 = vmul.f32 %v4919_v9, %v2499_v4  ;;  %v2520_v56 = vstv %s2965_s21  ;;  %s3134_s21 = sshll.u32 %s3244_s17, 4  ;;  %s3135_s21 = int_to_ptr.vmem [resolvable:$false] %s3134_s21 }
 0x234   : > { %2352 = vrot.lane.b32.xlu1 %v2349_v40, %s5565_s16  ;;  %v2507_v19 = vrot.slane %v2501_v33, 5  ;;  %v2522_v50 = vmul.f32 %v4893_v30, %v2520_v56  ;;  %v2426_v52 = vsel %vm650_vm6, %v2423_v62, %v2425_v42  ;;  %v2446_v21 = vrot.slane %v2439_v55, 2 }
 0x235   : > { %v1734_v31 = vadd.f32 %v1730_v45, %v1713_v54  ;;  %v1847_v11 = vpop.permute.xlu0 %1846  ;;  %v2487_v59 = vsel %vm192_vm0, %v2485_v49, %v2486_v39  ;;  %v2460_v60 = vmul.f32 %v5010_v46, %v2457_v34  ;;  %v2481_v62 = vmul.f32 %v5010_v46, %v2478_v35 }
 0x236   : > { %v1852_v3 = vadd.f32 %v1847_v11, %v1838_v8  ;;  %v1793_v1 = vpop.permute.xlu1 %1792  ;;  %v2506_v8 = vrot.slane %v2500_v5, 5  ;;  %v2528_v30 = vrot.slane %v2522_v50, 6  ;;  %v2447_v26 = vsel %vm668_vm7, %v2444_v44, %v2446_v21 }
 0x237   : > { %v1755_v2 = vadd.f32 %v1751_v47, %v1734_v31  ;;  %2427 = vrot.lane.b32.xlu0 %v2424_v53, %s3236_s23  ;;  %v2467_v10 = vrot.slane %v2460_v60, 3 }
 0x238   : > { %2373 = vrot.lane.b32.xlu1 %v2370_v24, %s5565_s16  ;;  %v2508_v40 = vsel %vm721_vm9, %v2506_v8, %v2507_v19  ;;  %v2523_v24 = vmul.f32 %v5010_v46, %v2520_v56 }
 0x239   : > { %v1776_v17 = vadd.f32 %v1772_v20, %v1755_v2  ;;  %v1868_v15 = vpop.permute.xlu0 %1867  ;;  %v2521_v20 = vmul.f32 %v4919_v9, %v2520_v56  ;;  %v2468_v34 = vsel %vm686_vm8, %v2465_v43, %v2467_v10 }
 0x23a   : > { %v1873_v48 = vadd.f32 %v1868_v15, %v1852_v3  ;;  %v1814_v45 = vpop.permute.xlu1 %1813  ;;  %v2488_v3 = vrot.slane %v2481_v62, 4 }
 0x23b   : > { %v1797_v61 = vadd.f32 %v1793_v1, %v1776_v17  ;;  %2448 = vrot.lane.b32.xlu0 %v2445_v7, %s3236_s23  ;;  %v2527_v36 = vrot.slane %v2521_v20, 6  ;;  %v2502_v1 = vmul.f32 %v5010_v46, %v2499_v4  ;;  %v2530_v17 = vrot.slane %v2523_v24, 6 }
 0x23c   : > { %2394 = vrot.lane.b32.xlu1 %v2391_v14, %s5565_s16  ;;  %v2489_v29 = vsel %vm192_vm0, %v2486_v39, %v2488_v3  ;;  %s3242_s16 = smov 96  }
 0x23d   : > { %v1818_v27 = vadd.f32 %v1814_v45, %v1797_v61  ;;  %v1889_v23 = vpop.permute.xlu0 %1888  ;;  %v2529_v9 = vsel %vm739_vm10, %v2527_v36, %v2528_v30  ;;  %v2509_v2 = vrot.slane %v2502_v1, 5 }
 0x23e   : > { %v5204_v25 = vadd.f32 %v1889_v23, %v1873_v48  ;;  %v1835_v37 = vpop.permute.xlu1 %1834  ;;  %v2531_v48 = vsel %vm739_vm10, %v2528_v30, %v2530_v17 }
 0x23f   : > { %v1839_v47 = vadd.f32 %v1835_v37, %v1818_v27  ;;  %2469 = vrot.lane.b32.xlu0 %v2466_v58, %s3236_s23  ;;  %v2510_v57 = vsel %vm721_vm9, %v2507_v19, %v2509_v2 }
 0x240   : > { %2408 = vrot.lane.b32.xlu1 %v2403_v12, %s3236_s23 }
 0x241   : > { %v5212_v16 = vpop.permute.xlu0 %1909 }
 0x242   : > { %v1849_v0 = vpop.permute.xlu1 %1848  ;;  %v1915_v55 = vadd.f32 %v5212_v16, %v5204_v25 }
 0x243   : > { %v1853_v13 = vadd.f32 %v1849_v0, %v1839_v47  ;;  %2490 = vrot.lane.b32.xlu0 %v2487_v59, %s3236_s23 }
 0x244   : > { %2429 = vrot.lane.b32.xlu1 %v2426_v52, %s3236_s23 }
 0x245   : > { %v1931_v6 = vpop.permute.xlu0 %1930 }
 0x246   : > { %v1870_v54 = vpop.permute.xlu1 %1869  ;;  %v1936_v5 = vadd.f32 %v1931_v6, %v1915_v55 }
 0x247   : > { %v1874_v63 = vadd.f32 %v1870_v54, %v1853_v13  ;;  %2511 = vrot.lane.b32.xlu0 %v2508_v40, %s3236_s23 }
 0x248   : > { %2450 = vrot.lane.b32.xlu1 %v2447_v26, %s3236_s23 }
 0x249   : > { %v1952_v18 = vpop.permute.xlu0 %1951 }
 0x24a   : > { %v1891_v31 = vpop.permute.xlu1 %1890  ;;  %v1957_v0 = vadd.f32 %v1952_v18, %v1936_v5 }
 0x24b   : > { %v1895_v11 = vadd.f32 %v1891_v31, %v1874_v63  ;;  %2532 = vrot.lane.b32.xlu0 %v2529_v9, %s3236_s23 }
 0x24c   : > { %2471 = vrot.lane.b32.xlu1 %v2468_v34, %s3236_s23 }
 0x24d   : > { %v1973_v53 = vpop.permute.xlu0 %1972 }
 0x24e   : > { %v1912_v44 = vpop.permute.xlu1 %1911  ;;  %v1978_v19 = vadd.f32 %v1973_v53, %v1957_v0 }
 0x24f   : > { %v1916_v20 = vadd.f32 %v1912_v44, %v1895_v11 }
 0x250   : > { %2492 = vrot.lane.b32.xlu1 %v2489_v29, %s3236_s23 }
 0x251   : > { %v1987_v51 = vpop.permute.xlu0 %1986 }
 0x252   : > { %v1933_v28 = vpop.permute.xlu1 %1932  ;;  %v1992_v13 = vadd.f32 %v1987_v51, %v1978_v19 }
 0x253   : > { %v1937_v63 = vadd.f32 %v1933_v28, %v1916_v20 }
 0x254   : > { %2513 = vrot.lane.b32.xlu1 %v2510_v57, %s3236_s23 }
 0x255   : > { %v2008_v15 = vpop.permute.xlu0 %2007 }
 0x256   : > { %v1954_v35 = vpop.permute.xlu1 %1953  ;;  %v2013_v21 = vadd.f32 %v2008_v15, %v1992_v13 }
 0x257   : > { %v1958_v10 = vadd.f32 %v1954_v35, %v1937_v63 }
 0x258   : > { %2534 = vrot.lane.b32.xlu1 %v2531_v48, %s3236_s23  ;;  %s2852_s23 = sshll.u32 %s3425_s18, 1 }
 0x259   : > { %v2029_v45 = vpop.permute.xlu0 %2028  ;;  %s5249_s6 = scalar_lea.vmem [#allocation10], %s2852_s23  ;;  %s3136_s23 = scalar_lea.vmem %s3135_s21, 64 }
 0x25a   : > { %v1975_v7 = vpop.permute.xlu1 %1974  ;;  %v2034_v8 = vadd.f32 %v2029_v45, %v2013_v21  ;;  %s2748_s19 = sshll.u32 %s5249_s6, 4  ;;  %s5446_s19 = int_to_ptr.vmem [resolvable:$true] %s2748_s19 }
 0x25b   : > { %v1979_v62 = vadd.f32 %v1975_v7, %v1958_v10  ;;  %s3130_s29 = scalar_lea.vmem %s5446_s19, 32  ;;  %p3137_p0 = scmp.lt.s32.totalorder %s5446_s19, %s3135_s21 }
 0x25c   : > { %p3131_p4 = scmp.ne.s32.totalorder %s5446_s19, %s3130_s29  ;;  %p3138_p3 = scmp.lt.s32.totalorder %s3136_s23, %s3130_s29 }
 0x25d   : > { %v2050_v43 = vpop.permute.xlu0 %2049 }
 0x25e   : > { %v1989_v32 = vpop.permute.xlu1 %1988  ;;  %v2055_v40 = vadd.f32 %v2050_v43, %v2034_v8  ;;  %p3132_p2 = pnand %p3131_p4, %p5599_p8  ;;  %p3139_p5 = por %p3138_p3, %p3137_p0 }
 0x25f   : > { %v1993_v18 = vadd.f32 %v1989_v32, %v1979_v62 }
 0x260   : > { %p3133_p12 = pneg %p3132_p2 }
 0x261   : > { %v2071_v46 = vpop.permute.xlu0 %2070 }
 0x262   : > { %v2010_v61 = vpop.permute.xlu1 %2009  ;;  %v2076_v26 = vadd.f32 %v2071_v46, %v2055_v40  ;;  %p3140_p11 = pnand %p3139_p5, %p3133_p12 }
 0x263   : > { %v2014_v3 = vadd.f32 %v2010_v61, %v1993_v18 }
 0x265   : > { %v2092_v14 = vpop.permute.xlu0 %2091 }
 0x266   : > { %v2031_v22 = vpop.permute.xlu1 %2030  ;;  %v2097_v16 = vadd.f32 %v2092_v14, %v2076_v26 }
 0x267   : > { %v2035_v53 = vadd.f32 %v2031_v22, %v2014_v3 }
 0x269   : > { %v2113_v38 = vpop.permute.xlu0 %2112 }
 0x26a   : > { %v2052_v41 = vpop.permute.xlu1 %2051  ;;  %v2118_v36 = vadd.f32 %v2113_v38, %v2097_v16 }
 0x26b   : > { %v2056_v2 = vadd.f32 %v2052_v41, %v2035_v53 }
 0x26d   : > { %v2127_v27 = vpop.permute.xlu0 %2126 }
 0x26e   : > { %v2073_v23 = vpop.permute.xlu1 %2072  ;;  %v2132_v9 = vadd.f32 %v2127_v27, %v2118_v36 }
 0x26f   : > { %v2077_v51 = vadd.f32 %v2073_v23, %v2056_v2 }
 0x271   : > { %v2148_v12 = vpop.permute.xlu0 %2147 }
 0x272   : > { %v2094_v4 = vpop.permute.xlu1 %2093  ;;  %v2153_v1 = vadd.f32 %v2148_v12, %v2132_v9 }
 0x273   : > { %v2098_v15 = vadd.f32 %v2094_v4, %v2077_v51 }
 0x275   : > { %v2169_v37 = vpop.permute.xlu0 %2168 }
 0x276   : > { %v2115_v58 = vpop.permute.xlu1 %2114  ;;  %v2174_v11 = vadd.f32 %v2169_v37, %v2153_v1 }
 0x277   : > { %v2119_v48 = vadd.f32 %v2115_v58, %v2098_v15 }
 0x279   : > { %v2190_v39 = vpop.permute.xlu0 %2189 }
 0x27a   : > { %v2129_v33 = vpop.permute.xlu1 %2128  ;;  %v2195_v24 = vadd.f32 %v2190_v39, %v2174_v11 }
 0x27b   : > { %v2133_v32 = vadd.f32 %v2129_v33, %v2119_v48  ;;  %v5569_v48 = vld [vmem:[#allocation14_spill] sm:$0xff] }
 0x27d   : > { %v2211_v47 = vpop.permute.xlu0 %2210 }
 0x27e   : > { %v2150_v42 = vpop.permute.xlu1 %2149  ;;  %v2216_v57 = vadd.f32 %v2211_v47, %v2195_v24 }
 0x27f   : > { %v2154_v61 = vadd.f32 %v2150_v42, %v2133_v32 }
 0x281   : > { %v2232_v49 = vpop.permute.xlu0 %2231 }
 0x282   : > { %v2171_v56 = vpop.permute.xlu1 %2170  ;;  %v2237_v35 = vadd.f32 %v2232_v49, %v2216_v57  ;;  %v5566_v57 = vlaneseq }
 0x283   : > { %v2175_v27 = vadd.f32 %v2171_v56, %v2154_v61 }
 0x284   : > { %vm5244_vm11 = vcmp.lt.s32.totalorder %v5566_v57, 16  ;;  %vm5269_vm12 = vcmp.ge.s32.totalorder %v5566_v57, 16  ;;  %vm5274_vm13 = vcmp.lt.s32.totalorder %v5566_v57, 32  ;;  %vm5283_vm15 = vcmp.ge.s32.totalorder %v5566_v57, 32 }
 0x285   : > { %v2253_v59 = vpop.permute.xlu0 %2252  ;;  %vm2583_vm14 = vmand %vm5269_vm12, %vm5274_vm13  ;;  %vm5288_vm0 = vcmp.lt.s32.totalorder %v5566_v57, 48  ;;  %vm5309_vm2 = vcmp.ge.s32.totalorder %v5566_v57, 48  ;;  %vm5314_vm3 = vcmp.lt.s32.totalorder %v5566_v57, 64  ;;  %vm5319_vm4 = vcmp.ge.s32.totalorder %v5566_v57, 64 }
 0x286   : > { %v2192_v50 = vpop.permute.xlu1 %2191  ;;  %v2258_v7 = vadd.f32 %v2253_v59, %v2237_v35  ;;  %vm2591_vm1 = vmand %vm5283_vm15, %vm5288_vm0  ;;  %vm5324_vm5 = vcmp.lt.s32.totalorder %v5566_v57, 80  ;;  %vm5337_vm8 = vcmp.ge.s32.totalorder %v5566_v57, 80  ;;  %vm5342_vm9 = vcmp.lt.s32.totalorder %v5566_v57, 96 }
 0x287   : > { %v2196_v41 = vadd.f32 %v2192_v50, %v2175_v27  ;;  %vm5515_vm6 = vmand %vm5309_vm2, %vm5314_vm3  ;;  %vm5395_vm13 = vcmp.ge.s32.totalorder %v5566_v57, 112 }
 0x288   : > { %vm2621_vm7 = vmand %vm5319_vm4, %vm5324_vm5 }
 0x289   : > { %v2267_v52 = vpop.permute.xlu0 %2266  ;;  %vm2636_vm10 = vmand %vm5337_vm8, %vm5342_vm9 }
 0x28a   : > { %v2213_v60 = vpop.permute.xlu1 %2212  ;;  %v2272_v46 = vadd.f32 %v2267_v52, %v2258_v7  ;;  %vm5598_vm0 = vmand %vm5309_vm2, %vm5314_vm3 }
 0x28b   : > { %v2217_v47 = vadd.f32 %v2213_v60, %v2196_v41 }
 0x28d   : > { %v2288_v54 = vpop.permute.xlu0 %2287 }
 0x28e   : > { %v2234_v30 = vpop.permute.xlu1 %2233  ;;  %v2293_v22 = vadd.f32 %v2288_v54, %v2272_v46 }
 0x28f   : > { %v2238_v4 = vadd.f32 %v2234_v30, %v2217_v47 }
 0x291   : > { %v2309_v25 = vpop.permute.xlu0 %2308 }
 0x292   : > { %v2255_v6 = vpop.permute.xlu1 %2254  ;;  %v2314_v12 = vadd.f32 %v2309_v25, %v2293_v22 }
 0x293   : > { %v2259_v0 = vadd.f32 %v2255_v6, %v2238_v4 }
 0x295   : > { %v2330_v31 = vpop.permute.xlu0 %2329 }
 0x296   : > { %v2269_v34 = vpop.permute.xlu1 %2268  ;;  %v2335_v23 = vadd.f32 %v2330_v31, %v2314_v12 }
 0x297   : > { %v2273_v33 = vadd.f32 %v2269_v34, %v2259_v0 }
 0x299   : > { %v2351_v29 = vpop.permute.xlu0 %2350 }
 0x29a   : > { %v2290_v44 = vpop.permute.xlu1 %2289  ;;  %v2356_v55 = vadd.f32 %v2351_v29, %v2335_v23 }
 0x29b   : > { %v2294_v52 = vadd.f32 %v2290_v44, %v2273_v33 }
 0x29d   : > { %v2372_v28 = vpop.permute.xlu0 %2371 }
 0x29e   : > { %v2311_v17 = vpop.permute.xlu1 %2310  ;;  %v2377_v58 = vadd.f32 %v2372_v28, %v2356_v55 }
 0x29f   : > { %v2315_v56 = vadd.f32 %v2311_v17, %v2294_v52 }
 0x2a1   : > { %v2393_v45 = vpop.permute.xlu0 %2392 }
 0x2a2   : > { %v2332_v43 = vpop.permute.xlu1 %2331  ;;  %v2398_v59 = vadd.f32 %v2393_v45, %v2377_v58 }
 0x2a3   : > { %v2336_v54 = vadd.f32 %v2332_v43, %v2315_v56 }
 0x2a5   : > { %v2407_v14 = vpop.permute.xlu0 %2406 }
 0x2a6   : > { %v2353_v38 = vpop.permute.xlu1 %2352  ;;  %v2412_v42 = vadd.f32 %v2407_v14, %v2398_v59 }
 0x2a7   : > { %v2357_v60 = vadd.f32 %v2353_v38, %v2336_v54 }
 0x2a9   : > { %v2428_v37 = vpop.permute.xlu0 %2427 }
 0x2aa   : > { %v2374_v39 = vpop.permute.xlu1 %2373  ;;  %v2433_v21 = vadd.f32 %v2428_v37, %v2412_v42 }
 0x2ab   : > { %v2378_v10 = vadd.f32 %v2374_v39, %v2357_v60 }
 0x2ad   : > { %v2449_v49 = vpop.permute.xlu0 %2448 }
 0x2ae   : > { %v2395_v5 = vpop.permute.xlu1 %2394  ;;  %v2454_v50 = vadd.f32 %v2449_v49, %v2433_v21 }
 0x2af   : > { %v2399_v16 = vadd.f32 %v2395_v5, %v2378_v10 }
 0x2b1   : > { %v2470_v19 = vpop.permute.xlu0 %2469 }
 0x2b2   : > { %v2409_v13 = vpop.permute.xlu1 %2408  ;;  %v2475_v40 = vadd.f32 %v2470_v19, %v2454_v50 }
 0x2b3   : > { %v2413_v18 = vadd.f32 %v2409_v13, %v2399_v16 }
 0x2b5   : > { %v2491_v8 = vpop.permute.xlu0 %2490 }
 0x2b6   : > { %v2430_v20 = vpop.permute.xlu1 %2429  ;;  %v2496_v30 = vadd.f32 %v2491_v8, %v2475_v40 }
 0x2b7   : > { %v2434_v9 = vadd.f32 %v2430_v20, %v2413_v18 }
 0x2b9   : > { %v2512_v63 = vpop.permute.xlu0 %2511 }
 0x2ba   : > { %v2451_v26 = vpop.permute.xlu1 %2450  ;;  %v2517_v25 = vadd.f32 %v2512_v63, %v2496_v30 }
 0x2bb   : > { %v2455_v3 = vadd.f32 %v2451_v26, %v2434_v9 }
 0x2bd   : > { %v2533_v6 = vpop.permute.xlu0 %2532 }
 0x2be   : > { %v2538_v62 = vadd.f32 %v2533_v6, %v2517_v25  ;;  %v2472_v36 = vpop.permute.xlu1 %2471 }
 0x2bf   : > { %v2476_v1 = vadd.f32 %v2472_v36, %v2455_v3 }
 0x2c0   : > { %v2966_v31 = vmul.f32 -1.442695, %v2538_v62 }
 0x2c2   : > { %3073 = vpow2.f32 %v2966_v31  ;;  %v2493_v34 = vpop.permute.xlu1 %2492 }
 0x2c3   : > { %v2497_v29 = vadd.f32 %v2493_v34, %v2476_v1 }
 0x2c6   : > { %v2514_v53 = vpop.permute.xlu1 %2513 }
 0x2c7   : > { %v2518_v11 = vadd.f32 %v2514_v53, %v2497_v29 }
 0x2ca   : > { %v2535_v44 = vpop.permute.xlu1 %2534 }
 0x2cb   : > { %v2539_v2 = vadd.f32 %v2535_v44, %v2518_v11 }
 0x2cc   : > { %v3074_v24 = vpop.eup %3073 }
 0x2cd   : > { %v2546_v51 = vadd.f32 1.0, %v3074_v24  ;;  %v2967_v28 = vmul.f32 -1.442695, %v2539_v2 }
 0x2cf   : > { %3075 = vrcp.f32 %v2546_v51 }
 0x2d0   : > { %3077 = vpow2.f32 %v2967_v28 }
 0x2d9   : > { %v3076_v15 = vpop.eup %3075 }
 0x2da   : > { %v3078_v35 = vpop.eup %3077  ;;  %v2562_v45 = vrot.slane %v3076_v15, %v5569_v48  ;;  %2554 = vst.msk [vmem:[%s5249_s6] sm:$0x1] %vm5244_vm11, %v3076_v15  ;;  %v2601_v61 = vcombine.high %v3076_v15, %v3076_v15 }
 0x2db   : > { %v2547_v7 = vadd.f32 1.0, %v3078_v35 }
 0x2dc   : > { %v2563_v43 = vcombine.high %v2562_v45, %v2562_v45  ;;  %v2570_v46 = vrot.slane %v2562_v45, %v5569_v48  ;;  %v2608_v22 = vrot.slane %v2601_v61, %v5569_v48 }
 0x2dd   : > { %3079 = vrcp.f32 %v2547_v7 }
 0x2de   : > { %v2577_v32 = vrot.slane %v2563_v43, %v5569_v48  ;;  %v2585_v14 = vcombine.high %v2570_v46, %v2570_v46  ;;  %v2615_v38 = vrot.slane %v2608_v22, %v5569_v48  ;;  %v2623_v23 = vcombine.high %v2608_v22, %v2608_v22 }
 0x2e0   : > { %2578 = vrot.lane.b32.xlu0 %v2577_v32, %s3237_s4  ;;  %v2593_v41 = vcombine.high %v2577_v32, %v2577_v32  ;;  %v2630_v4 = vrot.slane %v2623_v23, %v5569_v48  ;;  %v2638_v5 = vcombine.high %v2615_v38, %v2615_v38 }
 0x2e2   : > { %v2646_v59 = vcombine.high %v2630_v4, %v2630_v4 }
 0x2e4   : > { %2586 = vrot.lane.b32.xlu0 %v2585_v14, %s3238_s30 }
 0x2e7   : > { %v3080_v27 = vpop.eup %3079 }
 0x2e8   : > { %2616 = vrot.lane.b32.xlu0 %v2615_v38, %s3239_s5  ;;  %v2662_v12 = vrot.slane %v3080_v27, %v5569_v48  ;;  %2654 = vst.msk [vmem:[%s5249_s6 + $0x1] sm:$0x1] %vm5244_vm11, %v3080_v27  ;;  %v2692_v55 = vcombine.high %v3080_v27, %v3080_v27  ;;  %vm5369_vm11 = vcmp.ge.s32.totalorder %v5566_v57, 96 }
 0x2ea   : > { %v2663_v37 = vcombine.high %v2662_v12, %v2662_v12  ;;  %v2670_v47 = vrot.slane %v2662_v12, %v5569_v48  ;;  %v2699_v58 = vrot.slane %v2692_v55, %v5569_v48 }
 0x2ec   : > { %2594 = vrot.lane.b32.xlu0 %v2593_v41, %s3240_s3  ;;  %v2677_v39 = vrot.slane %v2663_v37, %v5569_v48  ;;  %v2682_v49 = vcombine.high %v2670_v47, %v2670_v47  ;;  %v2706_v0 = vrot.slane %v2699_v58, %v5569_v48  ;;  %v2711_v19 = vcombine.high %v2699_v58, %v2699_v58 }
 0x2ee   : > { %2678 = vrot.lane.b32.xlu1 %v2677_v39, %s3237_s4  ;;  %v2687_v33 = vcombine.high %v2677_v39, %v2677_v39  ;;  %v2718_v42 = vrot.slane %v2711_v19, %v5569_v48  ;;  %v2723_v13 = vcombine.high %v2706_v0, %v2706_v0 }
 0x2f0   : > { %2631 = vrot.lane.b32.xlu0 %v2630_v4, %s3241_s25  ;;  %v2728_v52 = vcombine.high %v2718_v42, %v2718_v42 }
 0x2f2   : > { %2683 = vrot.lane.b32.xlu1 %v2682_v49, %s3238_s30 }
 0x2f4   : > { %2639 = vrot.lane.b32.xlu0 %v2638_v5, %s3242_s16 }
 0x2f6   : > { %2707 = vrot.lane.b32.xlu1 %v2706_v0, %s3239_s5 }
 0x2f8   : > { %2647 = vrot.lane.b32.xlu0 %v2646_v59, %s3243_s8 }
 0x2fa   : > { %2688 = vrot.lane.b32.xlu1 %v2687_v33, %s3240_s3 }
 0x2fe   : > { %2719 = vrot.lane.b32.xlu1 %v2718_v42, %s3241_s25 }
 0x302   : > { %2724 = vrot.lane.b32.xlu1 %v2723_v13, %s3242_s16 }
 0x306   : > { %2729 = vrot.lane.b32.xlu1 %v2728_v52, %s3243_s8 }
 0x352   : > { %v2579_v20 = vpop.permute.xlu0 %2578 }
 0x353   : > { %2584 = vst.msk [vmem:[%s5249_s6] sm:$0x1] %vm2583_vm14, %v2579_v20 }
 0x356   : > { %v2587_v54 = vpop.permute.xlu0 %2586 }
 0x357   : > { %2592 = vst.msk [vmem:[%s5249_s6] sm:$0x1] %vm2591_vm1, %v2587_v54 }
 0x35a   : > { %v2617_v63 = vpop.permute.xlu0 %2616 }
 0x35e   : > { %v2595_v16 = vpop.permute.xlu0 %2594 }
 0x35f   : > { %2600 = vst.msk [vmem:[%s5249_s6] sm:$0x1] %vm5515_vm6, %v2595_v16  ;;  %vm5374_vm6 = vcmp.lt.s32.totalorder %v5566_v57, 112 }
 0x360   : > { %v2679_v6 = vpop.permute.xlu1 %2678  ;;  %2622 = vst.msk [vmem:[%s5249_s6] sm:$0x1] %vm2621_vm7, %v2617_v63  ;;  %vm2644_vm12 = vmand %vm5369_vm11, %vm5374_vm6 }
 0x361   : > { %2681 = vst.msk [vmem:[%s5249_s6 + $0x1] sm:$0x1] %vm2583_vm14, %v2679_v6  ;;  %vm5400_vm14 = vcmp.lt.s32.totalorder %v5566_v57, 128 }
 0x362   : > { %v2632_v18 = vpop.permute.xlu0 %2631  ;;  %vm2652_vm15 = vmand %vm5395_vm13, %vm5400_vm14 }
 0x363   : > { %2637 = vst.msk [vmem:[%s5249_s6] sm:$0x1] %vm2636_vm10, %v2632_v18 }
 0x364   : > { %v2684_v31 = vpop.permute.xlu1 %2683 }
 0x365   : > { %2686 = vst.msk [vmem:[%s5249_s6 + $0x1] sm:$0x1] %vm2591_vm1, %v2684_v31 }
 0x366   : > { %v2640_v3 = vpop.permute.xlu0 %2639 }
 0x367   : > { %2645 = vst.msk [vmem:[%s5249_s6] sm:$0x1] %vm2644_vm12, %v2640_v3 }
 0x368   : > { %v2708_v1 = vpop.permute.xlu1 %2707 }
 0x36a   : > { %v2648_v53 = vpop.permute.xlu0 %2647 }
 0x36b   : > { %2653 = vst.msk [vmem:[%s5249_s6] sm:$0x1] %vm2652_vm15, %v2648_v53 }
 0x36c   : > { %v2689_v29 = vpop.permute.xlu1 %2688 }
 0x36d   : > { %2691 = vst.msk [vmem:[%s5249_s6 + $0x1] sm:$0x1] %vm5598_vm0, %v2689_v29 }
 0x36e   : > { %2710 = vst.msk [vmem:[%s5249_s6 + $0x1] sm:$0x1] %vm2621_vm7, %v2708_v1 }
 0x370   : > { %v2720_v11 = vpop.permute.xlu1 %2719 }
 0x371   : > { %2722 = vst.msk [vmem:[%s5249_s6 + $0x1] sm:$0x1] %vm2636_vm10, %v2720_v11 }
 0x374   : > { %v2725_v44 = vpop.permute.xlu1 %2724 }
 0x375   : > { %2727 = vst.msk [vmem:[%s5249_s6 + $0x1] sm:$0x1] %vm2644_vm12, %v2725_v44 }
 0x378   : > { %v2730_v2 = vpop.permute.xlu1 %2729 }
 0x379   : > { %2732 = vst.msk [vmem:[%s5249_s6 + $0x1] sm:$0x1] %vm2652_vm15, %v2730_v2 }
 0x37a   : > { %3143 = shalt.err (!%p3140_p11)
}
 0x37b   : > { %s3144_s18 = scalar_lea.hbm %s5444_s27, 32  ;;  %s3148_s30 = scalar_lea.hbm %s5496_s2, 64 }
 0x37c   : > { %p3145_p13 = scmp.ne.s32.totalorder %s5444_s27, %s3144_s18  ;;  %p3149_p6 = scmp.lt.u32.totalorder %s5444_s27, %s5496_s2 }
 0x37d   : > { %p3150_p9 = scmp.lt.u32.totalorder %s3148_s30, %s3144_s18  ;;  %p3152_p4 = scmp.lt.u32.totalorder %s3144_s18, %s5444_s27 }
 0x37e   : > { %p3146_p7 = pnand %p3145_p13, %p5599_p8 }
 0x37f   : > { %p3151_p1 = por %p3150_p9, %p3149_p6 }
 0x380   : > { %p3147_p10 = pneg %p3146_p7 }
 0x381   : > { %p3153_p2 = por %p3152_p4, %p3151_p1 }
 0x383   : > { %p3154_p12 = pnand %p3153_p2, %p3147_p10 }
 0x385   : > { %3157 = shalt.err (!%p3154_p12)
}
 0x386   : > { %2981 = dma.vmem_to_hbm [thread:$0]  (%p5599_p8), %s5446_s19, 32, %s5444_s27, %s2734_s12  }
 0x387 PF: > { %s2760_s25 = sand.u32 1, %s3196_s9   ;;  %p5600_p0 = scmp.ne.s32.totalorder %s5519_s20, 0 }
 0x388   : > { %p5601_p3 = scmp.ge.s32.totalorder %s3216_s14, 2  ;;  %s2761_s16 = scalar_lea.sflag [#allocation7], %s2760_s25 }
 0x38a   : > { %p2992_p5 = pnand %p5601_p3, %p5600_p0 }
 0x38c   : > { %3191 = dma.done.wait (!%p2992_p5), %s2761_s16, 32  }
 0x38d   : > { %3193 = vsyncadd (!%p2992_p5), %s2761_s16, 4294967264  ;;  %s19_s14 = sadd.s32 1, %s3216_s14   ;;  %s5602_s9 = smov %s3200_s10 }
 0x38e   : > { %p16_p11 = scmp.ge.s32.totalorder %s19_s14, 4   ;;  %s5603_s10 = smov %s3204_s11 }
 0x38f   : > { %s5604_s11 = smov %s3377_s26  ;;  %s5605_s12 = smov %s3212_s13 }
 0x390   : > { %s5606_s13 = smov %s5608_s22  ;;  %18 = sbr.rel (!%p16_p11) target bundleno = 7 (0x7), region = 87 }
 0x397   :  { %2766 = vsyncpa [#allocation6], 1 }
 0x398   :  { %2768 = vsyncpa [#allocation6 + $0x1], 1 }
 0x399   :  { %2769 = vsyncpa [#allocation7], 1 }
 0x39a   :  { %2771 = vsyncpa [#allocation7 + $0x1], 1 }
 0x39b   :  { %2772 = vsyncpa [#allocation8], 1 }
 0x39c   :  { %2774 = vsyncpa [#allocation8 + $0x1], 1 }

</bundles_post_ra>
